<compile_context>
chip_gen: v7x
topology: tpu7x:2x2x1
jax: 0.10.0
libtpu: 0.0.40
codegen_flags: <defaults>
</compile_context>

<pallas_src>
import functools

import jax
import jax.numpy as jnp
from jax.experimental import pallas as pl
from jax.experimental.pallas import tpu as pltpu


def _pad3(v, H, W):
    """Zero-pad an (H, W) f32 map by 3 on every side -> (H+6, W+6), in-register."""
    z_side = jnp.zeros((H, 3), jnp.float32)
    z_band = jnp.zeros((3, W + 6), jnp.float32)
    row = jnp.concatenate([z_side, v, z_side], axis=1)      # (H, W+6)
    return jnp.concatenate([z_band, row, z_band], axis=0)   # (H+6, W+6)


def _spatial_attention_kernel(x_ref, w_ref, o_ref, sum_ref, max_ref, *, H, W):
    """Fused channel-stats + 7x7 conv + sigmoid.

    x_ref   : (1, tc, H, W) VMEM block (one batch element, one channel tile)
    w_ref   : (98,) SMEM conv weights: [avg-channel (49, pre-scaled by 1/C),
                                        max-channel (49)]
    o_ref   : (1, 1, H, W) output gate block (constant across the C grid axis)
    sum_ref : (H+6, W+6) VMEM scratch, zero-padded running channel sum
    max_ref : (H+6, W+6) VMEM scratch, zero-padded running channel max
    """
    c = pl.program_id(1)

    xb = x_ref[0].astype(jnp.float32)          # (tc, H, W)
    psum = _pad3(jnp.sum(xb, axis=0), H, W)    # padded partial channel sum
    pmax = _pad3(jnp.max(xb, axis=0), H, W)    # padded partial channel max

    @pl.when(c == 0)
    def _init():
        # Full-buffer stores; the zero border == Conv2d(padding=3) zero padding.
        sum_ref[...] = psum
        max_ref[...] = pmax

    @pl.when(c > 0)
    def _accumulate():
        sum_ref[...] = sum_ref[...] + psum
        # Border stays 0 (max(0, 0)); interior accumulates the true channel max.
        max_ref[...] = jnp.maximum(max_ref[...], pmax)

    @pl.when(c == pl.num_programs(1) - 1)
    def _finalize():
        # 7x7x2 cross-correlation as 98 shifted multiply-adds on the VPU;
        # scalar weights are read from SMEM and broadcast.
        acc = jnp.zeros((H, W), jnp.float32)
        for dy in range(7):
            for dx in range(7):
                acc = acc + w_ref[dy * 7 + dx] * sum_ref[dy:dy + H, dx:dx + W]
                acc = acc + w_ref[49 + dy * 7 + dx] * max_ref[dy:dy + H, dx:dx + W]
        o_ref[0, 0, :, :] = jax.nn.sigmoid(acc).astype(o_ref.dtype)


def _pick_c_tile(C, H, W, itemsize, vmem_budget_bytes=2 * 1024 * 1024):
    """Largest divisor of C whose (tc, H, W) input block stays under the budget
    (double-buffered by the Pallas pipeline -> 2x this in VMEM)."""
    per_channel = max(H * W * itemsize, 1)
    tc = max(1, min(C, vmem_budget_bytes // per_channel))
    while C % tc != 0:
        tc -= 1
    return tc


@functools.partial(jax.jit, static_argnames=("c_tile",))
def spatial_attention(x, weight, *, c_tile=None):
    """y = sigmoid(conv7x7(pad=3)([mean_c(x), max_c(x)])).

    x: (N, C, H, W) NCHW, weight: (1, 2, 7, 7) (PyTorch OIHW). Returns (N, 1, H, W).
    """
    N, C, H, W = x.shape
    assert weight.shape == (1, 2, 7, 7)

    tc = c_tile if c_tile is not None else _pick_c_tile(C, H, W, x.dtype.itemsize)
    assert C % tc == 0, f"c_tile={tc} must divide C={C}"

    # Fold the 1/C of the channel mean into the avg-channel weights so the
    # kernel only carries a running sum. Flatten to (98,) for SMEM.
    w_eff = weight[0].astype(jnp.float32) * jnp.array(
        [1.0 / C, 1.0], jnp.float32)[:, None, None]
    w_flat = w_eff.reshape(2 * 7 * 7)

    kernel = functools.partial(_spatial_attention_kernel, H=H, W=W)
    return pl.pallas_call(
        kernel,
        out_shape=jax.ShapeDtypeStruct((N, 1, H, W), x.dtype),
        grid_spec=pltpu.PrefetchScalarGridSpec(
            num_scalar_prefetch=0,
            grid=(N, C // tc),
            in_specs=[
                pl.BlockSpec((1, tc, H, W), lambda n, c: (n, c, 0, 0)),
                pl.BlockSpec(memory_space=pltpu.MemorySpace.SMEM),
            ],
            out_specs=pl.BlockSpec((1, 1, H, W), lambda n, c: (n, 0, 0, 0)),
            scratch_shapes=[
                pltpu.VMEM((H + 6, W + 6), jnp.float32),
                pltpu.VMEM((H + 6, W + 6), jnp.float32),
            ],
        ),
        compiler_params=pltpu.CompilerParams(
            dimension_semantics=("parallel", "arbitrary")),
    )(x, w_flat)


def spatial_attention_ref(x, weight):
    """Pure-JAX reference matching the PyTorch module (for validation)."""
    avg = jnp.mean(x, axis=1, keepdims=True)
    mx = jnp.max(x, axis=1, keepdims=True)
    s = jnp.concatenate([avg, mx], axis=1).astype(jnp.float32)
    y = jax.lax.conv_general_dilated(
        s, weight.astype(jnp.float32), window_strides=(1, 1),
        padding=((3, 3), (3, 3)),
        dimension_numbers=("NCHW", "OIHW", "NCHW"))
    return jax.nn.sigmoid(y).astype(x.dtype)


if __name__ == "__main__":
    key = jax.random.PRNGKey(0)
    kx1, kx2, kw = jax.random.split(key, 3)

    # Conv2d(2, 1, 7, bias=False) weight, kaiming-ish scale.
    weight = jax.random.normal(kw, (1, 2, 7, 7), jnp.float32) / (2 * 7 * 7) ** 0.5

    # Case 1: whole channel dim fits in a single C tile.
    x1 = jax.random.normal(kx1, (2, 64, 16, 16), jnp.float32)
    y1 = jax.block_until_ready(spatial_attention(x1, weight))
    assert y1.shape == (2, 1, 16, 16)
    r1 = spatial_attention_ref(x1, weight)
    assert float(jnp.max(jnp.abs(y1 - r1))) < 1e-5

    # Case 2: forced multi-step channel reduction (exercises the accumulator path).
    x2 = jax.random.normal(kx2, (1, 48, 8, 8), jnp.float32)
    y2 = jax.block_until_ready(spatial_attention(x2, weight, c_tile=16))
    assert y2.shape == (1, 1, 8, 8)
    r2 = spatial_attention_ref(x2, weight)
    assert float(jnp.max(jnp.abs(y2 - r2))) < 1e-5

    print("KERNEL_OK")
</pallas_src>

<mosaic_0001>
module attributes {stable_mosaic.version = 11 : i64} {
  func.func @_spatial_attention_kernel(%arg0: i32, %arg1: i32, %arg2: memref<1x64x16x16xf32, #tpu.memory_space<vmem>>, %arg3: memref<98xf32, #tpu.memory_space<smem>>, %arg4: memref<1x1x16x16xf32, #tpu.memory_space<vmem>>, %arg5: memref<22x22xf32, #tpu.memory_space<vmem>>, %arg6: memref<22x22xf32, #tpu.memory_space<vmem>>) attributes {dimension_semantics = [#tpu.dimension_semantics<parallel>, #tpu.dimension_semantics<arbitrary>], iteration_bounds = array<i64: 2, 1>, scalar_prefetch = 0 : i64, scratch_operands = 2 : i64, tpu.core_type = #tpu.core_type<tc>, window_params = [{transform_indices = @transform_0, window_bounds = array<i64: 1, 64, 16, 16>}, {transform_indices = @transform_1, window_bounds = array<i64: 98>}, {transform_indices = @transform_2, window_bounds = array<i64: 1, 1, 16, 16>}]} {
    %c0 = arith.constant 0 : index
    %c0_0 = arith.constant 0 : index
    %c0_1 = arith.constant 0 : index
    %c0_2 = arith.constant 0 : index
    %0 = vector.load %arg2[%c0, %c0_0, %c0_1, %c0_2] : memref<1x64x16x16xf32, #tpu.memory_space<vmem>>, vector<1x64x16x16xf32>
    %1 = vector.shape_cast %0 : vector<1x64x16x16xf32> to vector<64x16x16xf32>
    %cst = arith.constant dense<0.000000e+00> : vector<16x16xf32>
    %2 = vector.multi_reduction <add>, %1, %cst [0] : vector<64x16x16xf32> to vector<16x16xf32>
    %cst_3 = arith.constant 0.000000e+00 : f32
    %3 = vector.broadcast %cst_3 : f32 to vector<16x3xf32>
    %cst_4 = arith.constant 0.000000e+00 : f32
    %4 = vector.broadcast %cst_4 : f32 to vector<3x22xf32>
    %5 = tpu.concatenate %3, %2, %3 in 1 : vector<16x3xf32>, vector<16x16xf32>, vector<16x3xf32> -> vector<16x22xf32>
    %6 = tpu.concatenate %4, %5, %4 in 0 : vector<3x22xf32>, vector<16x22xf32>, vector<3x22xf32> -> vector<22x22xf32>
    %cst_5 = arith.constant dense<0xFF800000> : vector<16x16xf32>
    %7 = vector.multi_reduction <maximumf>, %1, %cst_5 [0] : vector<64x16x16xf32> to vector<16x16xf32>
    %cst_6 = arith.constant 0.000000e+00 : f32
    %8 = vector.broadcast %cst_6 : f32 to vector<16x3xf32>
    %cst_7 = arith.constant 0.000000e+00 : f32
    %9 = vector.broadcast %cst_7 : f32 to vector<3x22xf32>
    %10 = tpu.concatenate %8, %7, %8 in 1 : vector<16x3xf32>, vector<16x16xf32>, vector<16x3xf32> -> vector<16x22xf32>
    %11 = tpu.concatenate %9, %10, %9 in 0 : vector<3x22xf32>, vector<16x22xf32>, vector<3x22xf32> -> vector<22x22xf32>
    %c0_i32 = arith.constant 0 : i32
    %12 = arith.cmpi eq, %arg1, %c0_i32 : i32
    %13 = arith.extui %12 : i1 to i32
    %c0_i32_8 = arith.constant 0 : i32
    %14 = arith.cmpi ne, %13, %c0_i32_8 : i32
    scf.if %14 {
      %c0_13 = arith.constant 0 : index
      %c0_14 = arith.constant 0 : index
      %21 = vector.load %arg5[%c0_13, %c0_14] : memref<22x22xf32, #tpu.memory_space<vmem>>, vector<22x22xf32>
      tpu.vector_store %arg5[%c0_13, %c0_14], %6 {strides = array<i32>} : memref<22x22xf32, #tpu.memory_space<vmem>>, vector<22x22xf32>,
      %c0_15 = arith.constant 0 : index
      %c0_16 = arith.constant 0 : index
      %22 = vector.load %arg6[%c0_15, %c0_16] : memref<22x22xf32, #tpu.memory_space<vmem>>, vector<22x22xf32>
      tpu.vector_store %arg6[%c0_15, %c0_16], %11 {strides = array<i32>} : memref<22x22xf32, #tpu.memory_space<vmem>>, vector<22x22xf32>,
    } else {
    }
    %c0_i32_9 = arith.constant 0 : i32
    %15 = arith.cmpi sgt, %arg1, %c0_i32_9 : i32
    %16 = arith.extui %15 : i1 to i32
    %c0_i32_10 = arith.constant 0 : i32
    %17 = arith.cmpi ne, %16, %c0_i32_10 : i32
    scf.if %17 {
      %c0_13 = arith.constant 0 : index
      %c0_14 = arith.constant 0 : index
      %21 = vector.load %arg5[%c0_13, %c0_14] : memref<22x22xf32, #tpu.memory_space<vmem>>, vector<22x22xf32>
      %22 = arith.addf %21, %6 : vector<22x22xf32>
      %c0_15 = arith.constant 0 : index
      %c0_16 = arith.constant 0 : index
      %23 = vector.load %arg5[%c0_15, %c0_16] : memref<22x22xf32, #tpu.memory_space<vmem>>, vector<22x22xf32>
      tpu.vector_store %arg5[%c0_15, %c0_16], %22 {strides = array<i32>} : memref<22x22xf32, #tpu.memory_space<vmem>>, vector<22x22xf32>,
      %c0_17 = arith.constant 0 : index
      %c0_18 = arith.constant 0 : index
      %24 = vector.load %arg6[%c0_17, %c0_18] : memref<22x22xf32, #tpu.memory_space<vmem>>, vector<22x22xf32>
      %25 = arith.maximumf %24, %11 : vector<22x22xf32>
      %c0_19 = arith.constant 0 : index
      %c0_20 = arith.constant 0 : index
      %26 = vector.load %arg6[%c0_19, %c0_20] : memref<22x22xf32, #tpu.memory_space<vmem>>, vector<22x22xf32>
      tpu.vector_store %arg6[%c0_19, %c0_20], %25 {strides = array<i32>} : memref<22x22xf32, #tpu.memory_space<vmem>>, vector<22x22xf32>,
    } else {
    }
    %c0_i32_11 = arith.constant 0 : i32
    %18 = arith.cmpi eq, %arg1, %c0_i32_11 : i32
    %19 = arith.extui %18 : i1 to i32
    %c0_i32_12 = arith.constant 0 : i32
    %20 = arith.cmpi ne, %19, %c0_i32_12 : i32
    scf.if %20 {
      %cst_13 = arith.constant 0.000000e+00 : f32
      %21 = vector.broadcast %cst_13 : f32 to vector<16x16xf32>
      %c0_14 = arith.constant 0 : index
      %22 = memref.load %arg3[%c0_14] : memref<98xf32, #tpu.memory_space<smem>>
      %c0_15 = arith.constant 0 : index
      %c0_16 = arith.constant 0 : index
      %23 = vector.load %arg5[%c0_15, %c0_16] : memref<22x22xf32, #tpu.memory_space<vmem>>, vector<16x16xf32>
      %24 = vector.broadcast %22 : f32 to vector<16x16xf32>
      %25 = arith.mulf %24, %23 : vector<16x16xf32>
      %26 = arith.addf %21, %25 : vector<16x16xf32>
      %c49 = arith.constant 49 : index
      %27 = memref.load %arg3[%c49] : memref<98xf32, #tpu.memory_space<smem>>
      %c0_17 = arith.constant 0 : index
      %c0_18 = arith.constant 0 : index
      %28 = vector.load %arg6[%c0_17, %c0_18] : memref<22x22xf32, #tpu.memory_space<vmem>>, vector<16x16xf32>
      %29 = vector.broadcast %27 : f32 to vector<16x16xf32>
      %30 = arith.mulf %29, %28 : vector<16x16xf32>
      %31 = arith.addf %26, %30 : vector<16x16xf32>
      %c1 = arith.constant 1 : index
      %32 = memref.load %arg3[%c1] : memref<98xf32, #tpu.memory_space<smem>>
      %c0_19 = arith.constant 0 : index
      %c1_20 = arith.constant 1 : index
      %33 = vector.load %arg5[%c0_19, %c1_20] : memref<22x22xf32, #tpu.memory_space<vmem>>, vector<16x16xf32>
      %34 = vector.broadcast %32 : f32 to vector<16x16xf32>
      %35 = arith.mulf %34, %33 : vector<16x16xf32>
      %36 = arith.addf %31, %35 : vector<16x16xf32>
      %c50 = arith.constant 50 : index
      %37 = memref.load %arg3[%c50] : memref<98xf32, #tpu.memory_space<smem>>
      %c0_21 = arith.constant 0 : index
      %c1_22 = arith.constant 1 : index
      %38 = vector.load %arg6[%c0_21, %c1_22] : memref<22x22xf32, #tpu.memory_space<vmem>>, vector<16x16xf32>
      %39 = vector.broadcast %37 : f32 to vector<16x16xf32>
      %40 = arith.mulf %39, %38 : vector<16x16xf32>
      %41 = arith.addf %36, %40 : vector<16x16xf32>
      %c2 = arith.constant 2 : index
      %42 = memref.load %arg3[%c2] : memref<98xf32, #tpu.memory_space<smem>>
      %c0_23 = arith.constant 0 : index
      %c2_24 = arith.constant 2 : index
      %43 = vector.load %arg5[%c0_23, %c2_24] : memref<22x22xf32, #tpu.memory_space<vmem>>, vector<16x16xf32>
      %44 = vector.broadcast %42 : f32 to vector<16x16xf32>
      %45 = arith.mulf %44, %43 : vector<16x16xf32>
      %46 = arith.addf %41, %45 : vector<16x16xf32>
      %c51 = arith.constant 51 : index
      %47 = memref.load %arg3[%c51] : memref<98xf32, #tpu.memory_space<smem>>
      %c0_25 = arith.constant 0 : index
      %c2_26 = arith.constant 2 : index
      %48 = vector.load %arg6[%c0_25, %c2_26] : memref<22x22xf32, #tpu.memory_space<vmem>>, vector<16x16xf32>
      %49 = vector.broadcast %47 : f32 to vector<16x16xf32>
      %50 = arith.mulf %49, %48 : vector<16x16xf32>
      %51 = arith.addf %46, %50 : vector<16x16xf32>
      %c3 = arith.constant 3 : index
      %52 = memref.load %arg3[%c3] : memref<98xf32, #tpu.memory_space<smem>>
      %c0_27 = arith.constant 0 : index
      %c3_28 = arith.constant 3 : index
      %53 = vector.load %arg5[%c0_27, %c3_28] : memref<22x22xf32, #tpu.memory_space<vmem>>, vector<16x16xf32>
      %54 = vector.broadcast %52 : f32 to vector<16x16xf32>
      %55 = arith.mulf %54, %53 : vector<16x16xf32>
      %56 = arith.addf %51, %55 : vector<16x16xf32>
      %c52 = arith.constant 52 : index
      %57 = memref.load %arg3[%c52] : memref<98xf32, #tpu.memory_space<smem>>
      %c0_29 = arith.constant 0 : index
      %c3_30 = arith.constant 3 : index
      %58 = vector.load %arg6[%c0_29, %c3_30] : memref<22x22xf32, #tpu.memory_space<vmem>>, vector<16x16xf32>
      %59 = vector.broadcast %57 : f32 to vector<16x16xf32>
      %60 = arith.mulf %59, %58 : vector<16x16xf32>
      %61 = arith.addf %56, %60 : vector<16x16xf32>
      %c4 = arith.constant 4 : index
      %62 = memref.load %arg3[%c4] : memref<98xf32, #tpu.memory_space<smem>>
      %c0_31 = arith.constant 0 : index
      %c4_32 = arith.constant 4 : index
      %63 = vector.load %arg5[%c0_31, %c4_32] : memref<22x22xf32, #tpu.memory_space<vmem>>, vector<16x16xf32>
      %64 = vector.broadcast %62 : f32 to vector<16x16xf32>
      %65 = arith.mulf %64, %63 : vector<16x16xf32>
      %66 = arith.addf %61, %65 : vector<16x16xf32>
      %c53 = arith.constant 53 : index
      %67 = memref.load %arg3[%c53] : memref<98xf32, #tpu.memory_space<smem>>
      %c0_33 = arith.constant 0 : index
      %c4_34 = arith.constant 4 : index
      %68 = vector.load %arg6[%c0_33, %c4_34] : memref<22x22xf32, #tpu.memory_space<vmem>>, vector<16x16xf32>
      %69 = vector.broadcast %67 : f32 to vector<16x16xf32>
      %70 = arith.mulf %69, %68 : vector<16x16xf32>
      %71 = arith.addf %66, %70 : vector<16x16xf32>
      %c5 = arith.constant 5 : index
      %72 = memref.load %arg3[%c5] : memref<98xf32, #tpu.memory_space<smem>>
      %c0_35 = arith.constant 0 : index
      %c5_36 = arith.constant 5 : index
      %73 = vector.load %arg5[%c0_35, %c5_36] : memref<22x22xf32, #tpu.memory_space<vmem>>, vector<16x16xf32>
      %74 = vector.broadcast %72 : f32 to vector<16x16xf32>
      %75 = arith.mulf %74, %73 : vector<16x16xf32>
      %76 = arith.addf %71, %75 : vector<16x16xf32>
      %c54 = arith.constant 54 : index
      %77 = memref.load %arg3[%c54] : memref<98xf32, #tpu.memory_space<smem>>
      %c0_37 = arith.constant 0 : index
      %c5_38 = arith.constant 5 : index
      %78 = vector.load %arg6[%c0_37, %c5_38] : memref<22x22xf32, #tpu.memory_space<vmem>>, vector<16x16xf32>
      %79 = vector.broadcast %77 : f32 to vector<16x16xf32>
      %80 = arith.mulf %79, %78 : vector<16x16xf32>
      %81 = arith.addf %76, %80 : vector<16x16xf32>
      %c6 = arith.constant 6 : index
      %82 = memref.load %arg3[%c6] : memref<98xf32, #tpu.memory_space<smem>>
      %c0_39 = arith.constant 0 : index
      %c6_40 = arith.constant 6 : index
      %83 = vector.load %arg5[%c0_39, %c6_40] : memref<22x22xf32, #tpu.memory_space<vmem>>, vector<16x16xf32>
      %84 = vector.broadcast %82 : f32 to vector<16x16xf32>
      %85 = arith.mulf %84, %83 : vector<16x16xf32>
      %86 = arith.addf %81, %85 : vector<16x16xf32>
      %c55 = arith.constant 55 : index
      %87 = memref.load %arg3[%c55] : memref<98xf32, #tpu.memory_space<smem>>
      %c0_41 = arith.constant 0 : index
      %c6_42 = arith.constant 6 : index
      %88 = vector.load %arg6[%c0_41, %c6_42] : memref<22x22xf32, #tpu.memory_space<vmem>>, vector<16x16xf32>
      %89 = vector.broadcast %87 : f32 to vector<16x16xf32>
      %90 = arith.mulf %89, %88 : vector<16x16xf32>
      %91 = arith.addf %86, %90 : vector<16x16xf32>
      %c7 = arith.constant 7 : index
      %92 = memref.load %arg3[%c7] : memref<98xf32, #tpu.memory_space<smem>>
      %c1_43 = arith.constant 1 : index
      %c0_44 = arith.constant 0 : index
      %93 = vector.load %arg5[%c1_43, %c0_44] : memref<22x22xf32, #tpu.memory_space<vmem>>, vector<16x16xf32>
      %94 = vector.broadcast %92 : f32 to vector<16x16xf32>
      %95 = arith.mulf %94, %93 : vector<16x16xf32>
      %96 = arith.addf %91, %95 : vector<16x16xf32>
      %c56 = arith.constant 56 : index
      %97 = memref.load %arg3[%c56] : memref<98xf32, #tpu.memory_space<smem>>
      %c1_45 = arith.constant 1 : index
      %c0_46 = arith.constant 0 : index
      %98 = vector.load %arg6[%c1_45, %c0_46] : memref<22x22xf32, #tpu.memory_space<vmem>>, vector<16x16xf32>
      %99 = vector.broadcast %97 : f32 to vector<16x16xf32>
      %100 = arith.mulf %99, %98 : vector<16x16xf32>
      %101 = arith.addf %96, %100 : vector<16x16xf32>
      %c8 = arith.constant 8 : index
      %102 = memref.load %arg3[%c8] : memref<98xf32, #tpu.memory_space<smem>>
      %c1_47 = arith.constant 1 : index
      %c1_48 = arith.constant 1 : index
      %103 = vector.load %arg5[%c1_47, %c1_48] : memref<22x22xf32, #tpu.memory_space<vmem>>, vector<16x16xf32>
      %104 = vector.broadcast %102 : f32 to vector<16x16xf32>
      %105 = arith.mulf %104, %103 : vector<16x16xf32>
      %106 = arith.addf %101, %105 : vector<16x16xf32>
      %c57 = arith.constant 57 : index
      %107 = memref.load %arg3[%c57] : memref<98xf32, #tpu.memory_space<smem>>
      %c1_49 = arith.constant 1 : index
      %c1_50 = arith.constant 1 : index
      %108 = vector.load %arg6[%c1_49, %c1_50] : memref<22x22xf32, #tpu.memory_space<vmem>>, vector<16x16xf32>
      %109 = vector.broadcast %107 : f32 to vector<16x16xf32>
      %110 = arith.mulf %109, %108 : vector<16x16xf32>
      %111 = arith.addf %106, %110 : vector<16x16xf32>
      %c9 = arith.constant 9 : index
      %112 = memref.load %arg3[%c9] : memref<98xf32, #tpu.memory_space<smem>>
      %c1_51 = arith.constant 1 : index
      %c2_52 = arith.constant 2 : index
      %113 = vector.load %arg5[%c1_51, %c2_52] : memref<22x22xf32, #tpu.memory_space<vmem>>, vector<16x16xf32>
      %114 = vector.broadcast %112 : f32 to vector<16x16xf32>
      %115 = arith.mulf %114, %113 : vector<16x16xf32>
      %116 = arith.addf %111, %115 : vector<16x16xf32>
      %c58 = arith.constant 58 : index
      %117 = memref.load %arg3[%c58] : memref<98xf32, #tpu.memory_space<smem>>
      %c1_53 = arith.constant 1 : index
      %c2_54 = arith.constant 2 : index
      %118 = vector.load %arg6[%c1_53, %c2_54] : memref<22x22xf32, #tpu.memory_space<vmem>>, vector<16x16xf32>
      %119 = vector.broadcast %117 : f32 to vector<16x16xf32>
      %120 = arith.mulf %119, %118 : vector<16x16xf32>
      %121 = arith.addf %116, %120 : vector<16x16xf32>
      %c10 = arith.constant 10 : index
      %122 = memref.load %arg3[%c10] : memref<98xf32, #tpu.memory_space<smem>>
      %c1_55 = arith.constant 1 : index
      %c3_56 = arith.constant 3 : index
      %123 = vector.load %arg5[%c1_55, %c3_56] : memref<22x22xf32, #tpu.memory_space<vmem>>, vector<16x16xf32>
      %124 = vector.broadcast %122 : f32 to vector<16x16xf32>
      %125 = arith.mulf %124, %123 : vector<16x16xf32>
      %126 = arith.addf %121, %125 : vector<16x16xf32>
      %c59 = arith.constant 59 : index
      %127 = memref.load %arg3[%c59] : memref<98xf32, #tpu.memory_space<smem>>
      %c1_57 = arith.constant 1 : index
      %c3_58 = arith.constant 3 : index
      %128 = vector.load %arg6[%c1_57, %c3_58] : memref<22x22xf32, #tpu.memory_space<vmem>>, vector<16x16xf32>
      %129 = vector.broadcast %127 : f32 to vector<16x16xf32>
      %130 = arith.mulf %129, %128 : vector<16x16xf32>
      %131 = arith.addf %126, %130 : vector<16x16xf32>
      %c11 = arith.constant 11 : index
      %132 = memref.load %arg3[%c11] : memref<98xf32, #tpu.memory_space<smem>>
      %c1_59 = arith.constant 1 : index
      %c4_60 = arith.constant 4 : index
      %133 = vector.load %arg5[%c1_59, %c4_60] : memref<22x22xf32, #tpu.memory_space<vmem>>, vector<16x16xf32>
      %134 = vector.broadcast %132 : f32 to vector<16x16xf32>
      %135 = arith.mulf %134, %133 : vector<16x16xf32>
      %136 = arith.addf %131, %135 : vector<16x16xf32>
      %c60 = arith.constant 60 : index
      %137 = memref.load %arg3[%c60] : memref<98xf32, #tpu.memory_space<smem>>
      %c1_61 = arith.constant 1 : index
      %c4_62 = arith.constant 4 : index
      %138 = vector.load %arg6[%c1_61, %c4_62] : memref<22x22xf32, #tpu.memory_space<vmem>>, vector<16x16xf32>
      %139 = vector.broadcast %137 : f32 to vector<16x16xf32>
      %140 = arith.mulf %139, %138 : vector<16x16xf32>
      %141 = arith.addf %136, %140 : vector<16x16xf32>
      %c12 = arith.constant 12 : index
      %142 = memref.load %arg3[%c12] : memref<98xf32, #tpu.memory_space<smem>>
      %c1_63 = arith.constant 1 : index
      %c5_64 = arith.constant 5 : index
      %143 = vector.load %arg5[%c1_63, %c5_64] : memref<22x22xf32, #tpu.memory_space<vmem>>, vector<16x16xf32>
      %144 = vector.broadcast %142 : f32 to vector<16x16xf32>
      %145 = arith.mulf %144, %143 : vector<16x16xf32>
      %146 = arith.addf %141, %145 : vector<16x16xf32>
      %c61 = arith.constant 61 : index
      %147 = memref.load %arg3[%c61] : memref<98xf32, #tpu.memory_space<smem>>
      %c1_65 = arith.constant 1 : index
      %c5_66 = arith.constant 5 : index
      %148 = vector.load %arg6[%c1_65, %c5_66] : memref<22x22xf32, #tpu.memory_space<vmem>>, vector<16x16xf32>
      %149 = vector.broadcast %147 : f32 to vector<16x16xf32>
      %150 = arith.mulf %149, %148 : vector<16x16xf32>
      %151 = arith.addf %146, %150 : vector<16x16xf32>
      %c13 = arith.constant 13 : index
      %152 = memref.load %arg3[%c13] : memref<98xf32, #tpu.memory_space<smem>>
      %c1_67 = arith.constant 1 : index
      %c6_68 = arith.constant 6 : index
      %153 = vector.load %arg5[%c1_67, %c6_68] : memref<22x22xf32, #tpu.memory_space<vmem>>, vector<16x16xf32>
      %154 = vector.broadcast %152 : f32 to vector<16x16xf32>
      %155 = arith.mulf %154, %153 : vector<16x16xf32>
      %156 = arith.addf %151, %155 : vector<16x16xf32>
      %c62 = arith.constant 62 : index
      %157 = memref.load %arg3[%c62] : memref<98xf32, #tpu.memory_space<smem>>
      %c1_69 = arith.constant 1 : index
      %c6_70 = arith.constant 6 : index
      %158 = vector.load %arg6[%c1_69, %c6_70] : memref<22x22xf32, #tpu.memory_space<vmem>>, vector<16x16xf32>
      %159 = vector.broadcast %157 : f32 to vector<16x16xf32>
      %160 = arith.mulf %159, %158 : vector<16x16xf32>
      %161 = arith.addf %156, %160 : vector<16x16xf32>
      %c14 = arith.constant 14 : index
      %162 = memref.load %arg3[%c14] : memref<98xf32, #tpu.memory_space<smem>>
      %c2_71 = arith.constant 2 : index
      %c0_72 = arith.constant 0 : index
      %163 = vector.load %arg5[%c2_71, %c0_72] : memref<22x22xf32, #tpu.memory_space<vmem>>, vector<16x16xf32>
      %164 = vector.broadcast %162 : f32 to vector<16x16xf32>
      %165 = arith.mulf %164, %163 : vector<16x16xf32>
      %166 = arith.addf %161, %165 : vector<16x16xf32>
      %c63 = arith.constant 63 : index
      %167 = memref.load %arg3[%c63] : memref<98xf32, #tpu.memory_space<smem>>
      %c2_73 = arith.constant 2 : index
      %c0_74 = arith.constant 0 : index
      %168 = vector.load %arg6[%c2_73, %c0_74] : memref<22x22xf32, #tpu.memory_space<vmem>>, vector<16x16xf32>
      %169 = vector.broadcast %167 : f32 to vector<16x16xf32>
      %170 = arith.mulf %169, %168 : vector<16x16xf32>
      %171 = arith.addf %166, %170 : vector<16x16xf32>
      %c15 = arith.constant 15 : index
      %172 = memref.load %arg3[%c15] : memref<98xf32, #tpu.memory_space<smem>>
      %c2_75 = arith.constant 2 : index
      %c1_76 = arith.constant 1 : index
      %173 = vector.load %arg5[%c2_75, %c1_76] : memref<22x22xf32, #tpu.memory_space<vmem>>, vector<16x16xf32>
      %174 = vector.broadcast %172 : f32 to vector<16x16xf32>
      %175 = arith.mulf %174, %173 : vector<16x16xf32>
      %176 = arith.addf %171, %175 : vector<16x16xf32>
      %c64 = arith.constant 64 : index
      %177 = memref.load %arg3[%c64] : memref<98xf32, #tpu.memory_space<smem>>
      %c2_77 = arith.constant 2 : index
      %c1_78 = arith.constant 1 : index
      %178 = vector.load %arg6[%c2_77, %c1_78] : memref<22x22xf32, #tpu.memory_space<vmem>>, vector<16x16xf32>
      %179 = vector.broadcast %177 : f32 to vector<16x16xf32>
      %180 = arith.mulf %179, %178 : vector<16x16xf32>
      %181 = arith.addf %176, %180 : vector<16x16xf32>
      %c16 = arith.constant 16 : index
      %182 = memref.load %arg3[%c16] : memref<98xf32, #tpu.memory_space<smem>>
      %c2_79 = arith.constant 2 : index
      %c2_80 = arith.constant 2 : index
      %183 = vector.load %arg5[%c2_79, %c2_80] : memref<22x22xf32, #tpu.memory_space<vmem>>, vector<16x16xf32>
      %184 = vector.broadcast %182 : f32 to vector<16x16xf32>
      %185 = arith.mulf %184, %183 : vector<16x16xf32>
      %186 = arith.addf %181, %185 : vector<16x16xf32>
      %c65 = arith.constant 65 : index
      %187 = memref.load %arg3[%c65] : memref<98xf32, #tpu.memory_space<smem>>
      %c2_81 = arith.constant 2 : index
      %c2_82 = arith.constant 2 : index
      %188 = vector.load %arg6[%c2_81, %c2_82] : memref<22x22xf32, #tpu.memory_space<vmem>>, vector<16x16xf32>
      %189 = vector.broadcast %187 : f32 to vector<16x16xf32>
      %190 = arith.mulf %189, %188 : vector<16x16xf32>
      %191 = arith.addf %186, %190 : vector<16x16xf32>
      %c17 = arith.constant 17 : index
      %192 = memref.load %arg3[%c17] : memref<98xf32, #tpu.memory_space<smem>>
      %c2_83 = arith.constant 2 : index
      %c3_84 = arith.constant 3 : index
      %193 = vector.load %arg5[%c2_83, %c3_84] : memref<22x22xf32, #tpu.memory_space<vmem>>, vector<16x16xf32>
      %194 = vector.broadcast %192 : f32 to vector<16x16xf32>
      %195 = arith.mulf %194, %193 : vector<16x16xf32>
      %196 = arith.addf %191, %195 : vector<16x16xf32>
      %c66 = arith.constant 66 : index
      %197 = memref.load %arg3[%c66] : memref<98xf32, #tpu.memory_space<smem>>
      %c2_85 = arith.constant 2 : index
      %c3_86 = arith.constant 3 : index
      %198 = vector.load %arg6[%c2_85, %c3_86] : memref<22x22xf32, #tpu.memory_space<vmem>>, vector<16x16xf32>
      %199 = vector.broadcast %197 : f32 to vector<16x16xf32>
      %200 = arith.mulf %199, %198 : vector<16x16xf32>
      %201 = arith.addf %196, %200 : vector<16x16xf32>
      %c18 = arith.constant 18 : index
      %202 = memref.load %arg3[%c18] : memref<98xf32, #tpu.memory_space<smem>>
      %c2_87 = arith.constant 2 : index
      %c4_88 = arith.constant 4 : index
      %203 = vector.load %arg5[%c2_87, %c4_88] : memref<22x22xf32, #tpu.memory_space<vmem>>, vector<16x16xf32>
      %204 = vector.broadcast %202 : f32 to vector<16x16xf32>
      %205 = arith.mulf %204, %203 : vector<16x16xf32>
      %206 = arith.addf %201, %205 : vector<16x16xf32>
      %c67 = arith.constant 67 : index
      %207 = memref.load %arg3[%c67] : memref<98xf32, #tpu.memory_space<smem>>
      %c2_89 = arith.constant 2 : index
      %c4_90 = arith.constant 4 : index
      %208 = vector.load %arg6[%c2_89, %c4_90] : memref<22x22xf32, #tpu.memory_space<vmem>>, vector<16x16xf32>
      %209 = vector.broadcast %207 : f32 to vector<16x16xf32>
      %210 = arith.mulf %209, %208 : vector<16x16xf32>
      %211 = arith.addf %206, %210 : vector<16x16xf32>
      %c19 = arith.constant 19 : index
      %212 = memref.load %arg3[%c19] : memref<98xf32, #tpu.memory_space<smem>>
      %c2_91 = arith.constant 2 : index
      %c5_92 = arith.constant 5 : index
      %213 = vector.load %arg5[%c2_91, %c5_92] : memref<22x22xf32, #tpu.memory_space<vmem>>, vector<16x16xf32>
      %214 = vector.broadcast %212 : f32 to vector<16x16xf32>
      %215 = arith.mulf %214, %213 : vector<16x16xf32>
      %216 = arith.addf %211, %215 : vector<16x16xf32>
      %c68 = arith.constant 68 : index
      %217 = memref.load %arg3[%c68] : memref<98xf32, #tpu.memory_space<smem>>
      %c2_93 = arith.constant 2 : index
      %c5_94 = arith.constant 5 : index
      %218 = vector.load %arg6[%c2_93, %c5_94] : memref<22x22xf32, #tpu.memory_space<vmem>>, vector<16x16xf32>
      %219 = vector.broadcast %217 : f32 to vector<16x16xf32>
      %220 = arith.mulf %219, %218 : vector<16x16xf32>
      %221 = arith.addf %216, %220 : vector<16x16xf32>
      %c20 = arith.constant 20 : index
      %222 = memref.load %arg3[%c20] : memref<98xf32, #tpu.memory_space<smem>>
      %c2_95 = arith.constant 2 : index
      %c6_96 = arith.constant 6 : index
      %223 = vector.load %arg5[%c2_95, %c6_96] : memref<22x22xf32, #tpu.memory_space<vmem>>, vector<16x16xf32>
      %224 = vector.broadcast %222 : f32 to vector<16x16xf32>
      %225 = arith.mulf %224, %223 : vector<16x16xf32>
      %226 = arith.addf %221, %225 : vector<16x16xf32>
      %c69 = arith.constant 69 : index
      %227 = memref.load %arg3[%c69] : memref<98xf32, #tpu.memory_space<smem>>
      %c2_97 = arith.constant 2 : index
      %c6_98 = arith.constant 6 : index
      %228 = vector.load %arg6[%c2_97, %c6_98] : memref<22x22xf32, #tpu.memory_space<vmem>>, vector<16x16xf32>
      %229 = vector.broadcast %227 : f32 to vector<16x16xf32>
      %230 = arith.mulf %229, %228 : vector<16x16xf32>
      %231 = arith.addf %226, %230 : vector<16x16xf32>
      %c21 = arith.constant 21 : index
      %232 = memref.load %arg3[%c21] : memref<98xf32, #tpu.memory_space<smem>>
      %c3_99 = arith.constant 3 : index
      %c0_100 = arith.constant 0 : index
      %233 = vector.load %arg5[%c3_99, %c0_100] : memref<22x22xf32, #tpu.memory_space<vmem>>, vector<16x16xf32>
      %234 = vector.broadcast %232 : f32 to vector<16x16xf32>
      %235 = arith.mulf %234, %233 : vector<16x16xf32>
      %236 = arith.addf %231, %235 : vector<16x16xf32>
      %c70 = arith.constant 70 : index
      %237 = memref.load %arg3[%c70] : memref<98xf32, #tpu.memory_space<smem>>
      %c3_101 = arith.constant 3 : index
      %c0_102 = arith.constant 0 : index
      %238 = vector.load %arg6[%c3_101, %c0_102] : memref<22x22xf32, #tpu.memory_space<vmem>>, vector<16x16xf32>
      %239 = vector.broadcast %237 : f32 to vector<16x16xf32>
      %240 = arith.mulf %239, %238 : vector<16x16xf32>
      %241 = arith.addf %236, %240 : vector<16x16xf32>
      %c22 = arith.constant 22 : index
      %242 = memref.load %arg3[%c22] : memref<98xf32, #tpu.memory_space<smem>>
      %c3_103 = arith.constant 3 : index
      %c1_104 = arith.constant 1 : index
      %243 = vector.load %arg5[%c3_103, %c1_104] : memref<22x22xf32, #tpu.memory_space<vmem>>, vector<16x16xf32>
      %244 = vector.broadcast %242 : f32 to vector<16x16xf32>
      %245 = arith.mulf %244, %243 : vector<16x16xf32>
      %246 = arith.addf %241, %245 : vector<16x16xf32>
      %c71 = arith.constant 71 : index
      %247 = memref.load %arg3[%c71] : memref<98xf32, #tpu.memory_space<smem>>
      %c3_105 = arith.constant 3 : index
      %c1_106 = arith.constant 1 : index
      %248 = vector.load %arg6[%c3_105, %c1_106] : memref<22x22xf32, #tpu.memory_space<vmem>>, vector<16x16xf32>
      %249 = vector.broadcast %247 : f32 to vector<16x16xf32>
      %250 = arith.mulf %249, %248 : vector<16x16xf32>
      %251 = arith.addf %246, %250 : vector<16x16xf32>
      %c23 = arith.constant 23 : index
      %252 = memref.load %arg3[%c23] : memref<98xf32, #tpu.memory_space<smem>>
      %c3_107 = arith.constant 3 : index
      %c2_108 = arith.constant 2 : index
      %253 = vector.load %arg5[%c3_107, %c2_108] : memref<22x22xf32, #tpu.memory_space<vmem>>, vector<16x16xf32>
      %254 = vector.broadcast %252 : f32 to vector<16x16xf32>
      %255 = arith.mulf %254, %253 : vector<16x16xf32>
      %256 = arith.addf %251, %255 : vector<16x16xf32>
      %c72 = arith.constant 72 : index
      %257 = memref.load %arg3[%c72] : memref<98xf32, #tpu.memory_space<smem>>
      %c3_109 = arith.constant 3 : index
      %c2_110 = arith.constant 2 : index
      %258 = vector.load %arg6[%c3_109, %c2_110] : memref<22x22xf32, #tpu.memory_space<vmem>>, vector<16x16xf32>
      %259 = vector.broadcast %257 : f32 to vector<16x16xf32>
      %260 = arith.mulf %259, %258 : vector<16x16xf32>
      %261 = arith.addf %256, %260 : vector<16x16xf32>
      %c24 = arith.constant 24 : index
      %262 = memref.load %arg3[%c24] : memref<98xf32, #tpu.memory_space<smem>>
      %c3_111 = arith.constant 3 : index
      %c3_112 = arith.constant 3 : index
      %263 = vector.load %arg5[%c3_111, %c3_112] : memref<22x22xf32, #tpu.memory_space<vmem>>, vector<16x16xf32>
      %264 = vector.broadcast %262 : f32 to vector<16x16xf32>
      %265 = arith.mulf %264, %263 : vector<16x16xf32>
      %266 = arith.addf %261, %265 : vector<16x16xf32>
      %c73 = arith.constant 73 : index
      %267 = memref.load %arg3[%c73] : memref<98xf32, #tpu.memory_space<smem>>
      %c3_113 = arith.constant 3 : index
      %c3_114 = arith.constant 3 : index
      %268 = vector.load %arg6[%c3_113, %c3_114] : memref<22x22xf32, #tpu.memory_space<vmem>>, vector<16x16xf32>
      %269 = vector.broadcast %267 : f32 to vector<16x16xf32>
      %270 = arith.mulf %269, %268 : vector<16x16xf32>
      %271 = arith.addf %266, %270 : vector<16x16xf32>
      %c25 = arith.constant 25 : index
      %272 = memref.load %arg3[%c25] : memref<98xf32, #tpu.memory_space<smem>>
      %c3_115 = arith.constant 3 : index
      %c4_116 = arith.constant 4 : index
      %273 = vector.load %arg5[%c3_115, %c4_116] : memref<22x22xf32, #tpu.memory_space<vmem>>, vector<16x16xf32>
      %274 = vector.broadcast %272 : f32 to vector<16x16xf32>
      %275 = arith.mulf %274, %273 : vector<16x16xf32>
      %276 = arith.addf %271, %275 : vector<16x16xf32>
      %c74 = arith.constant 74 : index
      %277 = memref.load %arg3[%c74] : memref<98xf32, #tpu.memory_space<smem>>
      %c3_117 = arith.constant 3 : index
      %c4_118 = arith.constant 4 : index
      %278 = vector.load %arg6[%c3_117, %c4_118] : memref<22x22xf32, #tpu.memory_space<vmem>>, vector<16x16xf32>
      %279 = vector.broadcast %277 : f32 to vector<16x16xf32>
      %280 = arith.mulf %279, %278 : vector<16x16xf32>
      %281 = arith.addf %276, %280 : vector<16x16xf32>
      %c26 = arith.constant 26 : index
      %282 = memref.load %arg3[%c26] : memref<98xf32, #tpu.memory_space<smem>>
      %c3_119 = arith.constant 3 : index
      %c5_120 = arith.constant 5 : index
      %283 = vector.load %arg5[%c3_119, %c5_120] : memref<22x22xf32, #tpu.memory_space<vmem>>, vector<16x16xf32>
      %284 = vector.broadcast %282 : f32 to vector<16x16xf32>
      %285 = arith.mulf %284, %283 : vector<16x16xf32>
      %286 = arith.addf %281, %285 : vector<16x16xf32>
      %c75 = arith.constant 75 : index
      %287 = memref.load %arg3[%c75] : memref<98xf32, #tpu.memory_space<smem>>
      %c3_121 = arith.constant 3 : index
      %c5_122 = arith.constant 5 : index
      %288 = vector.load %arg6[%c3_121, %c5_122] : memref<22x22xf32, #tpu.memory_space<vmem>>, vector<16x16xf32>
      %289 = vector.broadcast %287 : f32 to vector<16x16xf32>
      %290 = arith.mulf %289, %288 : vector<16x16xf32>
      %291 = arith.addf %286, %290 : vector<16x16xf32>
      %c27 = arith.constant 27 : index
      %292 = memref.load %arg3[%c27] : memref<98xf32, #tpu.memory_space<smem>>
      %c3_123 = arith.constant 3 : index
      %c6_124 = arith.constant 6 : index
      %293 = vector.load %arg5[%c3_123, %c6_124] : memref<22x22xf32, #tpu.memory_space<vmem>>, vector<16x16xf32>
      %294 = vector.broadcast %292 : f32 to vector<16x16xf32>
      %295 = arith.mulf %294, %293 : vector<16x16xf32>
      %296 = arith.addf %291, %295 : vector<16x16xf32>
      %c76 = arith.constant 76 : index
      %297 = memref.load %arg3[%c76] : memref<98xf32, #tpu.memory_space<smem>>
      %c3_125 = arith.constant 3 : index
      %c6_126 = arith.constant 6 : index
      %298 = vector.load %arg6[%c3_125, %c6_126] : memref<22x22xf32, #tpu.memory_space<vmem>>, vector<16x16xf32>
      %299 = vector.broadcast %297 : f32 to vector<16x16xf32>
      %300 = arith.mulf %299, %298 : vector<16x16xf32>
      %301 = arith.addf %296, %300 : vector<16x16xf32>
      %c28 = arith.constant 28 : index
      %302 = memref.load %arg3[%c28] : memref<98xf32, #tpu.memory_space<smem>>
      %c4_127 = arith.constant 4 : index
      %c0_128 = arith.constant 0 : index
      %303 = vector.load %arg5[%c4_127, %c0_128] : memref<22x22xf32, #tpu.memory_space<vmem>>, vector<16x16xf32>
      %304 = vector.broadcast %302 : f32 to vector<16x16xf32>
      %305 = arith.mulf %304, %303 : vector<16x16xf32>
      %306 = arith.addf %301, %305 : vector<16x16xf32>
      %c77 = arith.constant 77 : index
      %307 = memref.load %arg3[%c77] : memref<98xf32, #tpu.memory_space<smem>>
      %c4_129 = arith.constant 4 : index
      %c0_130 = arith.constant 0 : index
      %308 = vector.load %arg6[%c4_129, %c0_130] : memref<22x22xf32, #tpu.memory_space<vmem>>, vector<16x16xf32>
      %309 = vector.broadcast %307 : f32 to vector<16x16xf32>
      %310 = arith.mulf %309, %308 : vector<16x16xf32>
      %311 = arith.addf %306, %310 : vector<16x16xf32>
      %c29 = arith.constant 29 : index
      %312 = memref.load %arg3[%c29] : memref<98xf32, #tpu.memory_space<smem>>
      %c4_131 = arith.constant 4 : index
      %c1_132 = arith.constant 1 : index
      %313 = vector.load %arg5[%c4_131, %c1_132] : memref<22x22xf32, #tpu.memory_space<vmem>>, vector<16x16xf32>
      %314 = vector.broadcast %312 : f32 to vector<16x16xf32>
      %315 = arith.mulf %314, %313 : vector<16x16xf32>
      %316 = arith.addf %311, %315 : vector<16x16xf32>
      %c78 = arith.constant 78 : index
      %317 = memref.load %arg3[%c78] : memref<98xf32, #tpu.memory_space<smem>>
      %c4_133 = arith.constant 4 : index
      %c1_134 = arith.constant 1 : index
      %318 = vector.load %arg6[%c4_133, %c1_134] : memref<22x22xf32, #tpu.memory_space<vmem>>, vector<16x16xf32>
      %319 = vector.broadcast %317 : f32 to vector<16x16xf32>
      %320 = arith.mulf %319, %318 : vector<16x16xf32>
      %321 = arith.addf %316, %320 : vector<16x16xf32>
      %c30 = arith.constant 30 : index
      %322 = memref.load %arg3[%c30] : memref<98xf32, #tpu.memory_space<smem>>
      %c4_135 = arith.constant 4 : index
      %c2_136 = arith.constant 2 : index
      %323 = vector.load %arg5[%c4_135, %c2_136] : memref<22x22xf32, #tpu.memory_space<vmem>>, vector<16x16xf32>
      %324 = vector.broadcast %322 : f32 to vector<16x16xf32>
      %325 = arith.mulf %324, %323 : vector<16x16xf32>
      %326 = arith.addf %321, %325 : vector<16x16xf32>
      %c79 = arith.constant 79 : index
      %327 = memref.load %arg3[%c79] : memref<98xf32, #tpu.memory_space<smem>>
      %c4_137 = arith.constant 4 : index
      %c2_138 = arith.constant 2 : index
      %328 = vector.load %arg6[%c4_137, %c2_138] : memref<22x22xf32, #tpu.memory_space<vmem>>, vector<16x16xf32>
      %329 = vector.broadcast %327 : f32 to vector<16x16xf32>
      %330 = arith.mulf %329, %328 : vector<16x16xf32>
      %331 = arith.addf %326, %330 : vector<16x16xf32>
      %c31 = arith.constant 31 : index
      %332 = memref.load %arg3[%c31] : memref<98xf32, #tpu.memory_space<smem>>
      %c4_139 = arith.constant 4 : index
      %c3_140 = arith.constant 3 : index
      %333 = vector.load %arg5[%c4_139, %c3_140] : memref<22x22xf32, #tpu.memory_space<vmem>>, vector<16x16xf32>
      %334 = vector.broadcast %332 : f32 to vector<16x16xf32>
      %335 = arith.mulf %334, %333 : vector<16x16xf32>
      %336 = arith.addf %331, %335 : vector<16x16xf32>
      %c80 = arith.constant 80 : index
      %337 = memref.load %arg3[%c80] : memref<98xf32, #tpu.memory_space<smem>>
      %c4_141 = arith.constant 4 : index
      %c3_142 = arith.constant 3 : index
      %338 = vector.load %arg6[%c4_141, %c3_142] : memref<22x22xf32, #tpu.memory_space<vmem>>, vector<16x16xf32>
      %339 = vector.broadcast %337 : f32 to vector<16x16xf32>
      %340 = arith.mulf %339, %338 : vector<16x16xf32>
      %341 = arith.addf %336, %340 : vector<16x16xf32>
      %c32 = arith.constant 32 : index
      %342 = memref.load %arg3[%c32] : memref<98xf32, #tpu.memory_space<smem>>
      %c4_143 = arith.constant 4 : index
      %c4_144 = arith.constant 4 : index
      %343 = vector.load %arg5[%c4_143, %c4_144] : memref<22x22xf32, #tpu.memory_space<vmem>>, vector<16x16xf32>
      %344 = vector.broadcast %342 : f32 to vector<16x16xf32>
      %345 = arith.mulf %344, %343 : vector<16x16xf32>
      %346 = arith.addf %341, %345 : vector<16x16xf32>
      %c81 = arith.constant 81 : index
      %347 = memref.load %arg3[%c81] : memref<98xf32, #tpu.memory_space<smem>>
      %c4_145 = arith.constant 4 : index
      %c4_146 = arith.constant 4 : index
      %348 = vector.load %arg6[%c4_145, %c4_146] : memref<22x22xf32, #tpu.memory_space<vmem>>, vector<16x16xf32>
      %349 = vector.broadcast %347 : f32 to vector<16x16xf32>
      %350 = arith.mulf %349, %348 : vector<16x16xf32>
      %351 = arith.addf %346, %350 : vector<16x16xf32>
      %c33 = arith.constant 33 : index
      %352 = memref.load %arg3[%c33] : memref<98xf32, #tpu.memory_space<smem>>
      %c4_147 = arith.constant 4 : index
      %c5_148 = arith.constant 5 : index
      %353 = vector.load %arg5[%c4_147, %c5_148] : memref<22x22xf32, #tpu.memory_space<vmem>>, vector<16x16xf32>
      %354 = vector.broadcast %352 : f32 to vector<16x16xf32>
      %355 = arith.mulf %354, %353 : vector<16x16xf32>
      %356 = arith.addf %351, %355 : vector<16x16xf32>
      %c82 = arith.constant 82 : index
      %357 = memref.load %arg3[%c82] : memref<98xf32, #tpu.memory_space<smem>>
      %c4_149 = arith.constant 4 : index
      %c5_150 = arith.constant 5 : index
      %358 = vector.load %arg6[%c4_149, %c5_150] : memref<22x22xf32, #tpu.memory_space<vmem>>, vector<16x16xf32>
      %359 = vector.broadcast %357 : f32 to vector<16x16xf32>
      %360 = arith.mulf %359, %358 : vector<16x16xf32>
      %361 = arith.addf %356, %360 : vector<16x16xf32>
      %c34 = arith.constant 34 : index
      %362 = memref.load %arg3[%c34] : memref<98xf32, #tpu.memory_space<smem>>
      %c4_151 = arith.constant 4 : index
      %c6_152 = arith.constant 6 : index
      %363 = vector.load %arg5[%c4_151, %c6_152] : memref<22x22xf32, #tpu.memory_space<vmem>>, vector<16x16xf32>
      %364 = vector.broadcast %362 : f32 to vector<16x16xf32>
      %365 = arith.mulf %364, %363 : vector<16x16xf32>
      %366 = arith.addf %361, %365 : vector<16x16xf32>
      %c83 = arith.constant 83 : index
      %367 = memref.load %arg3[%c83] : memref<98xf32, #tpu.memory_space<smem>>
      %c4_153 = arith.constant 4 : index
      %c6_154 = arith.constant 6 : index
      %368 = vector.load %arg6[%c4_153, %c6_154] : memref<22x22xf32, #tpu.memory_space<vmem>>, vector<16x16xf32>
      %369 = vector.broadcast %367 : f32 to vector<16x16xf32>
      %370 = arith.mulf %369, %368 : vector<16x16xf32>
      %371 = arith.addf %366, %370 : vector<16x16xf32>
      %c35 = arith.constant 35 : index
      %372 = memref.load %arg3[%c35] : memref<98xf32, #tpu.memory_space<smem>>
      %c5_155 = arith.constant 5 : index
      %c0_156 = arith.constant 0 : index
      %373 = vector.load %arg5[%c5_155, %c0_156] : memref<22x22xf32, #tpu.memory_space<vmem>>, vector<16x16xf32>
      %374 = vector.broadcast %372 : f32 to vector<16x16xf32>
      %375 = arith.mulf %374, %373 : vector<16x16xf32>
      %376 = arith.addf %371, %375 : vector<16x16xf32>
      %c84 = arith.constant 84 : index
      %377 = memref.load %arg3[%c84] : memref<98xf32, #tpu.memory_space<smem>>
      %c5_157 = arith.constant 5 : index
      %c0_158 = arith.constant 0 : index
      %378 = vector.load %arg6[%c5_157, %c0_158] : memref<22x22xf32, #tpu.memory_space<vmem>>, vector<16x16xf32>
      %379 = vector.broadcast %377 : f32 to vector<16x16xf32>
      %380 = arith.mulf %379, %378 : vector<16x16xf32>
      %381 = arith.addf %376, %380 : vector<16x16xf32>
      %c36 = arith.constant 36 : index
      %382 = memref.load %arg3[%c36] : memref<98xf32, #tpu.memory_space<smem>>
      %c5_159 = arith.constant 5 : index
      %c1_160 = arith.constant 1 : index
      %383 = vector.load %arg5[%c5_159, %c1_160] : memref<22x22xf32, #tpu.memory_space<vmem>>, vector<16x16xf32>
      %384 = vector.broadcast %382 : f32 to vector<16x16xf32>
      %385 = arith.mulf %384, %383 : vector<16x16xf32>
      %386 = arith.addf %381, %385 : vector<16x16xf32>
      %c85 = arith.constant 85 : index
      %387 = memref.load %arg3[%c85] : memref<98xf32, #tpu.memory_space<smem>>
      %c5_161 = arith.constant 5 : index
      %c1_162 = arith.constant 1 : index
      %388 = vector.load %arg6[%c5_161, %c1_162] : memref<22x22xf32, #tpu.memory_space<vmem>>, vector<16x16xf32>
      %389 = vector.broadcast %387 : f32 to vector<16x16xf32>
      %390 = arith.mulf %389, %388 : vector<16x16xf32>
      %391 = arith.addf %386, %390 : vector<16x16xf32>
      %c37 = arith.constant 37 : index
      %392 = memref.load %arg3[%c37] : memref<98xf32, #tpu.memory_space<smem>>
      %c5_163 = arith.constant 5 : index
      %c2_164 = arith.constant 2 : index
      %393 = vector.load %arg5[%c5_163, %c2_164] : memref<22x22xf32, #tpu.memory_space<vmem>>, vector<16x16xf32>
      %394 = vector.broadcast %392 : f32 to vector<16x16xf32>
      %395 = arith.mulf %394, %393 : vector<16x16xf32>
      %396 = arith.addf %391, %395 : vector<16x16xf32>
      %c86 = arith.constant 86 : index
      %397 = memref.load %arg3[%c86] : memref<98xf32, #tpu.memory_space<smem>>
      %c5_165 = arith.constant 5 : index
      %c2_166 = arith.constant 2 : index
      %398 = vector.load %arg6[%c5_165, %c2_166] : memref<22x22xf32, #tpu.memory_space<vmem>>, vector<16x16xf32>
      %399 = vector.broadcast %397 : f32 to vector<16x16xf32>
      %400 = arith.mulf %399, %398 : vector<16x16xf32>
      %401 = arith.addf %396, %400 : vector<16x16xf32>
      %c38 = arith.constant 38 : index
      %402 = memref.load %arg3[%c38] : memref<98xf32, #tpu.memory_space<smem>>
      %c5_167 = arith.constant 5 : index
      %c3_168 = arith.constant 3 : index
      %403 = vector.load %arg5[%c5_167, %c3_168] : memref<22x22xf32, #tpu.memory_space<vmem>>, vector<16x16xf32>
      %404 = vector.broadcast %402 : f32 to vector<16x16xf32>
      %405 = arith.mulf %404, %403 : vector<16x16xf32>
      %406 = arith.addf %401, %405 : vector<16x16xf32>
      %c87 = arith.constant 87 : index
      %407 = memref.load %arg3[%c87] : memref<98xf32, #tpu.memory_space<smem>>
      %c5_169 = arith.constant 5 : index
      %c3_170 = arith.constant 3 : index
      %408 = vector.load %arg6[%c5_169, %c3_170] : memref<22x22xf32, #tpu.memory_space<vmem>>, vector<16x16xf32>
      %409 = vector.broadcast %407 : f32 to vector<16x16xf32>
      %410 = arith.mulf %409, %408 : vector<16x16xf32>
      %411 = arith.addf %406, %410 : vector<16x16xf32>
      %c39 = arith.constant 39 : index
      %412 = memref.load %arg3[%c39] : memref<98xf32, #tpu.memory_space<smem>>
      %c5_171 = arith.constant 5 : index
      %c4_172 = arith.constant 4 : index
      %413 = vector.load %arg5[%c5_171, %c4_172] : memref<22x22xf32, #tpu.memory_space<vmem>>, vector<16x16xf32>
      %414 = vector.broadcast %412 : f32 to vector<16x16xf32>
      %415 = arith.mulf %414, %413 : vector<16x16xf32>
      %416 = arith.addf %411, %415 : vector<16x16xf32>
      %c88 = arith.constant 88 : index
      %417 = memref.load %arg3[%c88] : memref<98xf32, #tpu.memory_space<smem>>
      %c5_173 = arith.constant 5 : index
      %c4_174 = arith.constant 4 : index
      %418 = vector.load %arg6[%c5_173, %c4_174] : memref<22x22xf32, #tpu.memory_space<vmem>>, vector<16x16xf32>
      %419 = vector.broadcast %417 : f32 to vector<16x16xf32>
      %420 = arith.mulf %419, %418 : vector<16x16xf32>
      %421 = arith.addf %416, %420 : vector<16x16xf32>
      %c40 = arith.constant 40 : index
      %422 = memref.load %arg3[%c40] : memref<98xf32, #tpu.memory_space<smem>>
      %c5_175 = arith.constant 5 : index
      %c5_176 = arith.constant 5 : index
      %423 = vector.load %arg5[%c5_175, %c5_176] : memref<22x22xf32, #tpu.memory_space<vmem>>, vector<16x16xf32>
      %424 = vector.broadcast %422 : f32 to vector<16x16xf32>
      %425 = arith.mulf %424, %423 : vector<16x16xf32>
      %426 = arith.addf %421, %425 : vector<16x16xf32>
      %c89 = arith.constant 89 : index
      %427 = memref.load %arg3[%c89] : memref<98xf32, #tpu.memory_space<smem>>
      %c5_177 = arith.constant 5 : index
      %c5_178 = arith.constant 5 : index
      %428 = vector.load %arg6[%c5_177, %c5_178] : memref<22x22xf32, #tpu.memory_space<vmem>>, vector<16x16xf32>
      %429 = vector.broadcast %427 : f32 to vector<16x16xf32>
      %430 = arith.mulf %429, %428 : vector<16x16xf32>
      %431 = arith.addf %426, %430 : vector<16x16xf32>
      %c41 = arith.constant 41 : index
      %432 = memref.load %arg3[%c41] : memref<98xf32, #tpu.memory_space<smem>>
      %c5_179 = arith.constant 5 : index
      %c6_180 = arith.constant 6 : index
      %433 = vector.load %arg5[%c5_179, %c6_180] : memref<22x22xf32, #tpu.memory_space<vmem>>, vector<16x16xf32>
      %434 = vector.broadcast %432 : f32 to vector<16x16xf32>
      %435 = arith.mulf %434, %433 : vector<16x16xf32>
      %436 = arith.addf %431, %435 : vector<16x16xf32>
      %c90 = arith.constant 90 : index
      %437 = memref.load %arg3[%c90] : memref<98xf32, #tpu.memory_space<smem>>
      %c5_181 = arith.constant 5 : index
      %c6_182 = arith.constant 6 : index
      %438 = vector.load %arg6[%c5_181, %c6_182] : memref<22x22xf32, #tpu.memory_space<vmem>>, vector<16x16xf32>
      %439 = vector.broadcast %437 : f32 to vector<16x16xf32>
      %440 = arith.mulf %439, %438 : vector<16x16xf32>
      %441 = arith.addf %436, %440 : vector<16x16xf32>
      %c42 = arith.constant 42 : index
      %442 = memref.load %arg3[%c42] : memref<98xf32, #tpu.memory_space<smem>>
      %c6_183 = arith.constant 6 : index
      %c0_184 = arith.constant 0 : index
      %443 = vector.load %arg5[%c6_183, %c0_184] : memref<22x22xf32, #tpu.memory_space<vmem>>, vector<16x16xf32>
      %444 = vector.broadcast %442 : f32 to vector<16x16xf32>
      %445 = arith.mulf %444, %443 : vector<16x16xf32>
      %446 = arith.addf %441, %445 : vector<16x16xf32>
      %c91 = arith.constant 91 : index
      %447 = memref.load %arg3[%c91] : memref<98xf32, #tpu.memory_space<smem>>
      %c6_185 = arith.constant 6 : index
      %c0_186 = arith.constant 0 : index
      %448 = vector.load %arg6[%c6_185, %c0_186] : memref<22x22xf32, #tpu.memory_space<vmem>>, vector<16x16xf32>
      %449 = vector.broadcast %447 : f32 to vector<16x16xf32>
      %450 = arith.mulf %449, %448 : vector<16x16xf32>
      %451 = arith.addf %446, %450 : vector<16x16xf32>
      %c43 = arith.constant 43 : index
      %452 = memref.load %arg3[%c43] : memref<98xf32, #tpu.memory_space<smem>>
      %c6_187 = arith.constant 6 : index
      %c1_188 = arith.constant 1 : index
      %453 = vector.load %arg5[%c6_187, %c1_188] : memref<22x22xf32, #tpu.memory_space<vmem>>, vector<16x16xf32>
      %454 = vector.broadcast %452 : f32 to vector<16x16xf32>
      %455 = arith.mulf %454, %453 : vector<16x16xf32>
      %456 = arith.addf %451, %455 : vector<16x16xf32>
      %c92 = arith.constant 92 : index
      %457 = memref.load %arg3[%c92] : memref<98xf32, #tpu.memory_space<smem>>
      %c6_189 = arith.constant 6 : index
      %c1_190 = arith.constant 1 : index
      %458 = vector.load %arg6[%c6_189, %c1_190] : memref<22x22xf32, #tpu.memory_space<vmem>>, vector<16x16xf32>
      %459 = vector.broadcast %457 : f32 to vector<16x16xf32>
      %460 = arith.mulf %459, %458 : vector<16x16xf32>
      %461 = arith.addf %456, %460 : vector<16x16xf32>
      %c44 = arith.constant 44 : index
      %462 = memref.load %arg3[%c44] : memref<98xf32, #tpu.memory_space<smem>>
      %c6_191 = arith.constant 6 : index
      %c2_192 = arith.constant 2 : index
      %463 = vector.load %arg5[%c6_191, %c2_192] : memref<22x22xf32, #tpu.memory_space<vmem>>, vector<16x16xf32>
      %464 = vector.broadcast %462 : f32 to vector<16x16xf32>
      %465 = arith.mulf %464, %463 : vector<16x16xf32>
      %466 = arith.addf %461, %465 : vector<16x16xf32>
      %c93 = arith.constant 93 : index
      %467 = memref.load %arg3[%c93] : memref<98xf32, #tpu.memory_space<smem>>
      %c6_193 = arith.constant 6 : index
      %c2_194 = arith.constant 2 : index
      %468 = vector.load %arg6[%c6_193, %c2_194] : memref<22x22xf32, #tpu.memory_space<vmem>>, vector<16x16xf32>
      %469 = vector.broadcast %467 : f32 to vector<16x16xf32>
      %470 = arith.mulf %469, %468 : vector<16x16xf32>
      %471 = arith.addf %466, %470 : vector<16x16xf32>
      %c45 = arith.constant 45 : index
      %472 = memref.load %arg3[%c45] : memref<98xf32, #tpu.memory_space<smem>>
      %c6_195 = arith.constant 6 : index
      %c3_196 = arith.constant 3 : index
      %473 = vector.load %arg5[%c6_195, %c3_196] : memref<22x22xf32, #tpu.memory_space<vmem>>, vector<16x16xf32>
      %474 = vector.broadcast %472 : f32 to vector<16x16xf32>
      %475 = arith.mulf %474, %473 : vector<16x16xf32>
      %476 = arith.addf %471, %475 : vector<16x16xf32>
      %c94 = arith.constant 94 : index
      %477 = memref.load %arg3[%c94] : memref<98xf32, #tpu.memory_space<smem>>
      %c6_197 = arith.constant 6 : index
      %c3_198 = arith.constant 3 : index
      %478 = vector.load %arg6[%c6_197, %c3_198] : memref<22x22xf32, #tpu.memory_space<vmem>>, vector<16x16xf32>
      %479 = vector.broadcast %477 : f32 to vector<16x16xf32>
      %480 = arith.mulf %479, %478 : vector<16x16xf32>
      %481 = arith.addf %476, %480 : vector<16x16xf32>
      %c46 = arith.constant 46 : index
      %482 = memref.load %arg3[%c46] : memref<98xf32, #tpu.memory_space<smem>>
      %c6_199 = arith.constant 6 : index
      %c4_200 = arith.constant 4 : index
      %483 = vector.load %arg5[%c6_199, %c4_200] : memref<22x22xf32, #tpu.memory_space<vmem>>, vector<16x16xf32>
      %484 = vector.broadcast %482 : f32 to vector<16x16xf32>
      %485 = arith.mulf %484, %483 : vector<16x16xf32>
      %486 = arith.addf %481, %485 : vector<16x16xf32>
      %c95 = arith.constant 95 : index
      %487 = memref.load %arg3[%c95] : memref<98xf32, #tpu.memory_space<smem>>
      %c6_201 = arith.constant 6 : index
      %c4_202 = arith.constant 4 : index
      %488 = vector.load %arg6[%c6_201, %c4_202] : memref<22x22xf32, #tpu.memory_space<vmem>>, vector<16x16xf32>
      %489 = vector.broadcast %487 : f32 to vector<16x16xf32>
      %490 = arith.mulf %489, %488 : vector<16x16xf32>
      %491 = arith.addf %486, %490 : vector<16x16xf32>
      %c47 = arith.constant 47 : index
      %492 = memref.load %arg3[%c47] : memref<98xf32, #tpu.memory_space<smem>>
      %c6_203 = arith.constant 6 : index
      %c5_204 = arith.constant 5 : index
      %493 = vector.load %arg5[%c6_203, %c5_204] : memref<22x22xf32, #tpu.memory_space<vmem>>, vector<16x16xf32>
      %494 = vector.broadcast %492 : f32 to vector<16x16xf32>
      %495 = arith.mulf %494, %493 : vector<16x16xf32>
      %496 = arith.addf %491, %495 : vector<16x16xf32>
      %c96 = arith.constant 96 : index
      %497 = memref.load %arg3[%c96] : memref<98xf32, #tpu.memory_space<smem>>
      %c6_205 = arith.constant 6 : index
      %c5_206 = arith.constant 5 : index
      %498 = vector.load %arg6[%c6_205, %c5_206] : memref<22x22xf32, #tpu.memory_space<vmem>>, vector<16x16xf32>
      %499 = vector.broadcast %497 : f32 to vector<16x16xf32>
      %500 = arith.mulf %499, %498 : vector<16x16xf32>
      %501 = arith.addf %496, %500 : vector<16x16xf32>
      %c48 = arith.constant 48 : index
      %502 = memref.load %arg3[%c48] : memref<98xf32, #tpu.memory_space<smem>>
      %c6_207 = arith.constant 6 : index
      %c6_208 = arith.constant 6 : index
      %503 = vector.load %arg5[%c6_207, %c6_208] : memref<22x22xf32, #tpu.memory_space<vmem>>, vector<16x16xf32>
      %504 = vector.broadcast %502 : f32 to vector<16x16xf32>
      %505 = arith.mulf %504, %503 : vector<16x16xf32>
      %506 = arith.addf %501, %505 : vector<16x16xf32>
      %c97 = arith.constant 97 : index
      %507 = memref.load %arg3[%c97] : memref<98xf32, #tpu.memory_space<smem>>
      %c6_209 = arith.constant 6 : index
      %c6_210 = arith.constant 6 : index
      %508 = vector.load %arg6[%c6_209, %c6_210] : memref<22x22xf32, #tpu.memory_space<vmem>>, vector<16x16xf32>
      %509 = vector.broadcast %507 : f32 to vector<16x16xf32>
      %510 = arith.mulf %509, %508 : vector<16x16xf32>
      %511 = arith.addf %506, %510 : vector<16x16xf32>
      %512 = arith.negf %511 : vector<16x16xf32>
      %513 = math.exp %512 : vector<16x16xf32>
      %cst_211 = arith.constant 1.000000e+00 : f32
      %514 = vector.broadcast %cst_211 : f32 to vector<16x16xf32>
      %515 = arith.addf %514, %513 : vector<16x16xf32>
      %516 = arith.divf %514, %515 : vector<16x16xf32>
      %c0_212 = arith.constant 0 : index
      %c0_213 = arith.constant 0 : index
      %c0_214 = arith.constant 0 : index
      %c0_215 = arith.constant 0 : index
      %517 = vector.load %arg4[%c0_212, %c0_213, %c0_214, %c0_215] : memref<1x1x16x16xf32, #tpu.memory_space<vmem>>, vector<1x1x16x16xf32>
      %518 = vector.shape_cast %517 : vector<1x1x16x16xf32> to vector<16x16xf32>
      %519 = vector.shape_cast %516 : vector<16x16xf32> to vector<1x1x16x16xf32>
      tpu.vector_store %arg4[%c0_212, %c0_213, %c0_214, %c0_215], %519 {strides = array<i32>} : memref<1x1x16x16xf32, #tpu.memory_space<vmem>>, vector<1x1x16x16xf32>,
    } else {
    }
    return
  }
  func.func @transform_0(%arg0: i32, %arg1: i32) -> (i32, i32, i32, i32) {
    %c0_i32 = arith.constant 0 : i32
    %c0_i32_0 = arith.constant 0 : i32
    %c0_i32_1 = arith.constant 0 : i32
    return %arg0, %arg1, %c0_i32, %c0_i32_0 : i32, i32, i32, i32
  }
  func.func @transform_1(%arg0: i32, %arg1: i32) -> i32 {
    %c0_i32 = arith.constant 0 : i32
    %c0_i32_0 = arith.constant 0 : i32
    return %c0_i32 : i32
  }
  func.func @transform_2(%arg0: i32, %arg1: i32) -> (i32, i32, i32, i32) {
    %c0_i32 = arith.constant 0 : i32
    %c0_i32_0 = arith.constant 0 : i32
    %c0_i32_1 = arith.constant 0 : i32
    %c0_i32_2 = arith.constant 0 : i32
    return %arg0, %c0_i32, %c0_i32_0, %c0_i32_1 : i32, i32, i32, i32
  }
}

</mosaic_0001>

<bundles_post_ra>
// kernel: mul.0
= control target key start
LH: loop header
LB: loop body
LE: loop exit
PB: predicated region body
PF: predicated region fallthrough
CT: control target
= control target key end

     0   :  { %s34_s0 = inlined_call_operand.vmem [shape: f32[98], index: 0, kind: input, shape index: {}]   ;;  %s35_s1 = inlined_call_operand.vmem [shape: f32[98], index: 1, kind: input, shape index: {}]   ;;  %s36_s2 = inlined_call_operand.vmem [shape: f32[98], index: 2, kind: output, shape index: {}]  }
   0x1   :  { %v3_v0 = vld [vmem:[%s34_s0] sm:$0x1] }
   0x2   :  { %v4_v1 = vld [vmem:[%s35_s1] sm:$0x1] }
   0x3   :  { %v7_v2 = vmul.f32 %v4_v1, %v3_v0 }
   0x5   :  { %9 = vst [vmem:[%s36_s2] sm:$0x1] %v7_v2 }

// kernel: spatial_attention.1
= control target key start
LH: loop header
LB: loop body
LE: loop exit
PB: predicated region body
PF: predicated region fallthrough
CT: control target
= control target key end

     0   :  { %7 = vsyncpa [#allocation6], 0  ;;  %s4621_s0 = inlined_call_operand.vmem [shape: f32[2,64,16,16], index: 0, kind: input, shape index: {}]   ;;  %s4622_s1 = inlined_call_operand.vmem [shape: f32[98], index: 1, kind: input, shape index: {}]   ;;  %s4623_s2 = inlined_call_operand.hbm [shape: f32[2,1,16,16], index: 2, kind: output, shape index: {}]  }
   0x1   :  { %8 = vsyncpa [#allocation5], 0 }
   0x2   :  { %10 = vsyncpa [#allocation5 + $0x1], 0  ;;  %s2650_s9 = smov 0   ;;  %s2652_s10 = smov 0  }
   0x3   :  { %s2654_s11 = smov 0   ;;  %s2656_s12 = smov 0  }
   0x4   :  { %s2658_s13 = smov 0   ;;  %s2660_s14 = smov 0  }
   0x5 LB: > { %s2317_s15 = sadd.s32 4294967295, %s2622_s14   ;;  %s2318_s16 = sadd.s32 4294967294, %s2622_s14   ;;  %s2622_s14 = sphi %s2660_s14, %s16_s14   ;;  %s2618_s13 = sphi %s2658_s13, %s4819_s13   ;;  %s2614_s12 = sphi %s2656_s12, %s4818_s12   ;;  %s2610_s11 = sphi %s2654_s11, %s4817_s11   ;;  %s2606_s10 = sphi %s2652_s10, %s4816_s10   ;;  %s2602_s9 = sphi %s2650_s9, %s4815_s9  }
   0x6   : > { %s28_s17 = sadd.s32 1, %s2618_s13  ;;  %s84_s18 = sadd.s32 1, %s2610_s11 }
   0x7   : > { %p30_p0 = scmp.ge.s32.totalorder %s28_s17, 2  ;;  %p94_p1 = scmp.ne.s32.totalorder %s2610_s11, %s2606_s10 }
   0x8   : > { %p95_p2 = scmp.eq.s32.totalorder %s2317_s15, 1  ;;  %p100_p3 = scmp.ne.s32.totalorder %s2606_s10, %s2602_s9 }
   0x9   : > { %s4821_s17 = smov (%p30_p0, %s28_s17), 0  ;;  %p101_p5 = scmp.eq.s32.totalorder %s2318_s16, 1 }
   0xa   : > { %p2690_p4 = por %p95_p2, %p94_p1  ;;  %s81_s20 = ssub.s32 %s2618_s13, %s4821_s17 }
   0xb   : > { %p2319_p6 = scmp.ge.s32.totalorder %s2622_s14, 1  ;;  %p82_p7 = scmp.eq.s32.totalorder %s81_s20, 0 }
   0xc   : > { %p2697_p8 = por %p101_p5, %p100_p3  ;;  %p108_p9 = scmp.lt.s32.totalorder %s2622_s14, 3 }
   0xd   : > { %s2703_s22 = scalar_select %p82_p7, %s2610_s11, %s84_s18  }
   0xe   : > { %p2705_p10 = pnand %p2319_p6, %p108_p9  ;;  %p2709_p11 = scmp.eq.s32.totalorder %s2317_s15, 0 }
   0xf   : > { %s121_s27 = sshll.u32 %s4622_s1, 4  ;;  %s122_s27 = int_to_ptr.vmem [resolvable:$true] %s121_s27 }
  0x10   : > { %p2439_p12 = pneg %p2705_p10  ;;  %s2525_s28 = scalar_lea.vmem %s122_s27, 16 }
  0x11   : > { %p2526_p0 = scmp.ne.s32.totalorder %s122_s27, %s2525_s28  ;;  %p2533_p5 = scmp.lt.s32.totalorder %s122_s27, %s122_s27 }
  0x12   : > { %p2440_p13 = pnand %p2709_p11, %p2439_p12  ;;  %p2534_p6 = scmp.lt.s32.totalorder %s2525_s28, %s2525_s28 }
  0x14   : > { %p2527_p1 = pneg %p2440_p13  ;;  %p2535_p7 = por %p2534_p6, %p2533_p5 }
  0x16   : > { %p2528_p2 = pnand %p2527_p1, %p2526_p0 }
  0x18   : > { %p2529_p3 = pneg %p2528_p2 }
  0x1a   : > { %p2536_p9 = pnand %p2535_p7, %p2529_p3 }
  0x1c   : > { %2539 = shalt.err (!%p2536_p9)
}
  0x1d   : > { %s2624_s29 = smov [#allocation4]   ;;  %148 = sbr.rel (%p2705_p10) target bundleno = 784 (0x310), region = 28 }
  0x1e   : > { %2442 = dma.vmem_to_smem (!%p2440_p13), %s122_s27, 16, %s2624_s29, [#allocation6]  }
  0x24   : > { %2593 = dma.done.wait (%p2709_p11), [#allocation6], 16  }
  0x25   : > { %2595 = vsyncadd (%p2709_p11), [#allocation6], 4294967280 }
  0x26   : > { %154 = sfence }
  0x27   : > { %p177_p12 = scmp.lt.s32.totalorder %s2614_s12, 1  ;;  %vm315_vm0 = vcmask 130048   ;;  %s2625_s7 = smov 3   ;;  %vm578_vm1 = vcmask 23552   ;;  %vm581_vm2 = vcmask 154624   ;;  %vm586_vm3 = vcmask 1042432  }
  0x28   : > { %vm875_vm4 = vcmask 179200   ;;  %s3575_s8 = sld [smem:[#allocation4 + $0x32]]  ;;  %s3579_s15 = sld [smem:[#allocation4 + $0x33]]  ;;  %vm878_vm5 = vcmask 177152  }
  0x29   : > { %s178_s30 = scalar_select %p177_p12, %s2614_s12, 1 }
  0x2a   : > { %s3582_s16 = sld [smem:[#allocation4 + $0x34]]  ;;  %s3588_s18 = sld [smem:[#allocation4 + $0x35]] }
  0x2b   : > { %s2431_s3 = sshll.u32 %s178_s30, 10  ;;  %s2626_s20 = smov 127  }
  0x2c   : > { %s2731_s6 = scalar_lea.vmem %s4621_s0, %s2431_s3  ;;  %s3593_s23 = sld [smem:[#allocation4 + $0x36]] }
  0x2d   : > { %v2734_v0 = vld [vmem:[%s2731_s6] sm:$0xff]  ;;  %v189_v1 = vld [vmem:[%s2731_s6 + $0x10] sm:$0xff]  ;;  %s4671_s24 = smov 126   ;;  %s3598_s25 = sld [smem:[#allocation4 + $0x37]] }
  0x2e   : > { %v191_v2 = vld [vmem:[%s2731_s6 + $0x20] sm:$0xff]  ;;  %v193_v3 = vld [vmem:[%s2731_s6 + $0x30] sm:$0xff]  ;;  %v595_v6 = vsel %vm315_vm0, %v2734_v0, -inf  ;;  %v596_v9 = vsel %vm315_vm0, %v189_v1, -inf  ;;  %v2765_v36 = vsel %vm315_vm0, %v189_v1, 0.0  ;;  %s2628_s26 = smov 125  }
  0x2f   : > { %v195_v4 = vld [vmem:[%s2731_s6 + $0x40] sm:$0xff]  ;;  %v197_v5 = vld [vmem:[%s2731_s6 + $0x50] sm:$0xff]  ;;  %v597_v10 = vsel %vm315_vm0, %v191_v2, -inf  ;;  %v599_v11 = vsel %vm315_vm0, %v193_v3, -inf  ;;  %v2772_v41 = vsel %vm315_vm0, %v191_v2, 0.0  ;;  %v2775_v42 = vsel %vm315_vm0, %v193_v3, 0.0 }
  0x30   : > { %v199_v7 = vld [vmem:[%s2731_s6 + $0x60] sm:$0xff]  ;;  %v201_v8 = vld [vmem:[%s2731_s6 + $0x70] sm:$0xff]  ;;  %v601_v12 = vsel %vm315_vm0, %v195_v4, -inf  ;;  %v603_v13 = vsel %vm315_vm0, %v197_v5, -inf  ;;  %v598_v16 = vmax.f32 %v595_v6, %v597_v10  ;;  %v600_v17 = vmax.f32 %v596_v9, %v599_v11  ;;  %s2629_s27 = smov 124   ;;  %s2630_s28 = smov 123  }
  0x31   : > { %v203_v14 = vld [vmem:[%s2731_s6 + $0x80] sm:$0xff]  ;;  %v205_v15 = vld [vmem:[%s2731_s6 + $0x90] sm:$0xff]  ;;  %v605_v18 = vsel %vm315_vm0, %v199_v7, -inf  ;;  %v607_v19 = vsel %vm315_vm0, %v201_v8, -inf  ;;  %v2778_v45 = vsel %vm315_vm0, %v195_v4, 0.0  ;;  %v2781_v46 = vsel %vm315_vm0, %v197_v5, 0.0 }
  0x32   : > { %v207_v20 = vld [vmem:[%s2731_s6 + $0xa0] sm:$0xff]  ;;  %v209_v21 = vld [vmem:[%s2731_s6 + $0xb0] sm:$0xff]  ;;  %v602_v22 = vmax.f32 %v598_v16, %v601_v12  ;;  %v604_v23 = vmax.f32 %v600_v17, %v603_v13  ;;  %v609_v24 = vsel %vm315_vm0, %v203_v14, -inf  ;;  %v611_v25 = vsel %vm315_vm0, %v205_v15, -inf  ;;  %s4673_s29 = smov 122   ;;  %s3613_s30 = sld [smem:[#allocation4 + $0x39]] }
  0x33   : > { %v211_v26 = vld [vmem:[%s2731_s6 + $0xc0] sm:$0xff]  ;;  %v213_v27 = vld [vmem:[%s2731_s6 + $0xd0] sm:$0xff]  ;;  %v613_v30 = vsel %vm315_vm0, %v207_v20, -inf  ;;  %v615_v31 = vsel %vm315_vm0, %v209_v21, -inf  ;;  %v2788_v51 = vsel %vm315_vm0, %v199_v7, 0.0  ;;  %v2791_v52 = vsel %vm315_vm0, %v201_v8, 0.0 }
  0x34   : > { %v606_v28 = vmax.f32 %v602_v22, %v605_v18  ;;  %v608_v29 = vmax.f32 %v604_v23, %v607_v19  ;;  %v215_v32 = vld [vmem:[%s2731_s6 + $0xe0] sm:$0xff]  ;;  %v217_v33 = vld [vmem:[%s2731_s6 + $0xf0] sm:$0xff]  ;;  %v617_v37 = vsel %vm315_vm0, %v211_v26, -inf  ;;  %v619_v38 = vsel %vm315_vm0, %v213_v27, -inf  ;;  %s3617_s3 = sld [smem:[#allocation4 + $0x3a]]  ;;  %s3624_s4 = sld [smem:[#allocation4 + $0x3b]] }
  0x35   : > { %v219_v39 = vld [vmem:[%s2731_s6 + $0x100] sm:$0xff]  ;;  %v221_v40 = vld [vmem:[%s2731_s6 + $0x110] sm:$0xff]  ;;  %v621_v47 = vsel %vm315_vm0, %v215_v32, -inf  ;;  %v623_v48 = vsel %vm315_vm0, %v217_v33, -inf  ;;  %v2794_v55 = vsel %vm315_vm0, %v203_v14, 0.0  ;;  %v2797_v56 = vsel %vm315_vm0, %v205_v15, 0.0 }
  0x36   : > { %v610_v34 = vmax.f32 %v606_v28, %v609_v24  ;;  %v612_v35 = vmax.f32 %v608_v29, %v611_v25  ;;  %v223_v49 = vld [vmem:[%s2731_s6 + $0x120] sm:$0xff]  ;;  %v225_v50 = vld [vmem:[%s2731_s6 + $0x130] sm:$0xff]  ;;  %v625_v57 = vsel %vm315_vm0, %v219_v39, -inf  ;;  %v627_v58 = vsel %vm315_vm0, %v221_v40, -inf  ;;  %s3630_s5 = sld [smem:[#allocation4 + $0x3c]] }
  0x37   : > { %v227_v59 = vld [vmem:[%s2731_s6 + $0x140] sm:$0xff]  ;;  %v229_v60 = vld [vmem:[%s2731_s6 + $0x150] sm:$0xff]  ;;  %v2804_v61 = vsel %vm315_vm0, %v207_v20, 0.0  ;;  %v2807_v62 = vsel %vm315_vm0, %v209_v21, 0.0  ;;  %v2810_v2 = vsel %vm315_vm0, %v211_v26, 0.0  ;;  %v2813_v3 = vsel %vm315_vm0, %v213_v27, 0.0 }
  0x38   : > { %v614_v43 = vmax.f32 %v610_v34, %v613_v30  ;;  %v616_v44 = vmax.f32 %v612_v35, %v615_v31  ;;  %v629_v4 = vsel %vm315_vm0, %v223_v49, -inf  ;;  %v631_v5 = vsel %vm315_vm0, %v225_v50, -inf  ;;  %v231_v6 = vld [vmem:[%s2731_s6 + $0x160] sm:$0xff]  ;;  %v233_v7 = vld [vmem:[%s2731_s6 + $0x170] sm:$0xff]  ;;  %v2852_v26 = vld [vmem:[%s2731_s6 + $0x8] sm:$0xff] }
  0x39   : > { %v2820_v8 = vsel %vm315_vm0, %v215_v32, 0.0  ;;  %v2823_v9 = vsel %vm315_vm0, %v217_v33, 0.0  ;;  %v2826_v12 = vsel %vm315_vm0, %v219_v39, 0.0  ;;  %v2829_v13 = vsel %vm315_vm0, %v221_v40, 0.0  ;;  %v235_v16 = vld [vmem:[%s2731_s6 + $0x180] sm:$0xff]  ;;  %v2835_v17 = vld [vmem:[%s2731_s6 + $0x190] sm:$0xff] }
  0x3a   : > { %v618_v53 = vmax.f32 %v614_v43, %v617_v37  ;;  %v620_v54 = vmax.f32 %v616_v44, %v619_v38  ;;  %v633_v14 = vsel %vm315_vm0, %v227_v59, -inf  ;;  %v635_v15 = vsel %vm315_vm0, %v229_v60, -inf  ;;  %v2855_v27 = vld [vmem:[%s2731_s6 + $0x1a0] sm:$0xff]  ;;  %v2858_v28 = vld [vmem:[%s2731_s6 + $0x1b0] sm:$0xff]  ;;  %v2867_v33 = vld [vmem:[%s2731_s6 + $0x18] sm:$0xff] }
  0x3b   : > { %v2838_v18 = vsel %vm315_vm0, %v223_v49, 0.0  ;;  %v2841_v19 = vsel %vm315_vm0, %v225_v50, 0.0  ;;  %v2844_v22 = vsel %vm315_vm0, %v227_v59, 0.0  ;;  %v2847_v23 = vsel %vm315_vm0, %v229_v60, 0.0  ;;  %4679 = vst [vmem:[#allocation10_spill] sm:$0xff] %v2855_v27  ;;  %4680 = vst [vmem:[#allocation11_spill] sm:$0xff] %v2858_v28 }
  0x3c   : > { %v622_v63 = vmax.f32 %v618_v53, %v621_v47  ;;  %v624_v1 = vmax.f32 %v620_v54, %v623_v48  ;;  %v637_v24 = vsel %vm315_vm0, %v231_v6, -inf  ;;  %v639_v25 = vsel %vm315_vm0, %v233_v7, -inf  ;;  %v2870_v34 = vld [vmem:[%s2731_s6 + $0x1c0] sm:$0xff]  ;;  %v2881_v40 = vld [vmem:[%s2731_s6 + $0x1d0] sm:$0xff]  ;;  %v2888_v49 = vld [vmem:[%s2731_s6 + $0x28] sm:$0xff] }
  0x3d   : > { %v2861_v29 = vsel %vm315_vm0, %v231_v6, 0.0  ;;  %v2864_v30 = vsel %vm315_vm0, %v233_v7, 0.0  ;;  %4681 = vst [vmem:[#allocation12_spill] sm:$0xff] %v2870_v34  ;;  %v2873_v35 = vsel %vm315_vm0, %v235_v16, 0.0  ;;  %v641_v37 = vsel %vm315_vm0, %v235_v16, -inf  ;;  %4682 = vst [vmem:[#allocation13_spill] sm:$0xff] %v2881_v40 }
  0x3e   : > { %v626_v10 = vmax.f32 %v622_v63, %v625_v57  ;;  %v628_v11 = vmax.f32 %v624_v1, %v627_v58  ;;  %v643_v38 = vsel %vm315_vm0, %v2835_v17, -inf  ;;  %v316_v39 = vsel %vm315_vm0, %v2734_v0, 0.0  ;;  %v2884_v43 = vld [vmem:[%s2731_s6 + $0x1e0] sm:$0xff]  ;;  %v2893_v53 = vld [vmem:[%s2731_s6 + $0x1f0] sm:$0xff] }
  0x3f   : > { %4683 = vst [vmem:[#allocation14_spill] sm:$0xff] %v2884_v43  ;;  %v318_v48 = vadd.f32 %v2765_v36, %v316_v39  ;;  %v443_v50 = vsel %vm315_vm0, %v2852_v26, 0.0  ;;  %4684 = vst [vmem:[#allocation15_spill] sm:$0xff] %v2893_v53  ;;  %v645_v0 = vsel %vm315_vm0, %v2855_v27, -inf  ;;  %v647_v54 = vsel %vm315_vm0, %v2858_v28, -inf  ;;  %v2904_v58 = vld [vmem:[%s2731_s6 + $0x200] sm:$0xff] }
  0x40   : > { %v630_v20 = vmax.f32 %v626_v10, %v629_v4  ;;  %v632_v21 = vmax.f32 %v628_v11, %v631_v5  ;;  %v444_v57 = vsel %vm315_vm0, %v2867_v33, 0.0  ;;  %v446_v36 = vsel %vm315_vm0, %v2888_v49, 0.0  ;;  %4685 = vst [vmem:[#allocation16_spill] sm:$0xff] %v2904_v58  ;;  %v2907_v59 = vld [vmem:[%s2731_s6 + $0x210] sm:$0xff]  ;;  %v2911_v4 = vld [vmem:[%s2731_s6 + $0x38] sm:$0xff]  ;;  %v2914_v6 = vld [vmem:[%s2731_s6 + $0x220] sm:$0xff] }
  0x41   : > { %4686 = vst [vmem:[#allocation17_spill] sm:$0xff] %v2907_v59  ;;  %v320_v1 = vadd.f32 %v2772_v41, %v318_v48  ;;  %v445_v5 = vadd.f32 %v444_v57, %v443_v50  ;;  %4687 = vst [vmem:[#allocation18_spill] sm:$0xff] %v2914_v6  ;;  %v649_v7 = vsel %vm315_vm0, %v2870_v34, -inf  ;;  %v651_v10 = vsel %vm315_vm0, %v2881_v40, -inf  ;;  %v2925_v41 = vld [vmem:[%s2731_s6 + $0x230] sm:$0xff]  ;;  %v2956_v57 = vld [vmem:[%s2731_s6 + $0x280] sm:$0xff] }
  0x42   : > { %v634_v31 = vmax.f32 %v630_v20, %v633_v14  ;;  %v636_v32 = vmax.f32 %v632_v21, %v635_v15  ;;  %v653_v11 = vsel %vm315_vm0, %v2884_v43, -inf  ;;  %v448_v14 = vsel %vm315_vm0, %v2911_v4, 0.0  ;;  %4688 = vst [vmem:[#allocation19_spill] sm:$0xff] %v2925_v41  ;;  %v2928_v15 = vld [vmem:[%s2731_s6 + $0x240] sm:$0xff]  ;;  %4693 = vst [vmem:[#allocation24_spill] sm:$0xff] %v2956_v57 }
  0x43   : > { %4689 = vst [vmem:[#allocation20_spill] sm:$0xff] %v2928_v15  ;;  %v322_v21 = vadd.f32 %v2775_v42, %v320_v1  ;;  %v2946_v42 = vld [vmem:[%s2731_s6 + $0x260] sm:$0xff] }
  0x44   : > { %v638_v44 = vmax.f32 %v634_v31, %v637_v24  ;;  %v640_v47 = vmax.f32 %v636_v32, %v639_v25  ;;  %v2932_v24 = vld [vmem:[%s2731_s6 + $0x48] sm:$0xff]  ;;  %v447_v25 = vadd.f32 %v446_v36, %v445_v5  ;;  %v2935_v31 = vld [vmem:[%s2731_s6 + $0x250] sm:$0xff]  ;;  %v655_v32 = vsel %vm315_vm0, %v2893_v53, -inf  ;;  %4691 = vst [vmem:[#allocation22_spill] sm:$0xff] %v2946_v42  ;;  %v2970_v5 = vld [vmem:[%s2731_s6 + $0x2a0] sm:$0xff] }
  0x45   : > { %4690 = vst [vmem:[#allocation21_spill] sm:$0xff] %v2935_v31  ;;  %v450_v39 = vsel %vm315_vm0, %v2932_v24, 0.0  ;;  %v324_v50 = vadd.f32 %v2778_v45, %v322_v21  ;;  %v661_v36 = vsel %vm315_vm0, %v2914_v6, -inf  ;;  %v2967_v45 = vld [vmem:[%s2731_s6 + $0x290] sm:$0xff]  ;;  %4695 = vst [vmem:[#allocation26_spill] sm:$0xff] %v2970_v5 }
  0x46   : > { %v642_v60 = vmax.f32 %v638_v44, %v641_v37  ;;  %v644_v63 = vmax.f32 %v640_v47, %v643_v38  ;;  %v657_v37 = vsel %vm315_vm0, %v2904_v58, -inf  ;;  %v659_v38 = vsel %vm315_vm0, %v2907_v59, -inf  ;;  %v2949_v44 = vld [vmem:[%s2731_s6 + $0x270] sm:$0xff]  ;;  %4694 = vst [vmem:[#allocation25_spill] sm:$0xff] %v2967_v45 }
  0x47   : > { %4692 = vst [vmem:[#allocation23_spill] sm:$0xff] %v2949_v44  ;;  %v2977_v21 = vld [vmem:[%s2731_s6 + $0x2b0] sm:$0xff] }
  0x48   : > { %v646_v16 = vmax.f32 %v642_v60, %v645_v0  ;;  %v648_v20 = vmax.f32 %v644_v63, %v647_v54  ;;  %v2953_v0 = vld [vmem:[%s2731_s6 + $0x58] sm:$0xff]  ;;  %v449_v54 = vadd.f32 %v448_v14, %v447_v25  ;;  %v663_v60 = vsel %vm315_vm0, %v2925_v41, -inf  ;;  %4696 = vst [vmem:[#allocation27_spill] sm:$0xff] %v2977_v21 }
  0x49   : > { %v665_v63 = vsel %vm315_vm0, %v2928_v15, -inf  ;;  %v452_v1 = vsel %vm315_vm0, %v2953_v0, 0.0  ;;  %v326_v14 = vadd.f32 %v2781_v46, %v324_v50  ;;  %v667_v25 = vsel %vm315_vm0, %v2935_v31, -inf  ;;  %v2988_v46 = vld [vmem:[%s2731_s6 + $0x2c0] sm:$0xff] }
  0x4a   : > { %v650_v47 = vmax.f32 %v646_v16, %v649_v7  ;;  %v652_v48 = vmax.f32 %v648_v20, %v651_v10  ;;  %v2974_v16 = vld [vmem:[%s2731_s6 + $0x68] sm:$0xff]  ;;  %v451_v20 = vadd.f32 %v450_v39, %v449_v54  ;;  %v669_v15 = vsel %vm315_vm0, %v2946_v42, -inf  ;;  %4697 = vst [vmem:[#allocation28_spill] sm:$0xff] %v2988_v46  ;;  %v2995_v54 = vld [vmem:[%s2731_s6 + $0x78] sm:$0xff]  ;;  %v2998_v31 = vld [vmem:[%s2731_s6 + $0x2e0] sm:$0xff] }
  0x4b   : > { %v328_v50 = vadd.f32 %v2788_v51, %v326_v14  ;;  %4699 = vst [vmem:[#allocation30_spill] sm:$0xff] %v2998_v31  ;;  %v675_v41 = vsel %vm315_vm0, %v2967_v45, -inf  ;;  %v456_v51 = vsel %vm315_vm0, %v2995_v54, 0.0  ;;  %v681_v6 = vsel %vm315_vm0, %v2988_v46, -inf }
  0x4c   : > { %v654_v7 = vmax.f32 %v650_v47, %v653_v11  ;;  %v656_v10 = vmax.f32 %v652_v48, %v655_v32  ;;  %v671_v11 = vsel %vm315_vm0, %v2949_v44, -inf  ;;  %v454_v32 = vsel %vm315_vm0, %v2974_v16, 0.0  ;;  %v2991_v47 = vld [vmem:[%s2731_s6 + $0x2d0] sm:$0xff] }
  0x4d   : > { %4698 = vst [vmem:[#allocation29_spill] sm:$0xff] %v2991_v47  ;;  %v453_v42 = vadd.f32 %v452_v1, %v451_v20  ;;  %v673_v44 = vsel %vm315_vm0, %v2956_v57, -inf  ;;  %v3014_v1 = vld [vmem:[%s2731_s6 + $0x300] sm:$0xff]  ;;  %v330_v14 = vadd.f32 %v2791_v52, %v328_v50  ;;  %v3018_v20 = vld [vmem:[%s2731_s6 + $0x88] sm:$0xff]  ;;  %v3021_v57 = vld [vmem:[%s2731_s6 + $0x310] sm:$0xff] }
  0x4e   : > { %v658_v39 = vmax.f32 %v654_v7, %v657_v37  ;;  %v660_v48 = vmax.f32 %v656_v10, %v659_v38  ;;  %v3006_v37 = vsel %vm315_vm0, %v2970_v5, -inf  ;;  %v3011_v38 = vld [vmem:[%s2731_s6 + $0x2f0] sm:$0xff]  ;;  %4701 = vst [vmem:[#allocation32_spill] sm:$0xff] %v3014_v1  ;;  %4702 = vst [vmem:[#allocation33_spill] sm:$0xff] %v3021_v57  ;;  %v679_v5 = vsel %vm315_vm0, %v2977_v21, -inf  ;;  %v3032_v52 = vld [vmem:[%s2731_s6 + $0x320] sm:$0xff] }
  0x4f   : > { %4700 = vst [vmem:[#allocation31_spill] sm:$0xff] %v3011_v38  ;;  %v455_v45 = vadd.f32 %v454_v32, %v453_v42  ;;  %4703 = vst [vmem:[#allocation34_spill] sm:$0xff] %v3032_v52  ;;  %v3039_v50 = vld [vmem:[%s2731_s6 + $0x98] sm:$0xff]  ;;  %v3042_v21 = vld [vmem:[%s2731_s6 + $0x340] sm:$0xff]  ;;  %v687_v59 = vsel %vm315_vm0, %v3011_v38, -inf  ;;  %v3069_v58 = vsel %vm315_vm0, %v3032_v52, -inf }
  0x50   : > { %v662_v7 = vmax.f32 %v658_v39, %v661_v36  ;;  %v664_v10 = vmax.f32 %v660_v48, %v663_v60  ;;  %v683_v36 = vsel %vm315_vm0, %v2991_v47, -inf  ;;  %v458_v60 = vsel %vm315_vm0, %v3018_v20, 0.0  ;;  %v3035_v39 = vld [vmem:[%s2731_s6 + $0x330] sm:$0xff]  ;;  %4705 = vst [vmem:[#allocation36_spill] sm:$0xff] %v3042_v21 }
  0x51   : > { %4704 = vst [vmem:[#allocation35_spill] sm:$0xff] %v3035_v39  ;;  %v332_v48 = vadd.f32 %v2794_v55, %v330_v14  ;;  %v457_v46 = vadd.f32 %v456_v51, %v455_v45  ;;  %v685_v47 = vsel %vm315_vm0, %v2998_v31, -inf  ;;  %v3053_v55 = vld [vmem:[%s2731_s6 + $0x350] sm:$0xff]  ;;  %v3060_v14 = vld [vmem:[%s2731_s6 + $0xa8] sm:$0xff] }
  0x52   : > { %v666_v42 = vmax.f32 %v662_v7, %v665_v63  ;;  %v668_v32 = vmax.f32 %v664_v10, %v667_v25  ;;  %v689_v63 = vsel %vm315_vm0, %v3014_v1, -inf  ;;  %v460_v25 = vsel %vm315_vm0, %v3039_v50, 0.0  ;;  %4706 = vst [vmem:[#allocation37_spill] sm:$0xff] %v3053_v55  ;;  %v3056_v7 = vld [vmem:[%s2731_s6 + $0x360] sm:$0xff]  ;;  %v3063_v31 = vld [vmem:[%s2731_s6 + $0x370] sm:$0xff] }
  0x53   : > { %4707 = vst [vmem:[#allocation38_spill] sm:$0xff] %v3056_v7  ;;  %v334_v10 = vadd.f32 %v2797_v56, %v332_v48  ;;  %v459_v38 = vadd.f32 %v458_v60, %v457_v46  ;;  %4708 = vst [vmem:[#allocation39_spill] sm:$0xff] %v3063_v31  ;;  %v691_v1 = vsel %vm315_vm0, %v3021_v57, -inf  ;;  %v462_v56 = vsel %vm315_vm0, %v3060_v14, 0.0  ;;  %v3081_v46 = vld [vmem:[%s2731_s6 + $0x390] sm:$0xff]  ;;  %v3085_v48 = vld [vmem:[%s2731_s6 + $0xb8] sm:$0xff] }
  0x54   : > { %v670_v45 = vmax.f32 %v666_v42, %v669_v15  ;;  %v672_v51 = vmax.f32 %v668_v32, %v671_v11  ;;  %v3073_v15 = vsel %vm315_vm0, %v3035_v39, -inf  ;;  %v3078_v11 = vld [vmem:[%s2731_s6 + $0x380] sm:$0xff]  ;;  %4710 = vst [vmem:[#allocation41_spill] sm:$0xff] %v3081_v46  ;;  %v697_v39 = vsel %vm315_vm0, %v3042_v21, -inf  ;;  %v3112_v21 = vld [vmem:[%s2731_s6 + $0x3d0] sm:$0xff] }
  0x55   : > { %4709 = vst [vmem:[#allocation40_spill] sm:$0xff] %v3078_v11  ;;  %v336_v32 = vadd.f32 %v2804_v61, %v334_v10  ;;  %v461_v52 = vadd.f32 %v460_v25, %v459_v38  ;;  %v3088_v57 = vld [vmem:[%s2731_s6 + $0x3a0] sm:$0xff]  ;;  %v699_v53 = vsel %vm315_vm0, %v3053_v55, -inf  ;;  %v464_v61 = vsel %vm315_vm0, %v3085_v48, 0.0  ;;  %v3109_v10 = vld [vmem:[%s2731_s6 + $0xc8] sm:$0xff]  ;;  %4714 = vst [vmem:[#allocation45_spill] sm:$0xff] %v3112_v21 }
  0x56   : > { %v674_v60 = vmax.f32 %v670_v45, %v673_v44  ;;  %v676_v42 = vmax.f32 %v672_v51, %v675_v41  ;;  %4711 = vst [vmem:[#allocation42_spill] sm:$0xff] %v3088_v57  ;;  %v3096_v44 = vsel %vm315_vm0, %v3056_v7, -inf  ;;  %v3101_v41 = vld [vmem:[%s2731_s6 + $0x3b0] sm:$0xff]  ;;  %v3104_v38 = vld [vmem:[%s2731_s6 + $0x3c0] sm:$0xff]  ;;  %v3116_v7 = vsel %vm315_vm0, %v3063_v31, -inf }
  0x57   : > { %4712 = vst [vmem:[#allocation43_spill] sm:$0xff] %v3101_v41  ;;  %4713 = vst [vmem:[#allocation44_spill] sm:$0xff] %v3104_v38  ;;  %v338_v51 = vadd.f32 %v2807_v62, %v336_v32  ;;  %v463_v55 = vadd.f32 %v462_v56, %v461_v52  ;;  %v3120_v43 = vsel %vm315_vm0, %v3078_v11, -inf  ;;  %v3124_v40 = vsel %vm315_vm0, %v3081_v46, -inf }
  0x58   : > { %v678_v25 = vmax.f32 %v674_v60, %v3006_v37  ;;  %v680_v45 = vmax.f32 %v676_v42, %v679_v5  ;;  %v466_v62 = vsel %vm315_vm0, %v3109_v10, 0.0  ;;  %v3129_v5 = vld [vmem:[%s2731_s6 + $0x3e0] sm:$0xff]  ;;  %v3132_v37 = vld [vmem:[%s2731_s6 + $0x3f0] sm:$0xff]  ;;  %v3136_v42 = vld [vmem:[%s2731_s6 + $0xd8] sm:$0xff]  ;;  %v3140_v46 = vsel %vm315_vm0, %v3088_v57, -inf }
  0x59   : > { %4715 = vst [vmem:[#allocation46_spill] sm:$0xff] %v3129_v5  ;;  %4716 = vst [vmem:[#allocation47_spill] sm:$0xff] %v3132_v37  ;;  %v340_v60 = vadd.f32 %v2810_v2, %v338_v51  ;;  %v465_v32 = vadd.f32 %v464_v61, %v463_v55  ;;  %v3144_v11 = vsel %vm315_vm0, %v3101_v41, -inf  ;;  %v3148_v31 = vsel %vm315_vm0, %v3104_v38, -inf  ;;  %v3154_v61 = vld [vmem:[%s2731_s6 + $0xe8] sm:$0xff]  ;;  %v3167_v41 = vld [vmem:[%s2731_s6 + $0xf8] sm:$0xff] }
  0x5a   : > { %v682_v52 = vmax.f32 %v678_v25, %v681_v6  ;;  %v684_v56 = vmax.f32 %v680_v45, %v683_v36  ;;  %v468_v2 = vsel %vm315_vm0, %v3136_v42, 0.0  ;;  %v715_v45 = vsel %vm315_vm0, %v3112_v21, -inf  ;;  %v3202_v21 = vld [vmem:[%s2731_s6 + $0x168] sm:$0xff] }
  0x5b   : > { %v342_v55 = vadd.f32 %v2813_v3, %v340_v60  ;;  %v467_v25 = vadd.f32 %v466_v62, %v465_v32  ;;  %v3160_v51 = vsel %vm315_vm0, %v3129_v5, -inf  ;;  %v3164_v38 = vsel %vm315_vm0, %v3132_v37, -inf  ;;  %v3179_v60 = vld [vmem:[%s2731_s6 + $0x128] sm:$0xff]  ;;  %v3182_v37 = vld [vmem:[%s2731_s6 + $0x138] sm:$0xff] }
  0x5c   : > { %v686_v6 = vmax.f32 %v682_v52, %v685_v47  ;;  %v688_v36 = vmax.f32 %v684_v56, %v687_v59  ;;  %v470_v59 = vsel %vm315_vm0, %v3154_v61, 0.0  ;;  %v3173_v52 = vld [vmem:[%s2731_s6 + $0x108] sm:$0xff]  ;;  %v3176_v56 = vld [vmem:[%s2731_s6 + $0x118] sm:$0xff]  ;;  %v472_v5 = vsel %vm315_vm0, %v3167_v41, 0.0 }
  0x5d   : > { %v344_v62 = vadd.f32 %v2820_v8, %v342_v55  ;;  %v469_v32 = vadd.f32 %v468_v2, %v467_v25  ;;  %v478_v8 = vsel %vm315_vm0, %v3179_v60, 0.0  ;;  %v3196_v55 = vld [vmem:[%s2731_s6 + $0x148] sm:$0xff]  ;;  %v3199_v25 = vld [vmem:[%s2731_s6 + $0x158] sm:$0xff]  ;;  %v480_v34 = vsel %vm315_vm0, %v3182_v37, 0.0 }
  0x5e   : > { %v690_v3 = vmax.f32 %v686_v6, %v689_v63  ;;  %v692_v47 = vmax.f32 %v688_v36, %v691_v1  ;;  %v474_v63 = vsel %vm315_vm0, %v3173_v52, 0.0  ;;  %v476_v1 = vsel %vm315_vm0, %v3176_v56, 0.0  ;;  %4717 = vst [vmem:[#allocation48_spill] sm:$0xff] %v3196_v55  ;;  %4718 = vst [vmem:[#allocation49_spill] sm:$0xff] %v3199_v25 }
  0x5f   : > { %v346_v2 = vadd.f32 %v2823_v9, %v344_v62  ;;  %v471_v57 = vadd.f32 %v470_v59, %v469_v32  ;;  %v482_v28 = vsel %vm315_vm0, %v3196_v55, 0.0  ;;  %v722_v59 = vsel %vm315_vm0, %v2852_v26, -inf }
  0x60   : > { %v694_v6 = vmax.f32 %v690_v3, %v3069_v58  ;;  %v696_v36 = vmax.f32 %v692_v47, %v3073_v15  ;;  %v484_v58 = vsel %vm315_vm0, %v3199_v25, 0.0  ;;  %v486_v15 = vsel %vm315_vm0, %v3202_v21, 0.0 }
  0x61   : > { %v348_v47 = vadd.f32 %v2826_v12, %v346_v2  ;;  %v473_v62 = vadd.f32 %v472_v5, %v471_v57  ;;  %v723_v32 = vsel %vm315_vm0, %v2867_v33, -inf  ;;  %v724_v55 = vsel %vm315_vm0, %v2888_v49, -inf }
  0x62   : > { %v698_v9 = vmax.f32 %v694_v6, %v697_v39  ;;  %v700_v3 = vmax.f32 %v696_v36, %v699_v53  ;;  %v726_v25 = vsel %vm315_vm0, %v2911_v4, -inf  ;;  %v725_v57 = vmax.f32 %v722_v59, %v724_v55 }
  0x63   : > { %v350_v53 = vadd.f32 %v2829_v13, %v348_v47  ;;  %v475_v12 = vadd.f32 %v474_v63, %v473_v62  ;;  %v727_v5 = vmax.f32 %v723_v32, %v726_v25  ;;  %v728_v26 = vsel %vm315_vm0, %v2932_v24, -inf }
  0x64   : > { %v702_v27 = vmax.f32 %v698_v9, %v3096_v44  ;;  %v704_v39 = vmax.f32 %v700_v3, %v3116_v7  ;;  %v730_v33 = vsel %vm315_vm0, %v2953_v0, -inf  ;;  %v729_v36 = vmax.f32 %v725_v57, %v728_v26  ;;  %v238_v57 = vld [vmem:[%s2731_s6 + $0x198] sm:$0xff] }
  0x65   : > { %v352_v4 = vadd.f32 %v2838_v18, %v350_v53  ;;  %v477_v44 = vadd.f32 %v476_v1, %v475_v12  ;;  %v731_v7 = vmax.f32 %v727_v5, %v730_v33  ;;  %v732_v13 = vsel %vm315_vm0, %v2974_v16, -inf  ;;  %v4719_v5 = vld [vmem:[#allocation10_spill] sm:$0xff] }
  0x66   : > { %v706_v49 = vmax.f32 %v702_v27, %v3120_v43  ;;  %v708_v6 = vmax.f32 %v704_v39, %v3124_v40  ;;  %v734_v63 = vsel %vm315_vm0, %v2995_v54, -inf  ;;  %v733_v43 = vmax.f32 %v729_v36, %v732_v13  ;;  %v4721_v36 = vld [vmem:[#allocation49_spill] sm:$0xff] }
  0x67   : > { %v354_v0 = vadd.f32 %v2841_v19, %v352_v4  ;;  %v479_v27 = vadd.f32 %v478_v8, %v477_v44  ;;  %v735_v40 = vmax.f32 %v731_v7, %v734_v63  ;;  %v736_v18 = vsel %vm315_vm0, %v3018_v20, -inf  ;;  %v4722_v7 = vld [vmem:[#allocation11_spill] sm:$0xff] }
  0x68   : > { %v710_v24 = vmax.f32 %v706_v49, %v3140_v46  ;;  %v712_v2 = vmax.f32 %v708_v6, %v3144_v11  ;;  %v738_v1 = vsel %vm315_vm0, %v3039_v50, -inf  ;;  %v737_v25 = vmax.f32 %v733_v43, %v736_v18  ;;  %v240_v6 = vld [vmem:[%s2731_s6 + $0x1a8] sm:$0xff]  ;;  %v4723_v18 = vld [vmem:[#allocation12_spill] sm:$0xff] }
  0x69   : > { %v356_v54 = vadd.f32 %v2844_v22, %v354_v0  ;;  %v481_v46 = vadd.f32 %v480_v34, %v479_v27  ;;  %v739_v11 = vmax.f32 %v735_v40, %v738_v1  ;;  %v740_v19 = vsel %vm315_vm0, %v3060_v14, -inf  ;;  %v242_v0 = vld [vmem:[%s2731_s6 + $0x1b8] sm:$0xff] }
  0x6a   : > { %v714_v16 = vmax.f32 %v710_v24, %v3148_v31  ;;  %v716_v55 = vmax.f32 %v712_v2, %v715_v45  ;;  %v742_v8 = vsel %vm315_vm0, %v3085_v48, -inf  ;;  %v741_v45 = vmax.f32 %v737_v25, %v740_v19  ;;  %v234_v48 = vld [vmem:[%s2731_s6 + $0x178] sm:$0xff]  ;;  %v244_v25 = vld [vmem:[%s2731_s6 + $0x1c8] sm:$0xff] }
  0x6b   : > { %v358_v50 = vadd.f32 %v2847_v23, %v356_v54  ;;  %v483_v31 = vadd.f32 %v482_v28, %v481_v46  ;;  %v743_v22 = vmax.f32 %v739_v11, %v742_v8  ;;  %v744_v34 = vsel %vm315_vm0, %v3109_v10, -inf }
  0x6c   : > { %v718_v20 = vmax.f32 %v714_v16, %v3160_v51  ;;  %v720_v9 = vmax.f32 %v716_v55, %v3164_v38  ;;  %v746_v3 = vsel %vm315_vm0, %v3136_v42, -inf  ;;  %v748_v38 = vsel %vm315_vm0, %v3154_v61, -inf  ;;  %v236_v42 = vld [vmem:[%s2731_s6 + $0x188] sm:$0xff] }
  0x6d   : > { %v360_v47 = vadd.f32 %v2861_v29, %v358_v50  ;;  %v485_v62 = vadd.f32 %v484_v58, %v483_v31  ;;  %v488_v23 = vsel %vm315_vm0, %v234_v48, 0.0  ;;  %v745_v28 = vmax.f32 %v741_v45, %v744_v34 }
  0x6e   : > { %v721_v14 = vmax.f32 %v718_v20, %v720_v9  ;;  %v747_v51 = vmax.f32 %v743_v22, %v746_v3  ;;  %v750_v59 = vsel %vm315_vm0, %v3167_v41, -inf  ;;  %v752_v58 = vsel %vm315_vm0, %v3173_v52, -inf  ;;  %v4724_v20 = vld [vmem:[#allocation13_spill] sm:$0xff]  ;;  %v246_v9 = vld [vmem:[%s2731_s6 + $0x1d8] sm:$0xff] }
  0x6f   : > { %v362_v10 = vadd.f32 %v2864_v30, %v360_v47  ;;  %v487_v29 = vadd.f32 %v486_v15, %v485_v62  ;;  %v754_v61 = vsel %vm315_vm0, %v3176_v56, -inf  ;;  %v365_v32 = vsel %vm315_vm0, %v2835_v17, 0.0  ;;  %v4725_v47 = vld [vmem:[#allocation14_spill] sm:$0xff]  ;;  %v248_v62 = vld [vmem:[%s2731_s6 + $0x1e8] sm:$0xff] }
  0x70   : > { %851 = vrot.lane.b32.xlu1 %v721_v14, %s2625_s7  ;;  %v490_v39 = vsel %vm315_vm0, %v236_v42, 0.0  ;;  %v749_v41 = vmax.f32 %v745_v28, %v748_v38  ;;  %v751_v53 = vmax.f32 %v747_v51, %v750_v59  ;;  %v756_v15 = vsel %vm315_vm0, %v3179_v60, -inf  ;;  %v250_v38 = vld [vmem:[%s2731_s6 + $0x1f8] sm:$0xff] }
  0x71   : > { %v364_v12 = vadd.f32 %v2873_v35, %v362_v10  ;;  %v489_v30 = vadd.f32 %v488_v23, %v487_v29  ;;  %v758_v52 = vsel %vm315_vm0, %v3182_v37, -inf  ;;  %v367_v56 = vsel %vm315_vm0, %v4719_v5, 0.0  ;;  %v4720_v35 = vld [vmem:[#allocation48_spill] sm:$0xff] }
  0x72   : > { %v492_v17 = vsel %vm315_vm0, %v238_v57, 0.0  ;;  %v753_v26 = vmax.f32 %v749_v41, %v752_v58  ;;  %v755_v33 = vmax.f32 %v751_v53, %v754_v61  ;;  %v760_v44 = vsel %vm315_vm0, %v4720_v35, -inf  ;;  %v4726_v58 = vld [vmem:[#allocation15_spill] sm:$0xff]  ;;  %v4727_v5 = vld [vmem:[#allocation16_spill] sm:$0xff] }
  0x73   : > { %v366_v49 = vadd.f32 %v365_v32, %v364_v12  ;;  %v491_v4 = vadd.f32 %v490_v39, %v489_v30  ;;  %v762_v60 = vsel %vm315_vm0, %v4721_v36, -inf  ;;  %v369_v37 = vsel %vm315_vm0, %v4722_v7, 0.0  ;;  %v252_v32 = vld [vmem:[%s2731_s6 + $0x208] sm:$0xff]  ;;  %v254_v39 = vld [vmem:[%s2731_s6 + $0x218] sm:$0xff] }
  0x74   : > { %v494_v13 = vsel %vm315_vm0, %v240_v6, 0.0  ;;  %v757_v63 = vmax.f32 %v753_v26, %v756_v15  ;;  %v759_v24 = vmax.f32 %v755_v33, %v758_v52  ;;  %v764_v43 = vsel %vm315_vm0, %v3202_v21, -inf  ;;  %v258_v26 = vld [vmem:[%s2731_s6 + $0x238] sm:$0xff] }
  0x75   : > { %v368_v2 = vadd.f32 %v367_v56, %v366_v49  ;;  %v493_v27 = vadd.f32 %v492_v17, %v491_v4  ;;  %v766_v40 = vsel %vm315_vm0, %v234_v48, -inf  ;;  %v371_v1 = vsel %vm315_vm0, %v4723_v18, 0.0  ;;  %v256_v17 = vld [vmem:[%s2731_s6 + $0x228] sm:$0xff]  ;;  %v4729_v18 = vld [vmem:[#allocation18_spill] sm:$0xff] }
  0x76   : > { %v496_v16 = vsel %vm315_vm0, %v242_v0, 0.0  ;;  %v761_v55 = vmax.f32 %v757_v63, %v760_v44  ;;  %v763_v54 = vmax.f32 %v759_v24, %v762_v60  ;;  %v768_v19 = vsel %vm315_vm0, %v236_v42, -inf  ;;  %v4728_v60 = vld [vmem:[#allocation17_spill] sm:$0xff] }
  0x77   : > { %v370_v46 = vadd.f32 %v369_v37, %v368_v2  ;;  %v495_v11 = vadd.f32 %v494_v13, %v493_v27  ;;  %v770_v8 = vsel %vm315_vm0, %v238_v57, -inf  ;;  %v373_v21 = vsel %vm315_vm0, %v4724_v20, 0.0  ;;  %v260_v37 = vld [vmem:[%s2731_s6 + $0x248] sm:$0xff]  ;;  %v262_v13 = vld [vmem:[%s2731_s6 + $0x258] sm:$0xff] }
  0x78   : > { %v498_v50 = vsel %vm315_vm0, %v244_v25, 0.0  ;;  %v765_v31 = vmax.f32 %v761_v55, %v764_v43  ;;  %v767_v45 = vmax.f32 %v763_v54, %v766_v40  ;;  %v772_v3 = vsel %vm315_vm0, %v240_v6, -inf  ;;  %v266_v55 = vld [vmem:[%s2731_s6 + $0x278] sm:$0xff] }
  0x79   : > { %v372_v22 = vadd.f32 %v371_v1, %v370_v46  ;;  %v497_v34 = vadd.f32 %v496_v16, %v495_v11  ;;  %v774_v14 = vsel %vm315_vm0, %v242_v0, -inf  ;;  %v375_v48 = vsel %vm315_vm0, %v4725_v47, 0.0  ;;  %v264_v16 = vld [vmem:[%s2731_s6 + $0x268] sm:$0xff] }
  0x7a   : > { %v500_v23 = vsel %vm315_vm0, %v246_v9, 0.0  ;;  %v769_v28 = vmax.f32 %v765_v31, %v768_v19  ;;  %v771_v51 = vmax.f32 %v767_v45, %v770_v8  ;;  %v776_v42 = vsel %vm315_vm0, %v244_v25, -inf  ;;  %v3344_v31 = vld [vmem:[%s2731_s6 + $0x298] sm:$0xff] }
  0x7b   : > { %v374_v59 = vadd.f32 %v373_v21, %v372_v22  ;;  %v499_v10 = vadd.f32 %v498_v50, %v497_v34  ;;  %v778_v29 = vsel %vm315_vm0, %v246_v9, -inf  ;;  %v377_v61 = vsel %vm315_vm0, %v4726_v58, 0.0  ;;  %v4730_v21 = vld [vmem:[#allocation19_spill] sm:$0xff]  ;;  %v268_v50 = vld [vmem:[%s2731_s6 + $0x288] sm:$0xff] }
  0x7c   : > { %v502_v41 = vsel %vm315_vm0, %v248_v62, 0.0  ;;  %v773_v53 = vmax.f32 %v769_v28, %v772_v3  ;;  %v775_v12 = vmax.f32 %v771_v51, %v774_v14  ;;  %v780_v15 = vsel %vm315_vm0, %v248_v62, -inf  ;;  %v4731_v62 = vld [vmem:[#allocation20_spill] sm:$0xff]  ;;  %v3355_v28 = vld [vmem:[%s2731_s6 + $0x2b8] sm:$0xff] }
  0x7d   : > { %v376_v57 = vadd.f32 %v375_v48, %v374_v59  ;;  %v501_v30 = vadd.f32 %v500_v23, %v499_v10  ;;  %v782_v52 = vsel %vm315_vm0, %v250_v38, -inf  ;;  %v379_v56 = vsel %vm315_vm0, %v4727_v5, 0.0  ;;  %v3352_v23 = vld [vmem:[%s2731_s6 + $0x2a8] sm:$0xff] }
  0x7e   : > { %v504_v33 = vsel %vm315_vm0, %v250_v38, 0.0  ;;  %v777_v49 = vmax.f32 %v773_v53, %v776_v42  ;;  %v779_v6 = vmax.f32 %v775_v12, %v778_v29  ;;  %v784_v44 = vsel %vm315_vm0, %v252_v32, -inf  ;;  %v3367_v53 = vld [vmem:[%s2731_s6 + $0x2d8] sm:$0xff] }
  0x7f   : > { %v378_v4 = vadd.f32 %v377_v61, %v376_v57  ;;  %v503_v35 = vadd.f32 %v502_v41, %v501_v30  ;;  %v786_v36 = vsel %vm315_vm0, %v254_v39, -inf  ;;  %v381_v7 = vsel %vm315_vm0, %v4728_v60, 0.0  ;;  %v3364_v41 = vld [vmem:[%s2731_s6 + $0x2c8] sm:$0xff] }
  0x80   : > { %v506_v63 = vsel %vm315_vm0, %v252_v32, 0.0  ;;  %v781_v24 = vmax.f32 %v777_v49, %v780_v15  ;;  %v783_v2 = vmax.f32 %v779_v6, %v782_v52  ;;  %v788_v43 = vsel %vm315_vm0, %v256_v17, -inf  ;;  %v4732_v32 = vld [vmem:[#allocation21_spill] sm:$0xff]  ;;  %v3380_v49 = vld [vmem:[%s2731_s6 + $0x2f8] sm:$0xff] }
  0x81   : > { %v380_v0 = vadd.f32 %v379_v56, %v378_v4  ;;  %v505_v27 = vadd.f32 %v504_v33, %v503_v35  ;;  %v790_v40 = vsel %vm315_vm0, %v258_v26, -inf  ;;  %v383_v1 = vsel %vm315_vm0, %v4729_v18, 0.0  ;;  %v3377_v33 = vld [vmem:[%s2731_s6 + $0x2e8] sm:$0xff] }
  0x82   : > { %v508_v54 = vsel %vm315_vm0, %v254_v39, 0.0  ;;  %v785_v46 = vmax.f32 %v781_v24, %v784_v44  ;;  %v787_v25 = vmax.f32 %v783_v2, %v786_v36  ;;  %v792_v8 = vsel %vm315_vm0, %v260_v37, -inf  ;;  %v3390_v24 = vld [vmem:[%s2731_s6 + $0x308] sm:$0xff]  ;;  %v3393_v2 = vld [vmem:[%s2731_s6 + $0x318] sm:$0xff] }
  0x83   : > { %v382_v11 = vadd.f32 %v381_v7, %v380_v0  ;;  %v507_v19 = vadd.f32 %v506_v63, %v505_v27  ;;  %v794_v20 = vsel %vm315_vm0, %v262_v13, -inf  ;;  %v385_v9 = vsel %vm315_vm0, %v4730_v21, 0.0 }
  0x84   : > { %v510_v45 = vsel %vm315_vm0, %v256_v17, 0.0  ;;  %v789_v22 = vmax.f32 %v785_v46, %v788_v43  ;;  %v791_v34 = vmax.f32 %v787_v25, %v790_v40  ;;  %v796_v47 = vsel %vm315_vm0, %v264_v16, -inf  ;;  %v4733_v17 = vld [vmem:[#allocation22_spill] sm:$0xff]  ;;  %v3403_v25 = vld [vmem:[%s2731_s6 + $0x328] sm:$0xff] }
  0x85   : > { %v384_v3 = vadd.f32 %v383_v1, %v382_v11  ;;  %v509_v14 = vadd.f32 %v508_v54, %v507_v19  ;;  %v798_v48 = vsel %vm315_vm0, %v266_v55, -inf  ;;  %v387_v38 = vsel %vm315_vm0, %v4731_v62, 0.0  ;;  %v4735_v54 = vld [vmem:[#allocation24_spill] sm:$0xff]  ;;  %v3406_v11 = vld [vmem:[%s2731_s6 + $0x338] sm:$0xff] }
  0x86   : > { %v512_v51 = vsel %vm315_vm0, %v258_v26, 0.0  ;;  %v793_v59 = vmax.f32 %v789_v22, %v792_v8  ;;  %v795_v10 = vmax.f32 %v791_v34, %v794_v20  ;;  %v800_v58 = vsel %vm315_vm0, %v268_v50, -inf  ;;  %v4736_v22 = vld [vmem:[#allocation25_spill] sm:$0xff] }
  0x87   : > { %v386_v42 = vadd.f32 %v385_v9, %v384_v3  ;;  %v511_v29 = vadd.f32 %v510_v45, %v509_v14  ;;  %v802_v61 = vsel %vm315_vm0, %v3344_v31, -inf  ;;  %v389_v39 = vsel %vm315_vm0, %v4732_v32, 0.0  ;;  %v3416_v3 = vld [vmem:[%s2731_s6 + $0x348] sm:$0xff]  ;;  %v3419_v14 = vld [vmem:[%s2731_s6 + $0x358] sm:$0xff] }
  0x88   : > { %v514_v12 = vsel %vm315_vm0, %v260_v37, 0.0  ;;  %v797_v57 = vmax.f32 %v793_v59, %v796_v47  ;;  %v799_v30 = vmax.f32 %v795_v10, %v798_v48  ;;  %v804_v5 = vsel %vm315_vm0, %v3352_v23, -inf  ;;  %v4734_v37 = vld [vmem:[#allocation23_spill] sm:$0xff]  ;;  %v4737_v10 = vld [vmem:[#allocation26_spill] sm:$0xff] }
  0x89   : > { %v388_v15 = vadd.f32 %v387_v38, %v386_v42  ;;  %v513_v52 = vadd.f32 %v512_v51, %v511_v29  ;;  %v806_v56 = vsel %vm315_vm0, %v3355_v28, -inf  ;;  %v391_v26 = vsel %vm315_vm0, %v4733_v17, 0.0  ;;  %v3429_v29 = vld [vmem:[%s2731_s6 + $0x368] sm:$0xff] }
  0x8a   : > { %v516_v6 = vsel %vm315_vm0, %v262_v13, 0.0  ;;  %v801_v4 = vmax.f32 %v797_v57, %v800_v58  ;;  %v803_v35 = vmax.f32 %v799_v30, %v802_v61  ;;  %v808_v60 = vsel %vm315_vm0, %v3364_v41, -inf  ;;  %v3432_v58 = vld [vmem:[%s2731_s6 + $0x378] sm:$0xff] }
  0x8b   : > { %v390_v44 = vadd.f32 %v389_v39, %v388_v15  ;;  %v515_v36 = vadd.f32 %v514_v12, %v513_v52  ;;  %v810_v7 = vsel %vm315_vm0, %v3367_v53, -inf  ;;  %v393_v63 = vsel %vm315_vm0, %v4734_v37, 0.0  ;;  %v4738_v15 = vld [vmem:[#allocation27_spill] sm:$0xff] }
  0x8c   : > { %v518_v13 = vsel %vm315_vm0, %v264_v16, 0.0  ;;  %v805_v0 = vmax.f32 %v801_v4, %v804_v5  ;;  %v807_v27 = vmax.f32 %v803_v35, %v806_v56  ;;  %v812_v18 = vsel %vm315_vm0, %v3377_v33, -inf  ;;  %v3443_v5 = vld [vmem:[%s2731_s6 + $0x388] sm:$0xff]  ;;  %v3446_v56 = vld [vmem:[%s2731_s6 + $0x398] sm:$0xff] }
  0x8d   : > { %v392_v43 = vadd.f32 %v391_v26, %v390_v44  ;;  %v517_v40 = vadd.f32 %v516_v6, %v515_v36  ;;  %v814_v1 = vsel %vm315_vm0, %v3380_v49, -inf  ;;  %v395_v46 = vsel %vm315_vm0, %v4735_v54, 0.0  ;;  %v4739_v36 = vld [vmem:[#allocation28_spill] sm:$0xff]  ;;  %v3460_v37 = vld [vmem:[%s2731_s6 + $0x3b8] sm:$0xff]  ;;  %v3471_v54 = vld [vmem:[%s2731_s6 + $0x3c8] sm:$0xff] }
  0x8e   : > { %v520_v16 = vsel %vm315_vm0, %v266_v55, 0.0  ;;  %v809_v19 = vmax.f32 %v805_v0, %v808_v60  ;;  %v811_v8 = vmax.f32 %v807_v27, %v810_v7  ;;  %v816_v9 = vsel %vm315_vm0, %v3390_v24, -inf  ;;  %v3457_v7 = vld [vmem:[%s2731_s6 + $0x3a8] sm:$0xff] }
  0x8f   : > { %v394_v20 = vadd.f32 %v393_v63, %v392_v43  ;;  %v519_v21 = vadd.f32 %v518_v13, %v517_v40  ;;  %v818_v45 = vsel %vm315_vm0, %v3393_v2, -inf  ;;  %v397_v34 = vsel %vm315_vm0, %v4736_v22, 0.0 }
  0x90   : > { %v522_v55 = vsel %vm315_vm0, %v268_v50, 0.0  ;;  %v813_v47 = vmax.f32 %v809_v19, %v812_v18  ;;  %v815_v48 = vmax.f32 %v811_v8, %v814_v1  ;;  %v820_v51 = vsel %vm315_vm0, %v3403_v25, -inf  ;;  %v4740_v18 = vld [vmem:[#allocation29_spill] sm:$0xff] }
  0x91   : > { %v396_v62 = vadd.f32 %v395_v46, %v394_v20  ;;  %v521_v38 = vadd.f32 %v520_v16, %v519_v21  ;;  %v822_v59 = vsel %vm315_vm0, %v3406_v11, -inf  ;;  %v399_v42 = vsel %vm315_vm0, %v4737_v10, 0.0  ;;  %v3474_v46 = vld [vmem:[%s2731_s6 + $0x3d8] sm:$0xff] }
  0x92   : > { %v524_v50 = vsel %vm315_vm0, %v3344_v31, 0.0  ;;  %v817_v61 = vmax.f32 %v813_v47, %v816_v9  ;;  %v819_v32 = vmax.f32 %v815_v48, %v818_v45  ;;  %v824_v57 = vsel %vm315_vm0, %v3416_v3, -inf  ;;  %v4741_v45 = vld [vmem:[#allocation30_spill] sm:$0xff]  ;;  %v4742_v10 = vld [vmem:[#allocation31_spill] sm:$0xff] }
  0x93   : > { %v398_v39 = vadd.f32 %v397_v34, %v396_v62  ;;  %v523_v12 = vadd.f32 %v522_v55, %v521_v38  ;;  %v826_v30 = vsel %vm315_vm0, %v3419_v14, -inf  ;;  %v401_v52 = vsel %vm315_vm0, %v4738_v15, 0.0  ;;  %v3485_v34 = vld [vmem:[%s2731_s6 + $0x3e8] sm:$0xff]  ;;  %v3488_v55 = vld [vmem:[%s2731_s6 + $0x3f8] sm:$0xff]  ;;  %s3637_s6 = sld [smem:[#allocation4 + $0x3d]] }
  0x94   : > { %v526_v31 = vsel %vm315_vm0, %v3352_v23, 0.0  ;;  %v821_v17 = vmax.f32 %v817_v61, %v820_v51  ;;  %v823_v26 = vmax.f32 %v819_v32, %v822_v59  ;;  %v828_v35 = vsel %vm315_vm0, %v3429_v29, -inf }
  0x95   : > { %v400_v6 = vadd.f32 %v399_v42, %v398_v39  ;;  %v525_v4 = vadd.f32 %v524_v50, %v523_v12  ;;  %v830_v44 = vsel %vm315_vm0, %v3432_v58, -inf  ;;  %v403_v60 = vsel %vm315_vm0, %v4739_v36, 0.0 }
  0x96   : > { %v528_v23 = vsel %vm315_vm0, %v3355_v28, 0.0  ;;  %v825_v63 = vmax.f32 %v821_v17, %v824_v57  ;;  %v827_v13 = vmax.f32 %v823_v26, %v826_v30  ;;  %v832_v43 = vsel %vm315_vm0, %v3443_v5, -inf  ;;  %v4743_v30 = vld [vmem:[#allocation32_spill] sm:$0xff] }
  0x97   : > { %v402_v0 = vadd.f32 %v401_v52, %v400_v6  ;;  %v527_v27 = vadd.f32 %v526_v31, %v525_v4  ;;  %v834_v40 = vsel %vm315_vm0, %v3446_v56, -inf  ;;  %v405_v1 = vsel %vm315_vm0, %v4740_v18, 0.0  ;;  %v4744_v6 = vld [vmem:[#allocation33_spill] sm:$0xff] }
  0x98   : > { %v530_v28 = vsel %vm315_vm0, %v3364_v41, 0.0  ;;  %v829_v16 = vmax.f32 %v825_v63, %v828_v35  ;;  %v831_v19 = vmax.f32 %v827_v13, %v830_v44  ;;  %v836_v21 = vsel %vm315_vm0, %v3457_v7, -inf  ;;  %v4745_v63 = vld [vmem:[#allocation34_spill] sm:$0xff] }
  0x99   : > { %v404_v8 = vadd.f32 %v403_v60, %v402_v0  ;;  %v529_v20 = vadd.f32 %v528_v23, %v527_v27  ;;  %v838_v9 = vsel %vm315_vm0, %v3460_v37, -inf  ;;  %v407_v22 = vsel %vm315_vm0, %v4741_v45, 0.0 }
  0x9a   : > { %v532_v41 = vsel %vm315_vm0, %v3367_v53, 0.0  ;;  %v833_v47 = vmax.f32 %v829_v16, %v832_v43  ;;  %v835_v48 = vmax.f32 %v831_v19, %v834_v40  ;;  %v840_v51 = vsel %vm315_vm0, %v3471_v54, -inf  ;;  %v4746_v40 = vld [vmem:[#allocation35_spill] sm:$0xff]  ;;  %v4747_v16 = vld [vmem:[#allocation36_spill] sm:$0xff] }
  0x9b   : > { %v406_v62 = vadd.f32 %v405_v1, %v404_v8  ;;  %v531_v38 = vadd.f32 %v530_v28, %v529_v20  ;;  %v842_v59 = vsel %vm315_vm0, %v3474_v46, -inf  ;;  %v409_v42 = vsel %vm315_vm0, %v4742_v10, 0.0 }
  0x9c   : > { %v534_v50 = vsel %vm315_vm0, %v3377_v33, 0.0  ;;  %v837_v61 = vmax.f32 %v833_v47, %v836_v21  ;;  %v839_v32 = vmax.f32 %v835_v48, %v838_v9  ;;  %v844_v12 = vsel %vm315_vm0, %v3485_v34, -inf  ;;  %v4748_v21 = vld [vmem:[#allocation37_spill] sm:$0xff] }
  0x9d   : > { %v408_v39 = vadd.f32 %v407_v22, %v406_v62  ;;  %v533_v53 = vadd.f32 %v532_v41, %v531_v38  ;;  %v846_v57 = vsel %vm315_vm0, %v3488_v55, -inf  ;;  %v411_v15 = vsel %vm315_vm0, %v4743_v30, 0.0  ;;  %v4749_v41 = vld [vmem:[#allocation38_spill] sm:$0xff] }
  0x9e   : > { %v536_v52 = vsel %vm315_vm0, %v3380_v49, 0.0  ;;  %v841_v31 = vmax.f32 %v837_v61, %v840_v51  ;;  %v843_v17 = vmax.f32 %v839_v32, %v842_v59  ;;  %v413_v4 = vsel %vm315_vm0, %v4744_v6, 0.0  ;;  %v4750_v51 = vld [vmem:[#allocation39_spill] sm:$0xff] }
  0x9f   : > { %v410_v26 = vadd.f32 %v409_v42, %v408_v39  ;;  %v535_v33 = vadd.f32 %v534_v50, %v533_v53  ;;  %v538_v35 = vsel %vm315_vm0, %v3390_v24, 0.0  ;;  %v415_v13 = vsel %vm315_vm0, %v4745_v63, 0.0  ;;  %v4751_v50 = vld [vmem:[#allocation40_spill] sm:$0xff]  ;;  %v4752_v53 = vld [vmem:[#allocation41_spill] sm:$0xff] }
  0xa0   : > { %v845_v44 = vmax.f32 %v841_v31, %v844_v12  ;;  %v847_v36 = vmax.f32 %v843_v17, %v846_v57  ;;  %v540_v49 = vsel %vm315_vm0, %v3393_v2, 0.0  ;;  %v417_v18 = vsel %vm315_vm0, %v4746_v40, 0.0 }
  0xa1   : > { %v412_v60 = vadd.f32 %v411_v15, %v410_v26  ;;  %v537_v23 = vadd.f32 %v536_v52, %v535_v33  ;;  %v542_v1 = vsel %vm315_vm0, %v3403_v25, 0.0  ;;  %v419_v19 = vsel %vm315_vm0, %v4747_v16, 0.0  ;;  %v4753_v15 = vld [vmem:[#allocation42_spill] sm:$0xff]  ;;  %v4754_v26 = vld [vmem:[#allocation43_spill] sm:$0xff] }
  0xa2   : > { %v848_v0 = vmax.f32 %v845_v44, %v847_v36  ;;  %v544_v8 = vsel %vm315_vm0, %v3406_v11, 0.0  ;;  %v421_v9 = vsel %vm315_vm0, %v4748_v21, 0.0  ;;  %v546_v45 = vsel %vm315_vm0, %v3416_v3, 0.0 }
  0xa3   : > { %v414_v27 = vadd.f32 %v413_v4, %v412_v60  ;;  %v539_v43 = vadd.f32 %v538_v35, %v537_v23  ;;  %v423_v47 = vsel %vm315_vm0, %v4749_v41, 0.0  ;;  %v548_v48 = vsel %vm315_vm0, %v3419_v14, 0.0  ;;  %v4755_v35 = vld [vmem:[#allocation44_spill] sm:$0xff]  ;;  %v4756_v23 = vld [vmem:[#allocation45_spill] sm:$0xff] }
  0xa4   : > { %853 = vrot.lane.b32.xlu1 %v848_v0, %s2625_s7  ;;  %v425_v11 = vsel %vm315_vm0, %v4750_v51, 0.0  ;;  %v550_v59 = vsel %vm315_vm0, %v3429_v29, 0.0  ;;  %v427_v3 = vsel %vm315_vm0, %v4751_v50, 0.0  ;;  %v552_v61 = vsel %vm315_vm0, %v3432_v58, 0.0 }
  0xa5   : > { %v416_v24 = vadd.f32 %v415_v13, %v414_v27  ;;  %v541_v28 = vadd.f32 %v540_v49, %v539_v43  ;;  %v429_v14 = vsel %vm315_vm0, %v4752_v53, 0.0  ;;  %v554_v12 = vsel %vm315_vm0, %v3443_v5, 0.0  ;;  %v4757_v49 = vld [vmem:[#allocation46_spill] sm:$0xff] }
  0xa6   : > { %v431_v29 = vsel %vm315_vm0, %v4753_v15, 0.0  ;;  %v556_v52 = vsel %vm315_vm0, %v3446_v56, 0.0  ;;  %v558_v58 = vsel %vm315_vm0, %v3457_v7, 0.0  ;;  %v433_v33 = vsel %vm315_vm0, %v4754_v26, 0.0 }
  0xa7   : > { %v418_v2 = vadd.f32 %v417_v18, %v416_v24  ;;  %v543_v20 = vadd.f32 %v542_v1, %v541_v28  ;;  %v435_v5 = vsel %vm315_vm0, %v4755_v35, 0.0  ;;  %v560_v44 = vsel %vm315_vm0, %v3460_v37, 0.0  ;;  %v4758_v18 = vld [vmem:[#allocation47_spill] sm:$0xff] }
  0xa8   : > { %v437_v56 = vsel %vm315_vm0, %v4756_v23, 0.0  ;;  %v562_v63 = vsel %vm315_vm0, %v3471_v54, 0.0  ;;  %v439_v0 = vsel %vm315_vm0, %v4757_v49, 0.0  ;;  %v564_v27 = vsel %vm315_vm0, %v3474_v46, 0.0 }
  0xa9   : > { %v420_v22 = vadd.f32 %v419_v19, %v418_v2  ;;  %v545_v25 = vadd.f32 %v544_v8, %v543_v20  ;;  %v441_v37 = vsel %vm315_vm0, %v4758_v18, 0.0  ;;  %v566_v1 = vsel %vm315_vm0, %v3485_v34, 0.0 }
  0xaa   : > { %v568_v54 = vsel %vm315_vm0, %v3488_v55, 0.0  ;;  %v941_v21 = vstv %s3575_s8  ;;  %v997_v41 = vstv %s3582_s16  ;;  %s3653_s8 = sld [smem:[#allocation4 + $0x40]] }
  0xab   : > { %v422_v62 = vadd.f32 %v421_v9, %v420_v22  ;;  %v547_v38 = vadd.f32 %v546_v45, %v545_v25  ;;  %v969_v22 = vstv %s3579_s15  ;;  %s3659_s15 = sld [smem:[#allocation4 + $0x31]]  ;;  %s3665_s16 = sld [smem:[#allocation4]] }
  0xad   : > { %v424_v10 = vadd.f32 %v423_v47, %v422_v62  ;;  %v549_v42 = vadd.f32 %v548_v48, %v547_v38  ;;  %v1025_v48 = vstv %s3588_s18  ;;  %v1053_v38 = vstv %s3593_s23  ;;  %s3668_s18 = sld [smem:[#allocation4 + $0x41]]  ;;  %s3679_s23 = sld [smem:[#allocation4 + $0x42]] }
  0xaf   : > { %v426_v32 = vadd.f32 %v425_v11, %v424_v10  ;;  %v551_v39 = vadd.f32 %v550_v59, %v549_v42  ;;  %v1081_v11 = vstv %s3598_s25  ;;  %s3690_s25 = sld [smem:[#allocation4 + $0x43]] }
  0xb0   : > { %v1309_v18 = vstv %s3653_s8  ;;  %s3741_s8 = sld [smem:[#allocation4 + $0x4b]] }
  0xb1   : > { %v428_v57 = vadd.f32 %v427_v3, %v426_v32  ;;  %v553_v30 = vadd.f32 %v552_v61, %v551_v39 }
  0xb3   : > { %v555_v31 = vadd.f32 %v554_v12, %v553_v30  ;;  %v430_v17 = vadd.f32 %v429_v14, %v428_v57  ;;  %v1125_v14 = vstv %s3613_s30  ;;  %v1153_v30 = vstv %s3617_s3  ;;  %s3701_s30 = sld [smem:[#allocation4 + $0x44]]  ;;  %s3712_s3 = sld [smem:[#allocation4 + $0x45]] }
  0xb5   : > { %v432_v6 = vadd.f32 %v431_v29, %v430_v17  ;;  %v557_v4 = vadd.f32 %v556_v52, %v555_v31  ;;  %v1181_v52 = vstv %s3624_s4  ;;  %s3719_s4 = sld [smem:[#allocation4 + $0x47]] }
  0xb7   : > { %v434_v36 = vadd.f32 %v433_v33, %v432_v6  ;;  %v559_v60 = vadd.f32 %v558_v58, %v557_v4  ;;  %v1209_v58 = vstv %s3630_s5  ;;  %v1237_v6 = vstv %s3637_s6  ;;  %s3726_s5 = sld [smem:[#allocation4 + $0x48]]  ;;  %s3731_s6 = sld [smem:[#allocation4 + $0x49]] }
  0xb9   : > { %v436_v7 = vadd.f32 %v435_v5, %v434_v36  ;;  %v561_v13 = vadd.f32 %v560_v44, %v559_v60 }
  0xbb   : > { %v438_v43 = vadd.f32 %v437_v56, %v436_v7  ;;  %v563_v40 = vadd.f32 %v562_v63, %v561_v13 }
  0xbd   : > { %v440_v24 = vadd.f32 %v439_v0, %v438_v43  ;;  %v565_v28 = vadd.f32 %v564_v27, %v563_v40 }
  0xbf   : > { %v442_v16 = vadd.f32 %v441_v37, %v440_v24  ;;  %v567_v19 = vadd.f32 %v566_v1, %v565_v28  ;;  %v921_v28 = vstv %s3659_s15  ;;  %s3746_s15 = sld [smem:[#allocation4 + $0x4c]] }
  0xc1   : > { %572 = vrot.lane.b32.xlu0 %v442_v16, %s2625_s7  ;;  %v569_v8 = vadd.f32 %v568_v54, %v567_v19  ;;  %v913_v54 = vstv %s3665_s16  ;;  %v1337_v19 = vstv %s3668_s18  ;;  %s3751_s16 = sld [smem:[#allocation4 + $0x4e]]  ;;  %s3756_s18 = sld [smem:[#allocation4 + $0x4f]] }
  0xc5   : > { %574 = vrot.lane.b32.xlu0 %v569_v8, %s2625_s7  ;;  %s3644_s7 = sld [smem:[#allocation4 + $0x3e]] }
  0xcb   : > { %v1265_v23 = vstv %s3644_s7  ;;  %s3736_s7 = sld [smem:[#allocation4 + $0x4a]] }
  0xe2   : > { %v852_v46 = vpop.permute.xlu1 %851 }
  0xe3   : > { %v857_v2 = vsel %vm578_vm1, 0.0, %v852_v46 }
  0xe4   : > { %v859_v34 = vsel %vm581_vm2, %v857_v2, 0.0 }
  0xe5   : > { %v863_v20 = vrot.slane %v859_v34, 5 }
  0xe7   : > { %v869_v55 = vsel %vm586_vm3, 0.0, %v863_v20 }
  0xe8   : > { %880 = vst.msk [vmem:[#allocation3] sm:$0xff] %vm875_vm4, %v869_v55 }
  0xef   : > { %v3584_v9 = vld [vmem:[#allocation3] sm:$0xff] }
  0xf0   : > { %v942_v45 = vmul.f32 %v941_v21, %v3584_v9  ;;  %v970_v25 = vmul.f32 %v969_v22, %v3584_v9  ;;  %v998_v47 = vmul.f32 %v997_v41, %v3584_v9  ;;  %v1026_v62 = vmul.f32 %v1025_v48, %v3584_v9 }
  0xf1   : > { %v1054_v51 = vmul.f32 %v1053_v38, %v3584_v9  ;;  %v1082_v59 = vmul.f32 %v1081_v11, %v3584_v9  ;;  %v922_v2 = vmul.f32 %v921_v28, %v3584_v9 }
  0xf2   : > { %946 = vrot.lane.b32.xlu0 %v942_v45, %s2626_s20 }
  0xf6   : > { %974 = vrot.lane.b32.xlu0 %v970_v25, %s4671_s24 }
  0xfa   : > { %1002 = vrot.lane.b32.xlu0 %v998_v47, %s2628_s26 }
  0xfe   : > { %1030 = vrot.lane.b32.xlu0 %v1026_v62, %s2629_s27 }
 0x102   : > { %1058 = vrot.lane.b32.xlu0 %v1054_v51, %s2630_s28  ;;  %v1421_v51 = vstv %s3701_s30  ;;  %s3771_s30 = sld [smem:[#allocation4 + $0x52]] }
 0x106   : > { %1086 = vrot.lane.b32.xlu0 %v1082_v59, %s4673_s29 }
 0x116   : > { %v854_v10 = vpop.permute.xlu1 %853 }
 0x117   : > { %v858_v42 = vsel %vm578_vm1, 0.0, %v854_v10  ;;  %v1449_v10 = vstv %s3712_s3  ;;  %s3778_s3 = sld [smem:[#allocation4 + $0x53]] }
 0x118   : > { %v860_v50 = vsel %vm581_vm2, %v858_v42, 0.0 }
 0x119   : > { %v864_v3 = vrot.slane %v860_v50, 5 }
 0x11b   : > { %v865_v61 = vsel %vm586_vm3, %v863_v20, %v864_v3  ;;  %v870_v32 = vsel %vm586_vm3, %v864_v3, 0.0 }
 0x11c   : > { %881 = vst.msk [vmem:[#allocation3 + $0x8] sm:$0xff] %vm875_vm4, %v865_v61 }
 0x11d   : > { %882 = vst.msk [vmem:[#allocation3 + $0x10] sm:$0x3f] %vm878_vm5, %v870_v32  ;;  %v1493_v32 = vstv %s3719_s4  ;;  %s3783_s4 = sld [smem:[#allocation4 + $0x55]] }
 0x123   : > { %v3619_v39 = vld [vmem:[#allocation3 + $0x8] sm:$0xff] }
 0x124   : > { %v3621_v53 = vld [vmem:[#allocation3 + $0x1] sm:$0xff]  ;;  %v943_v12 = vmul.f32 %v941_v21, %v3619_v39  ;;  %v971_v15 = vmul.f32 %v969_v22, %v3619_v39  ;;  %v999_v31 = vmul.f32 %v997_v41, %v3619_v39  ;;  %v1027_v26 = vmul.f32 %v1025_v48, %v3619_v39  ;;  %v1104_v49 = vld [vmem:[#allocation3 + $0x9] sm:$0xff] }
 0x125   : > { %v1126_v57 = vmul.f32 %v1125_v14, %v3621_v53  ;;  %v1154_v29 = vmul.f32 %v1153_v30, %v3621_v53  ;;  %v1182_v17 = vmul.f32 %v1181_v52, %v3621_v53  ;;  %v1210_v33 = vmul.f32 %v1209_v58, %v3621_v53  ;;  %v1287_v40 = vld [vmem:[#allocation3 + $0x2] sm:$0xff]  ;;  %v1288_v50 = vld [vmem:[#allocation3 + $0xa] sm:$0xff] }
 0x126   : > { %948 = vrot.lane.b32.xlu1 %v943_v12, %s2626_s20  ;;  %v1055_v35 = vmul.f32 %v1053_v38, %v3619_v39  ;;  %v1238_v36 = vmul.f32 %v1237_v6, %v3621_v53  ;;  %v1083_v63 = vmul.f32 %v1081_v11, %v3619_v39  ;;  %v1266_v27 = vmul.f32 %v1265_v23, %v3621_v53  ;;  %v1471_v61 = vld [vmem:[#allocation3 + $0x3] sm:$0xff] }
 0x127   : > { %1130 = vrot.lane.b32.xlu0 %v1126_v57, %s2626_s20  ;;  %v1127_v37 = vmul.f32 %v1125_v14, %v1104_v49  ;;  %v1310_v16 = vmul.f32 %v1309_v18, %v1287_v40  ;;  %v1155_v8 = vmul.f32 %v1153_v30, %v1104_v49  ;;  %v1338_v20 = vmul.f32 %v1337_v19, %v1287_v40 }
 0x128   : > { %v1365_v21 = vstv %s3679_s23  ;;  %v1183_v45 = vmul.f32 %v1181_v52, %v1104_v49  ;;  %v923_v9 = vmul.f32 %v921_v28, %v3619_v39  ;;  %v1393_v48 = vstv %s3690_s25  ;;  %s3761_s23 = sld [smem:[#allocation4 + $0x50]]  ;;  %s3766_s25 = sld [smem:[#allocation4 + $0x51]] }
 0x129   : > { %v1366_v41 = vmul.f32 %v1365_v21, %v1287_v40  ;;  %v1211_v62 = vmul.f32 %v1209_v58, %v1104_v49  ;;  %v1394_v38 = vmul.f32 %v1393_v48, %v1287_v40  ;;  %v1239_v11 = vmul.f32 %v1237_v6, %v1104_v49 }
 0x12a   : > { %976 = vrot.lane.b32.xlu1 %v971_v15, %s4671_s24  ;;  %v1422_v59 = vmul.f32 %v1421_v51, %v1287_v40  ;;  %v1267_v42 = vmul.f32 %v1265_v23, %v1104_v49  ;;  %v1450_v3 = vmul.f32 %v1449_v10, %v1287_v40  ;;  %v1311_v39 = vmul.f32 %v1309_v18, %v1288_v50 }
 0x12b   : > { %1158 = vrot.lane.b32.xlu0 %v1154_v29, %s4671_s24  ;;  %v1494_v14 = vmul.f32 %v1493_v32, %v1471_v61  ;;  %v1521_v12 = vstv %s3726_s5  ;;  %v1339_v57 = vmul.f32 %v1337_v19, %v1288_v50  ;;  %v1549_v15 = vstv %s3731_s6  ;;  %s3790_s5 = sld [smem:[#allocation4 + $0x56]]  ;;  %s3799_s6 = sld [smem:[#allocation4 + $0x1]] }
 0x12c   : > { %v1522_v30 = vmul.f32 %v1521_v12, %v1471_v61  ;;  %v1367_v29 = vmul.f32 %v1365_v21, %v1288_v50  ;;  %v1550_v52 = vmul.f32 %v1549_v15, %v1471_v61  ;;  %v1861_v21 = vstv %s3783_s4  ;;  %s3893_s4 = sld [smem:[#allocation4 + $0xc]] }
 0x12e   : > { %1004 = vrot.lane.b32.xlu1 %v999_v31, %s2628_s26  ;;  %v1577_v31 = vstv %s3736_s7  ;;  %v1733_v49 = vstv %s3761_s23  ;;  %v1761_v40 = vstv %s3766_s25  ;;  %s3805_s7 = sld [smem:[#allocation4 + $0x2]]  ;;  %s3847_s23 = sld [smem:[#allocation4 + $0x8]] }
 0x12f   : > { %1186 = vrot.lane.b32.xlu0 %v1182_v17, %s2628_s26  ;;  %v1395_v17 = vmul.f32 %v1393_v48, %v1288_v50  ;;  %v1578_v58 = vmul.f32 %v1577_v31, %v1471_v61  ;;  %s3858_s25 = sld [smem:[#allocation4 + $0x9]] }
 0x132   : > { %1032 = vrot.lane.b32.xlu1 %v1027_v26, %s2629_s27  ;;  %v1605_v26 = vstv %s3741_s8  ;;  %s3813_s8 = sld [smem:[#allocation4 + $0x3]] }
 0x133   : > { %v573_v4 = vpop.permute.xlu0 %572  ;;  %1214 = vrot.lane.b32.xlu0 %v1210_v33, %s2629_s27  ;;  %v1423_v33 = vmul.f32 %v1421_v51, %v1288_v50  ;;  %v1606_v6 = vmul.f32 %v1605_v26, %v1471_v61 }
 0x134   : > { %v579_v5 = vsel %vm578_vm1, 0.0, %v573_v4  ;;  %v1633_v4 = vstv %s3746_s15  ;;  %s3821_s15 = sld [smem:[#allocation4 + $0x4]] }
 0x135   : > { %v582_v44 = vsel %vm581_vm2, %v579_v5, 0.0  ;;  %v1472_v5 = vld [vmem:[#allocation3 + $0xb] sm:$0xff] }
 0x136   : > { %1060 = vrot.lane.b32.xlu1 %v1055_v35, %s2630_s28  ;;  %v587_v60 = vrot.slane %v582_v44, 5  ;;  %v1451_v35 = vmul.f32 %v1449_v10, %v1288_v50  ;;  %v1634_v44 = vmul.f32 %v1633_v4, %v1471_v61  ;;  %v1495_v23 = vmul.f32 %v1493_v32, %v1472_v5 }
 0x137   : > { %v575_v56 = vpop.permute.xlu0 %574  ;;  %1242 = vrot.lane.b32.xlu0 %v1238_v36, %s2630_s28  ;;  %v1655_v36 = vld [vmem:[#allocation3 + $0x4] sm:$0xff]  ;;  %v1579_v18 = vmul.f32 %v1577_v31, %v1472_v5  ;;  %v1635_v19 = vmul.f32 %v1633_v4, %v1472_v5  ;;  %v955_v10 = vstv %s3805_s7  ;;  %s3926_s7 = sld [smem:[#allocation4 + $0x10]] }
 0x138   : > { %v593_v7 = vsel %vm586_vm3, 0.0, %v587_v60  ;;  %v580_v13 = vsel %vm578_vm1, 0.0, %v575_v56 }
 0x139   : > { %876 = vst.msk [vmem:[#allocation2] sm:$0xff] %vm875_vm4, %v593_v7  ;;  %v583_v0 = vsel %vm581_vm2, %v580_v13, 0.0  ;;  %v1523_v7 = vmul.f32 %v1521_v12, %v1472_v5 }
 0x13a   : > { %1088 = vrot.lane.b32.xlu1 %v1083_v63, %s4673_s29  ;;  %v588_v43 = vrot.slane %v583_v0, 5  ;;  %v1705_v63 = vstv %s3756_s18  ;;  %v1551_v0 = vmul.f32 %v1549_v15, %v1472_v5  ;;  %s3835_s18 = sld [smem:[#allocation4 + $0x6]] }
 0x13b   : > { %1270 = vrot.lane.b32.xlu0 %v1266_v27, %s4673_s29  ;;  %v1706_v13 = vmul.f32 %v1705_v63, %v1655_v36  ;;  %v1734_v27 = vmul.f32 %v1733_v49, %v1655_v36 }
 0x13c   : > { %v589_v1 = vsel %vm586_vm3, %v587_v60, %v588_v43  ;;  %v594_v24 = vsel %vm586_vm3, %v588_v43, 0.0  ;;  %v1677_v60 = vstv %s3751_s16  ;;  %s3827_s16 = sld [smem:[#allocation4 + $0x5]] }
 0x13d   : > { %877 = vst.msk [vmem:[#allocation2 + $0x8] sm:$0xff] %vm875_vm4, %v589_v1  ;;  %v1678_v56 = vmul.f32 %v1677_v60, %v1655_v36  ;;  %v1789_v1 = vstv %s3771_s30  ;;  %s3871_s30 = sld [smem:[#allocation4 + $0xa]] }
 0x13e   : > { %879 = vst.msk [vmem:[#allocation2 + $0x10] sm:$0x3f] %vm878_vm5, %v594_v24  ;;  %1132 = vrot.lane.b32.xlu1 %v1127_v37, %s2626_s20  ;;  %v1762_v37 = vmul.f32 %v1761_v40, %v1655_v36  ;;  %v1607_v24 = vmul.f32 %v1605_v26, %v1472_v5 }
 0x13f   : > { %1314 = vrot.lane.b32.xlu0 %v1310_v16, %s2626_s20  ;;  %v1817_v16 = vstv %s3778_s3  ;;  %s3882_s3 = sld [smem:[#allocation4 + $0xb]] }
 0x140   : > { %v3692_v46 = vld [vmem:[#allocation2] sm:$0xff] }
 0x141   : > { %v914_v34 = vmul.f32 %v913_v54, %v3692_v46  ;;  %v956_v50 = vmul.f32 %v955_v10, %v3692_v46 }
 0x142   : > { %1160 = vrot.lane.b32.xlu1 %v1155_v8, %s4671_s24  ;;  %v1656_v8 = vld [vmem:[#allocation3 + $0xc] sm:$0xff] }
 0x143   : > { %v3698_v55 = vadd.f32 %v922_v2, %v914_v34  ;;  %1342 = vrot.lane.b32.xlu0 %v1338_v20, %s4671_s24  ;;  %v1818_v2 = vmul.f32 %v1817_v16, %v1655_v36  ;;  %v3796_v20 = vld [vmem:[#allocation3 + $0x5] sm:$0xff]  ;;  %v1735_v51 = vmul.f32 %v1733_v49, %v1656_v8  ;;  %v1791_v61 = vmul.f32 %v1789_v1, %v1656_v8 }
 0x144   : > { %v3703_v22 = vld [vmem:[#allocation2 + $0x8] sm:$0xff] }
 0x145   : > { %v915_v25 = vmul.f32 %v913_v54, %v3703_v22  ;;  %v1790_v54 = vmul.f32 %v1789_v1, %v1655_v36  ;;  %v1111_v36 = vstv %s3847_s23  ;;  %s3985_s23 = sld [smem:[#allocation4 + $0x16]] }
 0x146   : > { %1188 = vrot.lane.b32.xlu1 %v1183_v45, %s2628_s26  ;;  %v1679_v45 = vmul.f32 %v1677_v60, %v1656_v8 }
 0x147   : > { %v3709_v47 = vadd.f32 %v923_v9, %v915_v25  ;;  %1370 = vrot.lane.b32.xlu0 %v1366_v41, %s2628_s26  ;;  %v1862_v9 = vmul.f32 %v1861_v21, %v3796_v20  ;;  %v1889_v25 = vstv %s3790_s5  ;;  %v1707_v41 = vmul.f32 %v1705_v63, %v1656_v8  ;;  %s3904_s5 = sld [smem:[#allocation4 + $0xd]] }
 0x14a   : > { %1216 = vrot.lane.b32.xlu1 %v1211_v62, %s2629_s27  ;;  %v1890_v62 = vmul.f32 %v1889_v25, %v3796_v20 }
 0x14b   : > { %1398 = vrot.lane.b32.xlu0 %v1394_v38, %s2629_s27  ;;  %v927_v38 = vstv %s3799_s6  ;;  %s3915_s6 = sld [smem:[#allocation4 + $0xf]] }
 0x14e   : > { %1244 = vrot.lane.b32.xlu1 %v1239_v11, %s2630_s28  ;;  %v928_v11 = vmul.f32 %v927_v38, %v3692_v46 }
 0x14f   : > { %1426 = vrot.lane.b32.xlu0 %v1422_v59, %s2630_s28 }
 0x152   : > { %1272 = vrot.lane.b32.xlu1 %v1267_v42, %s4673_s29  ;;  %v1763_v42 = vmul.f32 %v1761_v40, %v1656_v8 }
 0x153   : > { %1454 = vrot.lane.b32.xlu0 %v1450_v3, %s4673_s29  ;;  %v983_v3 = vstv %s3813_s8  ;;  %s3941_s8 = sld [smem:[#allocation4 + $0x11]] }
 0x156   : > { %1316 = vrot.lane.b32.xlu1 %v1311_v39, %s2626_s20  ;;  %v984_v39 = vmul.f32 %v983_v3, %v3692_v46 }
 0x157   : > { %1498 = vrot.lane.b32.xlu0 %v1494_v14, %s2626_s20  ;;  %v1011_v14 = vstv %s3821_s15  ;;  %s3952_s15 = sld [smem:[#allocation4 + $0x12]] }
 0x15a   : > { %1344 = vrot.lane.b32.xlu1 %v1339_v57, %s4671_s24  ;;  %v1819_v57 = vmul.f32 %v1817_v16, %v1656_v8  ;;  %v1013_v16 = vmul.f32 %v1011_v14, %v3703_v22 }
 0x15b   : > { %1526 = vrot.lane.b32.xlu0 %v1522_v30, %s4671_s24  ;;  %v3840_v30 = vld [vmem:[#allocation3 + $0xd] sm:$0xff] }
 0x15c   : > { %v1891_v4 = vmul.f32 %v1889_v25, %v3840_v30 }
 0x15e   : > { %1372 = vrot.lane.b32.xlu1 %v1367_v29, %s2628_s26  ;;  %v1012_v29 = vmul.f32 %v1011_v14, %v3692_v46  ;;  %v1323_v14 = vstv %s3926_s7  ;;  %s4066_s7 = sld [smem:[#allocation4 + $0x1e]] }
 0x15f   : > { %1554 = vrot.lane.b32.xlu0 %v1550_v52, %s2628_s26  ;;  %v1039_v52 = vstv %s3827_s16  ;;  %s3963_s16 = sld [smem:[#allocation4 + $0x13]] }
 0x160   : > { %v1040_v26 = vmul.f32 %v1039_v52, %v3692_v46 }
 0x162   : > { %1400 = vrot.lane.b32.xlu1 %v1395_v17, %s2629_s27  ;;  %v1863_v17 = vmul.f32 %v1861_v21, %v3840_v30 }
 0x163   : > { %1582 = vrot.lane.b32.xlu0 %v1578_v58, %s2629_s27 }
 0x164   : > { %v3775_v43 = vpop.permute.xlu0 %946 }
 0x166   : > { %1428 = vrot.lane.b32.xlu1 %v1423_v33, %s2630_s28  ;;  %v1067_v33 = vstv %s3835_s18  ;;  %s3974_s18 = sld [smem:[#allocation4 + $0x14]] }
 0x167   : > { %1610 = vrot.lane.b32.xlu0 %v1606_v6, %s2630_s28  ;;  %v1068_v5 = vmul.f32 %v1067_v33, %v3692_v46 }
 0x168   : > { %v3786_v28 = vpop.permute.xlu0 %974 }
 0x16a   : > { %1456 = vrot.lane.b32.xlu1 %v1451_v35, %s4673_s29 }
 0x16b   : > { %1638 = vrot.lane.b32.xlu0 %v1634_v44, %s4673_s29  ;;  %v3868_v44 = vld [vmem:[#allocation2 + $0x1] sm:$0xff] }
 0x16c   : > { %v3794_v34 = vpop.permute.xlu0 %1002  ;;  %v1112_v63 = vmul.f32 %v1111_v36, %v3868_v44 }
 0x16e   : > { %1500 = vrot.lane.b32.xlu1 %v1495_v23, %s2626_s20  ;;  %v929_v23 = vmul.f32 %v927_v38, %v3703_v22  ;;  %v1069_v38 = vmul.f32 %v1067_v33, %v3703_v22 }
 0x16f   : > { %1682 = vrot.lane.b32.xlu0 %v1678_v56, %s2626_s20 }
 0x170   : > { %v3808_v48 = vpop.permute.xlu0 %1030 }
 0x172   : > { %1528 = vrot.lane.b32.xlu1 %v1523_v7, %s4671_s24  ;;  %v1139_v7 = vstv %s3858_s25  ;;  %s3996_s25 = sld [smem:[#allocation4 + $0x17]] }
 0x173   : > { %1710 = vrot.lane.b32.xlu0 %v1706_v13, %s4671_s24  ;;  %v957_v13 = vmul.f32 %v955_v10, %v3703_v22 }
 0x174   : > { %v3818_v59 = vpop.permute.xlu0 %1058 }
 0x176   : > { %1556 = vrot.lane.b32.xlu1 %v1551_v0, %s2628_s26  ;;  %v1140_v0 = vmul.f32 %v1139_v7, %v3868_v44 }
 0x177   : > { %1738 = vrot.lane.b32.xlu0 %v1734_v27, %s2628_s26  ;;  %v1167_v27 = vstv %s3871_s30  ;;  %s4011_s30 = sld [smem:[#allocation4 + $0x18]] }
 0x178   : > { %v3830_v32 = vpop.permute.xlu0 %1086  ;;  %v1168_v1 = vmul.f32 %v1167_v27, %v3868_v44 }
 0x17a   : > { %1584 = vrot.lane.b32.xlu1 %v1579_v18, %s2629_s27  ;;  %v985_v18 = vmul.f32 %v983_v3, %v3703_v22 }
 0x17b   : > { %1766 = vrot.lane.b32.xlu0 %v1762_v37, %s2629_s27 }
 0x17e   : > { %1612 = vrot.lane.b32.xlu1 %v1607_v24, %s2630_s28  ;;  %v1195_v24 = vstv %s3882_s3  ;;  %s4022_s3 = sld [smem:[#allocation4 + $0x19]] }
 0x17f   : > { %1794 = vrot.lane.b32.xlu0 %v1790_v54, %s2630_s28  ;;  %v1196_v8 = vmul.f32 %v1195_v24, %v3868_v44 }
 0x182   : > { %1640 = vrot.lane.b32.xlu1 %v1635_v19, %s4673_s29 }
 0x183   : > { %1822 = vrot.lane.b32.xlu0 %v1818_v2, %s4673_s29  ;;  %v1223_v2 = vstv %s3893_s4  ;;  %s4033_s4 = sld [smem:[#allocation4 + $0x1a]] }
 0x184   : > { %v1224_v25 = vmul.f32 %v1223_v2, %v3868_v44 }
 0x186   : > { %1684 = vrot.lane.b32.xlu1 %v1679_v45, %s2626_s20  ;;  %v1041_v45 = vmul.f32 %v1039_v52, %v3703_v22 }
 0x187   : > { %1866 = vrot.lane.b32.xlu0 %v1862_v9, %s2626_s20 }
 0x18a   : > { %1712 = vrot.lane.b32.xlu1 %v1707_v41, %s4671_s24  ;;  %v1251_v41 = vstv %s3904_s5  ;;  %s4044_s5 = sld [smem:[#allocation4 + $0x1b]] }
 0x18b   : > { %1894 = vrot.lane.b32.xlu0 %v1890_v62, %s4671_s24  ;;  %v1252_v10 = vmul.f32 %v1251_v41, %v3868_v44 }
 0x18e   : > { %1740 = vrot.lane.b32.xlu1 %v1735_v51, %s2628_s26  ;;  %v3932_v51 = vld [vmem:[#allocation2 + $0x9] sm:$0xff] }
 0x18f   : > { %932 = vrot.lane.b32.xlu0 %v928_v11, %s2626_s20  ;;  %v1113_v22 = vmul.f32 %v1111_v36, %v3932_v51 }
 0x192   : > { %1768 = vrot.lane.b32.xlu1 %v1763_v42, %s2629_s27  ;;  %v3938_v42 = vld [vmem:[#allocation2 + $0x2] sm:$0xff] }
 0x193   : > { %960 = vrot.lane.b32.xlu0 %v956_v50, %s4671_s24  ;;  %v1295_v50 = vstv %s3915_s6  ;;  %s4055_s6 = sld [smem:[#allocation4 + $0x1d]] }
 0x196   : > { %1796 = vrot.lane.b32.xlu1 %v1791_v61, %s2630_s28 }
 0x197   : > { %988 = vrot.lane.b32.xlu0 %v984_v39, %s2628_s26  ;;  %v1296_v39 = vmul.f32 %v1295_v50, %v3938_v42 }
 0x198   : > { %v3837_v12 = vpop.permute.xlu1 %948 }
 0x199   : > { %v3843_v15 = vpop.permute.xlu0 %1130 }
 0x19a   : > { %1824 = vrot.lane.b32.xlu1 %v1819_v57, %s4673_s29 }
 0x19b   : > { %1016 = vrot.lane.b32.xlu0 %v1012_v29, %s2629_s27  ;;  %v1141_v29 = vmul.f32 %v1139_v7, %v3932_v51  ;;  %v1197_v7 = vmul.f32 %v1195_v24, %v3932_v51 }
 0x19c   : > { %v3849_v31 = vpop.permute.xlu1 %976 }
 0x19d   : > { %v3854_v58 = vpop.permute.xlu0 %1158 }
 0x19e   : > { %1868 = vrot.lane.b32.xlu1 %v1863_v17, %s2626_s20  ;;  %v1324_v17 = vmul.f32 %v1323_v14, %v3938_v42 }
 0x19f   : > { %1044 = vrot.lane.b32.xlu0 %v1040_v26, %s2630_s28  ;;  %v1351_v26 = vstv %s3941_s8  ;;  %s4081_s8 = sld [smem:[#allocation4 + $0x1f]] }
 0x1a0   : > { %v3860_v6 = vpop.permute.xlu1 %1004  ;;  %v1352_v36 = vmul.f32 %v1351_v26, %v3938_v42 }
 0x1a1   : > { %v3865_v35 = vpop.permute.xlu0 %1186 }
 0x1a2   : > { %1896 = vrot.lane.b32.xlu1 %v1891_v4, %s4671_s24  ;;  %v1169_v4 = vmul.f32 %v1167_v27, %v3932_v51  ;;  %v1407_v27 = vstv %s3963_s16  ;;  %s4103_s16 = sld [smem:[#allocation4 + $0x21]] }
 0x1a3   : > { %1072 = vrot.lane.b32.xlu0 %v1068_v5, %s4673_s29 }
 0x1a4   : > { %v3873_v60 = vpop.permute.xlu1 %1032 }
 0x1a5   : > { %v3878_v56 = vpop.permute.xlu0 %1214 }
 0x1a6   : > { %934 = vrot.lane.b32.xlu1 %v929_v23, %s2626_s20  ;;  %v1379_v23 = vstv %s3952_s15  ;;  %s4092_s15 = sld [smem:[#allocation4 + $0x20]] }
 0x1a7   : > { %1116 = vrot.lane.b32.xlu0 %v1112_v63, %s2626_s20 }
 0x1a8   : > { %v3884_v46 = vpop.permute.xlu1 %1060 }
 0x1a9   : > { %v3889_v49 = vpop.permute.xlu0 %1242 }
 0x1aa   : > { %962 = vrot.lane.b32.xlu1 %v957_v13, %s4671_s24 }
 0x1ab   : > { %1144 = vrot.lane.b32.xlu0 %v1140_v0, %s4671_s24  ;;  %v1380_v0 = vmul.f32 %v1379_v23, %v3938_v42 }
 0x1ac   : > { %v3895_v40 = vpop.permute.xlu1 %1088 }
 0x1ad   : > { %v3900_v37 = vpop.permute.xlu0 %1270 }
 0x1ae   : > { %990 = vrot.lane.b32.xlu1 %v985_v18, %s2628_s26 }
 0x1af   : > { %1172 = vrot.lane.b32.xlu0 %v1168_v1, %s2628_s26  ;;  %v1225_v1 = vmul.f32 %v1223_v2, %v3932_v51 }
 0x1b0   : > { %v3906_v54 = vpop.permute.xlu1 %1132 }
 0x1b1   : > { %v3911_v19 = vpop.permute.xlu0 %1314 }
 0x1b2   : > { %1018 = vrot.lane.b32.xlu1 %v1013_v16, %s2629_s27  ;;  %v1408_v16 = vmul.f32 %v1407_v27, %v3938_v42 }
 0x1b3   : > { %1200 = vrot.lane.b32.xlu0 %v1196_v8, %s2629_s27  ;;  %v1435_v8 = vstv %s3974_s18  ;;  %s4114_s18 = sld [smem:[#allocation4 + $0x22]] }
 0x1b4   : > { %v3917_v21 = vpop.permute.xlu1 %1160 }
 0x1b5   : > { %v3922_v9 = vpop.permute.xlu0 %1342 }
 0x1b6   : > { %1046 = vrot.lane.b32.xlu1 %v1041_v45, %s2630_s28 }
 0x1b7   : > { %1228 = vrot.lane.b32.xlu0 %v1224_v25, %s2630_s28  ;;  %v1253_v25 = vmul.f32 %v1251_v41, %v3932_v51 }
 0x1b8   : > { %v3928_v62 = vpop.permute.xlu1 %1188 }
 0x1b9   : > { %v3935_v11 = vpop.permute.xlu0 %1370 }
 0x1ba   : > { %1074 = vrot.lane.b32.xlu1 %v1069_v38, %s4673_s29  ;;  %v4002_v38 = vld [vmem:[#allocation2 + $0xa] sm:$0xff] }
 0x1bb   : > { %1256 = vrot.lane.b32.xlu0 %v1252_v10, %s4673_s29  ;;  %v1436_v10 = vmul.f32 %v1435_v8, %v3938_v42  ;;  %v1297_v41 = vmul.f32 %v1295_v50, %v4002_v38 }
 0x1bc   : > { %v3943_v3 = vpop.permute.xlu1 %1216 }
 0x1bd   : > { %v3948_v61 = vpop.permute.xlu0 %1398 }
 0x1be   : > { %1118 = vrot.lane.b32.xlu1 %v1113_v22, %s2626_s20  ;;  %v4008_v22 = vld [vmem:[#allocation2 + $0x3] sm:$0xff] }
 0x1bf   : > { %1300 = vrot.lane.b32.xlu0 %v1296_v39, %s2626_s20  ;;  %v1479_v39 = vstv %s3985_s23  ;;  %s4125_s23 = sld [smem:[#allocation4 + $0x24]] }
 0x1c0   : > { %v3954_v57 = vpop.permute.xlu1 %1244 }
 0x1c1   : > { %v3959_v52 = vpop.permute.xlu0 %1426 }
 0x1c2   : > { %1146 = vrot.lane.b32.xlu1 %v1141_v29, %s4671_s24 }
 0x1c3   : > { %1328 = vrot.lane.b32.xlu0 %v1324_v17, %s4671_s24 }
 0x1c4   : > { %v3965_v33 = vpop.permute.xlu1 %1272 }
 0x1c5   : > { %v3970_v5 = vpop.permute.xlu0 %1454 }
 0x1c6   : > { %1174 = vrot.lane.b32.xlu1 %v1169_v4, %s2628_s26  ;;  %v1480_v4 = vmul.f32 %v1479_v39, %v4008_v22 }
 0x1c7   : > { %1356 = vrot.lane.b32.xlu0 %v1352_v36, %s2628_s26  ;;  %v1507_v36 = vstv %s3996_s25  ;;  %s4138_s25 = sld [smem:[#allocation4 + $0x25]] }
 0x1c8   : > { %v3976_v63 = vpop.permute.xlu1 %1316 }
 0x1c9   : > { %v3981_v13 = vpop.permute.xlu0 %1498 }
 0x1ca   : > { %1202 = vrot.lane.b32.xlu1 %v1197_v7, %s2629_s27 }
 0x1cb   : > { %1384 = vrot.lane.b32.xlu0 %v1380_v0, %s2629_s27  ;;  %v1325_v0 = vmul.f32 %v1323_v14, %v4002_v38 }
 0x1cc   : > { %v3987_v18 = vpop.permute.xlu1 %1344 }
 0x1cd   : > { %v3992_v24 = vpop.permute.xlu0 %1526 }
 0x1ce   : > { %1230 = vrot.lane.b32.xlu1 %v1225_v1, %s2630_s28  ;;  %v1508_v1 = vmul.f32 %v1507_v36, %v4008_v22 }
 0x1cf   : > { %1412 = vrot.lane.b32.xlu0 %v1408_v16, %s2630_s28  ;;  %v1535_v16 = vstv %s4011_s30  ;;  %s4154_s30 = sld [smem:[#allocation4 + $0x26]] }
 0x1d0   : > { %v3998_v45 = vpop.permute.xlu1 %1372 }
 0x1d1   : > { %v4005_v2 = vpop.permute.xlu0 %1554 }
 0x1d2   : > { %1258 = vrot.lane.b32.xlu1 %v1253_v25, %s4673_s29 }
 0x1d3   : > { %1440 = vrot.lane.b32.xlu0 %v1436_v10, %s4673_s29  ;;  %v1353_v10 = vmul.f32 %v1351_v26, %v4002_v38 }
 0x1d4   : > { %v4013_v29 = vpop.permute.xlu1 %1400 }
 0x1d5   : > { %v4018_v17 = vpop.permute.xlu0 %1582 }
 0x1d6   : > { %1302 = vrot.lane.b32.xlu1 %v1297_v41, %s2626_s20  ;;  %4759 = vst [vmem:[#allocation10_spill] sm:$0xff] %v4018_v17  ;;  %v1536_v41 = vmul.f32 %v1535_v16, %v4008_v22 }
 0x1d7   : > { %1484 = vrot.lane.b32.xlu0 %v1480_v4, %s2626_s20  ;;  %v1563_v4 = vstv %s4022_s3  ;;  %s4166_s3 = sld [smem:[#allocation4 + $0x57]] }
 0x1d8   : > { %v4024_v7 = vpop.permute.xlu1 %1428 }
 0x1d9   : > { %4760 = vst [vmem:[#allocation48_spill] sm:$0xff] %v4024_v7  ;;  %v4029_v50 = vpop.permute.xlu0 %1610 }
 0x1da   : > { %1330 = vrot.lane.b32.xlu1 %v1325_v0, %s4671_s24  ;;  %4761 = vst [vmem:[#allocation49_spill] sm:$0xff] %v4029_v50  ;;  %v1381_v50 = vmul.f32 %v1379_v23, %v4002_v38 }
 0x1db   : > { %1512 = vrot.lane.b32.xlu0 %v1508_v1, %s4671_s24  ;;  %v1564_v1 = vmul.f32 %v1563_v4, %v4008_v22 }
 0x1dc   : > { %v4035_v25 = vpop.permute.xlu1 %1456 }
 0x1dd   : > { %4762 = vst [vmem:[#allocation11_spill] sm:$0xff] %v4035_v25  ;;  %v4040_v14 = vpop.permute.xlu0 %1638  ;;  %v1409_v25 = vmul.f32 %v1407_v27, %v4002_v38 }
 0x1de   : > { %1358 = vrot.lane.b32.xlu1 %v1353_v10, %s2628_s26  ;;  %4763 = vst [vmem:[#allocation12_spill] sm:$0xff] %v4040_v14  ;;  %v1591_v10 = vstv %s4033_s4  ;;  %s4178_s4 = sld [smem:[#allocation4 + $0x27]] }
 0x1df   : > { %1540 = vrot.lane.b32.xlu0 %v1536_v41, %s2628_s26  ;;  %v1619_v41 = vstv %s4044_s5  ;;  %s4185_s5 = sld [smem:[#allocation4 + $0x7]] }
 0x1e0   : > { %v4046_v0 = vpop.permute.xlu1 %1500 }
 0x1e1   : > { %4764 = vst [vmem:[#allocation13_spill] sm:$0xff] %v4046_v0  ;;  %v4051_v26 = vpop.permute.xlu0 %1682  ;;  %v1437_v0 = vmul.f32 %v1435_v8, %v4002_v38 }
 0x1e2   : > { %1386 = vrot.lane.b32.xlu1 %v1381_v50, %s2629_s27  ;;  %4765 = vst [vmem:[#allocation14_spill] sm:$0xff] %v4051_v26  ;;  %v1592_v50 = vmul.f32 %v1591_v10, %v4008_v22 }
 0x1e3   : > { %1568 = vrot.lane.b32.xlu0 %v1564_v1, %s2629_s27  ;;  %v4078_v1 = vld [vmem:[#allocation2 + $0x4] sm:$0xff] }
 0x1e4   : > { %v4057_v14 = vpop.permute.xlu1 %1528  ;;  %4770 = vst [vmem:[#allocation19_spill] sm:$0xff] %v4078_v1 }
 0x1e5   : > { %4766 = vst [vmem:[#allocation15_spill] sm:$0xff] %v4057_v14  ;;  %v4062_v23 = vpop.permute.xlu0 %1710  ;;  %v4072_v14 = vld [vmem:[#allocation2 + $0xb] sm:$0xff] }
 0x1e6   : > { %1414 = vrot.lane.b32.xlu1 %v1409_v25, %s2630_s28  ;;  %4767 = vst [vmem:[#allocation16_spill] sm:$0xff] %v4062_v23  ;;  %v1620_v25 = vmul.f32 %v1619_v41, %v4008_v22  ;;  %v1663_v23 = vstv %s4055_s6  ;;  %v1481_v8 = vmul.f32 %v1479_v39, %v4072_v14  ;;  %v1509_v7 = vmul.f32 %v1507_v36, %v4072_v14  ;;  %s4192_s6 = sld [smem:[#allocation4 + $0x58]] }
 0x1e7   : > { %1596 = vrot.lane.b32.xlu0 %v1592_v50, %s2630_s28 }
 0x1e8   : > { %v4068_v26 = vpop.permute.xlu1 %1556 }
 0x1e9   : > { %4768 = vst [vmem:[#allocation17_spill] sm:$0xff] %v4068_v26  ;;  %v4075_v27 = vpop.permute.xlu0 %1738 }
 0x1ea   : > { %1442 = vrot.lane.b32.xlu1 %v1437_v0, %s4673_s29  ;;  %4769 = vst [vmem:[#allocation18_spill] sm:$0xff] %v4075_v27  ;;  %v1664_v0 = vmul.f32 %v1663_v23, %v4078_v1  ;;  %v1691_v27 = vstv %s4066_s7  ;;  %s4194_s7 = sld [smem:[#allocation4 + $0x38]] }
 0x1eb   : > { %1624 = vrot.lane.b32.xlu0 %v1620_v25, %s4673_s29  ;;  %v1692_v25 = vmul.f32 %v1691_v27, %v4078_v1 }
 0x1ec   : > { %v4083_v26 = vpop.permute.xlu1 %1584 }
 0x1ed   : > { %4771 = vst [vmem:[#allocation20_spill] sm:$0xff] %v4083_v26  ;;  %v4088_v50 = vpop.permute.xlu0 %1766  ;;  %v1537_v26 = vmul.f32 %v1535_v16, %v4072_v14 }
 0x1ee   : > { %1486 = vrot.lane.b32.xlu1 %v1481_v8, %s2626_s20  ;;  %4772 = vst [vmem:[#allocation21_spill] sm:$0xff] %v4088_v50  ;;  %v1719_v8 = vstv %s4081_s8  ;;  %s4206_s8 = sld [smem:[#allocation4 + $0x28]] }
 0x1ef   : > { %1668 = vrot.lane.b32.xlu0 %v1664_v0, %s2626_s20  ;;  %v1747_v0 = vstv %s4092_s15  ;;  %s4221_s15 = sld [smem:[#allocation4 + $0x59]] }
 0x1f0   : > { %v4094_v17 = vpop.permute.xlu1 %1612 }
 0x1f1   : > { %4773 = vst [vmem:[#allocation22_spill] sm:$0xff] %v4094_v17  ;;  %v4099_v39 = vpop.permute.xlu0 %1794  ;;  %v1565_v17 = vmul.f32 %v1563_v4, %v4072_v14 }
 0x1f2   : > { %1514 = vrot.lane.b32.xlu1 %v1509_v7, %s4671_s24  ;;  %4774 = vst [vmem:[#allocation23_spill] sm:$0xff] %v4099_v39  ;;  %v1720_v7 = vmul.f32 %v1719_v8, %v4078_v1 }
 0x1f3   : > { %1696 = vrot.lane.b32.xlu0 %v1692_v25, %s4671_s24  ;;  %v4664_v25 = vstv %s4103_s16 }
 0x1f4   : > { %v4105_v50 = vpop.permute.xlu1 %1640 }
 0x1f5   : > { %4775 = vst [vmem:[#allocation24_spill] sm:$0xff] %v4105_v50  ;;  %v4110_v36 = vpop.permute.xlu0 %1822  ;;  %v1593_v50 = vmul.f32 %v1591_v10, %v4072_v14  ;;  %v4144_v10 = vld [vmem:[#allocation2 + $0xc] sm:$0xff] }
 0x1f6   : > { %1542 = vrot.lane.b32.xlu1 %v1537_v26, %s2628_s26  ;;  %4776 = vst [vmem:[#allocation25_spill] sm:$0xff] %v4110_v36  ;;  %v1748_v26 = vmul.f32 %v1747_v0, %v4078_v1 }
 0x1f7   : > { %1724 = vrot.lane.b32.xlu0 %v1720_v7, %s2628_s26  ;;  %v4665_v7 = vstv %s4114_s18 }
 0x1f8   : > { %v4116_v39 = vpop.permute.xlu1 %1684 }
 0x1f9   : > { %4777 = vst [vmem:[#allocation26_spill] sm:$0xff] %v4116_v39  ;;  %v4121_v16 = vpop.permute.xlu0 %1866  ;;  %v1621_v39 = vmul.f32 %v1619_v41, %v4072_v14 }
 0x1fa   : > { %1570 = vrot.lane.b32.xlu1 %v1565_v17, %s2629_s27  ;;  %4778 = vst [vmem:[#allocation27_spill] sm:$0xff] %v4121_v16  ;;  %v1776_v17 = vmul.f32 %v4664_v25, %v4078_v1 }
 0x1fb   : > { %1752 = vrot.lane.b32.xlu0 %v1748_v26, %s2629_s27  ;;  %v1804_v26 = vmul.f32 %v4665_v7, %v4078_v1 }
 0x1fc   : > { %v4127_v36 = vpop.permute.xlu1 %1712 }
 0x1fd   : > { %4779 = vst [vmem:[#allocation28_spill] sm:$0xff] %v4127_v36  ;;  %v4132_v4 = vpop.permute.xlu0 %1894  ;;  %v1847_v36 = vstv %s4125_s23  ;;  %s4269_s23 = sld [smem:[#allocation4 + $0x2b]] }
 0x1fe   : > { %1598 = vrot.lane.b32.xlu1 %v1593_v50, %s2630_s28  ;;  %4780 = vst [vmem:[#allocation29_spill] sm:$0xff] %v4132_v4  ;;  %v4151_v4 = vld [vmem:[#allocation2 + $0x5] sm:$0xff] }
 0x1ff   : > { %1780 = vrot.lane.b32.xlu0 %v1776_v17, %s2630_s28  ;;  %v1665_v17 = vmul.f32 %v1663_v23, %v4144_v10 }
 0x200   : > { %v4140_v16 = vpop.permute.xlu1 %1740 }
 0x201   : > { %4781 = vst [vmem:[#allocation30_spill] sm:$0xff] %v4140_v16  ;;  %v933_v50 = vpop.permute.xlu0 %932  ;;  %v1875_v16 = vstv %s4138_s25  ;;  %s4282_s25 = sld [smem:[#allocation4 + $0x5c]] }
 0x202   : > { %1626 = vrot.lane.b32.xlu1 %v1621_v39, %s4673_s29  ;;  %v938_v25 = vadd.f32 %v933_v50, %v3698_v55  ;;  %v1848_v55 = vmul.f32 %v1847_v36, %v4151_v4 }
 0x203   : > { %1808 = vrot.lane.b32.xlu0 %v1804_v26, %s4673_s29  ;;  %v4668_v26 = vstv %s4154_s30 }
 0x204   : > { %v4156_v41 = vpop.permute.xlu1 %1768  ;;  %v952_v39 = vadd.f32 %v3775_v43, %v938_v25  ;;  %v1876_v25 = vmul.f32 %v1875_v16, %v4151_v4 }
 0x205   : > { %4782 = vst [vmem:[#allocation31_spill] sm:$0xff] %v4156_v41  ;;  %v961_v7 = vpop.permute.xlu0 %960  ;;  %v1693_v41 = vmul.f32 %v1691_v27, %v4144_v10  ;;  %v1721_v27 = vmul.f32 %v1719_v8, %v4144_v10 }
 0x206   : > { %1670 = vrot.lane.b32.xlu1 %v1665_v17, %s2626_s20  ;;  %v966_v50 = vadd.f32 %v961_v7, %v952_v39  ;;  %v1904_v39 = vmul.f32 %v4668_v26, %v4151_v4  ;;  %v4232_v26 = vld [vmem:[#allocation2 + $0xd] sm:$0xff] }
 0x207   : > { %1852 = vrot.lane.b32.xlu0 %v1848_v55, %s2626_s20 }
 0x208   : > { %v4168_v1 = vpop.permute.xlu1 %1796  ;;  %v980_v23 = vadd.f32 %v3786_v28, %v966_v50  ;;  %v4667_v50 = vstv %s4166_s3 }
 0x209   : > { %v989_v43 = vpop.permute.xlu0 %988 }
 0x20a   : > { %1698 = vrot.lane.b32.xlu1 %v1693_v41, %s4671_s24  ;;  %v994_v7 = vadd.f32 %v989_v43, %v980_v23 }
 0x20b   : > { %1880 = vrot.lane.b32.xlu0 %v1876_v25, %s4671_s24  ;;  %v1918_v25 = vmul.f32 %v4667_v50, %v3796_v20  ;;  %v1105_v50 = vstv %s4194_s7  ;;  %s4789_s7 = smov 126  }
 0x20c   : > { %v4180_v17 = vpop.permute.xlu1 %1824  ;;  %v1008_v28 = vadd.f32 %v3794_v34, %v994_v7  ;;  %v1749_v34 = vmul.f32 %v1747_v0, %v4144_v10 }
 0x20d   : > { %v1017_v41 = vpop.permute.xlu0 %1016 }
 0x20e   : > { %1726 = vrot.lane.b32.xlu1 %v1721_v27, %s2628_s26  ;;  %v1022_v55 = vadd.f32 %v1017_v41, %v1008_v28  ;;  %v4669_v27 = vstv %s4178_s4  ;;  %v4783_v28 = vstv %s4103_s16  ;;  %s4244_s16 = sld [smem:[#allocation4 + $0x29]] }
 0x20f   : > { %1908 = vrot.lane.b32.xlu0 %v1904_v39, %s2628_s26  ;;  %v1777_v41 = vmul.f32 %v4783_v28, %v4144_v10  ;;  %v1097_v39 = vstv %s4185_s5  ;;  %s4334_s5 = sld [smem:[#allocation4 + $0x2d]] }
 0x210   : > { %v4196_v8 = vpop.permute.xlu1 %1868  ;;  %v1036_v23 = vadd.f32 %v3808_v48, %v1022_v55 }
 0x211   : > { %v1045_v43 = vpop.permute.xlu0 %1044 }
 0x212   : > { %1754 = vrot.lane.b32.xlu1 %v1749_v34, %s2629_s27  ;;  %v1050_v7 = vadd.f32 %v1045_v43, %v1036_v23  ;;  %v1932_v34 = vmul.f32 %v4669_v27, %v4151_v4  ;;  %v4670_v43 = vstv %s4192_s6 }
 0x213   : > { %1922 = vrot.lane.b32.xlu0 %v1918_v25, %s2628_s26  ;;  %v4784_v25 = vstv %s4114_s18  ;;  %v1946_v27 = vmul.f32 %v4670_v43, %v3796_v20  ;;  %s4256_s18 = sld [smem:[#allocation4 + $0x5a]] }
 0x214   : > { %v4208_v0 = vpop.permute.xlu1 %1896  ;;  %v1064_v48 = vadd.f32 %v3818_v59, %v1050_v7  ;;  %v1805_v59 = vmul.f32 %v4784_v25, %v4144_v10  ;;  %v1098_v7 = vmul.f32 %v1097_v39, %v3868_v44 }
 0x215   : > { %v1073_v55 = vpop.permute.xlu0 %1072 }
 0x216   : > { %1782 = vrot.lane.b32.xlu1 %v1777_v41, %s2630_s28  ;;  %v1078_v23 = vadd.f32 %v1073_v55, %v1064_v48 }
 0x217   : > { %1936 = vrot.lane.b32.xlu0 %v1932_v34, %s2629_s27  ;;  %v1106_v34 = vmul.f32 %v1105_v50, %v3621_v53 }
 0x218   : > { %v935_v28 = vpop.permute.xlu1 %934  ;;  %v1092_v48 = vadd.f32 %v3830_v32, %v1078_v23  ;;  %v1849_v32 = vmul.f32 %v1847_v36, %v4232_v26 }
 0x219   : > { %v939_v41 = vadd.f32 %v935_v28, %v3709_v47  ;;  %v1117_v55 = vpop.permute.xlu0 %1116  ;;  %v1959_v47 = vstv %s4206_s8  ;;  %s4365_s8 = sld [smem:[#allocation4 + $0x2e]] }
 0x21a   : > { %1810 = vrot.lane.b32.xlu1 %v1805_v59, %s4673_s29  ;;  %v1100_v44 = vadd.f32 %v1098_v7, %v1092_v48  ;;  %v1960_v53 = vmul.f32 %v1959_v47, %v4151_v4 }
 0x21b   : > { %v953_v25 = vadd.f32 %v3837_v12, %v939_v41  ;;  %1950 = vrot.lane.b32.xlu0 %v1946_v27, %s2629_s27  ;;  %v1973_v41 = vstv %s4221_s15  ;;  %v1877_v27 = vmul.f32 %v1875_v16, %v4232_v26  ;;  %s4378_s15 = sld [smem:[#allocation4 + $0x5f]] }
 0x21c   : > { %v963_v28 = vpop.permute.xlu1 %962  ;;  %v1108_v59 = vadd.f32 %v1106_v34, %v1100_v44 }
 0x21d   : > { %v967_v23 = vadd.f32 %v963_v28, %v953_v25  ;;  %v1145_v43 = vpop.permute.xlu0 %1144  ;;  %v1987_v28 = vstv %s4244_s16  ;;  %s4393_s16 = sld [smem:[#allocation4 + $0x2f]] }
 0x21e   : > { %1854 = vrot.lane.b32.xlu1 %v1849_v32, %s2626_s20  ;;  %v1122_v7 = vadd.f32 %v1117_v55, %v1108_v59  ;;  %v4785_v32 = vstv %s4154_s30  ;;  %s4289_s30 = sld [smem:[#allocation4 + $0xe]] }
 0x21f   : > { %v981_v12 = vadd.f32 %v3849_v31, %v967_v23  ;;  %1964 = vrot.lane.b32.xlu0 %v1960_v53, %s2630_s28  ;;  %v1974_v31 = vmul.f32 %v1973_v41, %v3796_v20  ;;  %v1905_v23 = vmul.f32 %v4785_v32, %v4232_v26  ;;  %v4787_v32 = vstv %s4178_s4  ;;  %s4319_s4 = sld [smem:[#allocation4 + $0x5d]] }
 0x220   : > { %v991_v36 = vpop.permute.xlu1 %990  ;;  %v1136_v34 = vadd.f32 %v3843_v15, %v1122_v7  ;;  %v2001_v7 = vstv %s4256_s18  ;;  %s4403_s18 = sld [smem:[#allocation4 + $0x15]] }
 0x221   : > { %v995_v48 = vadd.f32 %v991_v36, %v981_v12  ;;  %v1173_v25 = vpop.permute.xlu0 %1172 }
 0x222   : > { %1882 = vrot.lane.b32.xlu1 %v1877_v27, %s4671_s24  ;;  %v1150_v44 = vadd.f32 %v1145_v43, %v1136_v34  ;;  %v4786_v27 = vstv %s4166_s3  ;;  %s4299_s3 = sld [smem:[#allocation4 + $0x2c]]  ;;  %s4301_s24 = sld [smem:[#allocation4 + $0x3f]] }
 0x223   : > { %v1009_v55 = vadd.f32 %v3860_v6, %v995_v48  ;;  %1978 = vrot.lane.b32.xlu0 %v1974_v31, %s2630_s28  ;;  %v1988_v6 = vmul.f32 %v1987_v28, %v4151_v4  ;;  %v1919_v48 = vmul.f32 %v4786_v27, %v3840_v30  ;;  %v4788_v27 = vstv %s4192_s6  ;;  %s4353_s6 = sld [smem:[#allocation4 + $0x5e]] }
 0x224   : > { %v1019_v16 = vpop.permute.xlu1 %1018  ;;  %v1164_v59 = vadd.f32 %v3854_v58, %v1150_v44  ;;  %v4296_v44 = vld [vmem:[#allocation2 + $0x6] sm:$0xff] }
 0x225   : > { %v1023_v15 = vadd.f32 %v1019_v16, %v1009_v55  ;;  %v1201_v53 = vpop.permute.xlu0 %1200  ;;  %v2031_v16 = vstv %s4269_s23  ;;  %s4410_s23 = sld [smem:[#allocation4 + $0x60]] }
 0x226   : > { %1910 = vrot.lane.b32.xlu1 %v1905_v23, %s2628_s26  ;;  %v1178_v12 = vadd.f32 %v1173_v25, %v1164_v59  ;;  %v2002_v25 = vmul.f32 %v2001_v7, %v3796_v20  ;;  %v1933_v23 = vmul.f32 %v4787_v32, %v4232_v26  ;;  %v2032_v59 = vmul.f32 %v2031_v16, %v4296_v44 }
 0x227   : > { %v1037_v43 = vadd.f32 %v3873_v60, %v1023_v15  ;;  %1992 = vrot.lane.b32.xlu0 %v1988_v6, %s4673_s29 }
 0x228   : > { %v1047_v36 = vpop.permute.xlu1 %1046  ;;  %v1192_v34 = vadd.f32 %v3865_v35, %v1178_v12  ;;  %v4316_v12 = vld [vmem:[#allocation3 + $0x6] sm:$0xff]  ;;  %v1289_v32 = vstv %s4301_s24  ;;  %s4790_s24 = smov 122  }
 0x229   : > { %v1051_v58 = vadd.f32 %v1047_v36, %v1037_v43  ;;  %v1229_v60 = vpop.permute.xlu0 %1228  ;;  %v2045_v36 = vstv %s4282_s25  ;;  %s4428_s25 = sld [smem:[#allocation4 + $0x30]] }
 0x22a   : > { %1924 = vrot.lane.b32.xlu1 %v1919_v48, %s2628_s26  ;;  %v1206_v55 = vadd.f32 %v1201_v53, %v1192_v34  ;;  %v1099_v53 = vmul.f32 %v1097_v39, %v3932_v51  ;;  %v1947_v48 = vmul.f32 %v4788_v27, %v3840_v30  ;;  %v1281_v34 = vstv %s4289_s30  ;;  %s4498_s30 = sld [smem:[#allocation4 + $0x4d]] }
 0x22b   : > { %v1065_v31 = vadd.f32 %v3884_v46, %v1051_v58  ;;  %2006 = vrot.lane.b32.xlu0 %v2002_v25, %s4673_s29  ;;  %v2516_v58 = vld [vmem:[#allocation3 + $0x9] sm:$0xff]  ;;  %v2046_v25 = vmul.f32 %v2045_v36, %v4316_v12  ;;  %v2073_v27 = vstv %s4319_s4  ;;  %s173_s4 = sand.u32 1, %s2606_s10  }
 0x22c   : > { %v1075_v35 = vpop.permute.xlu1 %1074  ;;  %v1220_v46 = vadd.f32 %v3878_v56, %v1206_v55  ;;  %v1107_v51 = vmul.f32 %v2516_v58, %v1105_v50  ;;  %v2074_v58 = vmul.f32 %v2073_v27, %v4316_v12 }
 0x22d   : > { %v1079_v20 = vadd.f32 %v1075_v35, %v1065_v31  ;;  %v1257_v15 = vpop.permute.xlu0 %1256  ;;  %v2059_v35 = vstv %s4299_s3  ;;  %s4552_s3 = sld [smem:[#allocation4 + $0x5b]] }
 0x22e   : > { %1938 = vrot.lane.b32.xlu1 %v1933_v23, %s2629_s27  ;;  %v1234_v43 = vadd.f32 %v1229_v60, %v1220_v46  ;;  %v1282_v23 = vmul.f32 %v1281_v34, %v3938_v42 }
 0x22f   : > { %v1093_v6 = vadd.f32 %v3895_v40, %v1079_v20  ;;  %2036 = vrot.lane.b32.xlu0 %v2032_v59, %s2626_s20  ;;  %v2060_v59 = vmul.f32 %v2059_v35, %v4296_v44 }
 0x230   : > { %v1119_v56 = vpop.permute.xlu1 %1118  ;;  %v1248_v39 = vadd.f32 %v3889_v49, %v1234_v43  ;;  %v1961_v49 = vmul.f32 %v1959_v47, %v4232_v26 }
 0x231   : > { %v1101_v40 = vadd.f32 %v1099_v53, %v1093_v6  ;;  %v1301_v60 = vpop.permute.xlu0 %1300  ;;  %v2517_v6 = vld [vmem:[#allocation3 + $0x2] sm:$0xff] }
 0x232   : > { %1952 = vrot.lane.b32.xlu1 %v1947_v48, %s2629_s27  ;;  %v1262_v55 = vadd.f32 %v1257_v15, %v1248_v39  ;;  %v1290_v47 = vmul.f32 %v2517_v6, %v1289_v32  ;;  %v2087_v39 = vstv %s4334_s5  ;;  %s2324_s5 = sshll.u32 %s173_s4, 4 }
 0x233   : > { %v1109_v31 = vadd.f32 %v1107_v51, %v1101_v40  ;;  %2050 = vrot.lane.b32.xlu0 %v2046_v25, %s2626_s20  ;;  %v1989_v25 = vmul.f32 %v1987_v28, %v4232_v26 }
 0x234   : > { %v1147_v50 = vpop.permute.xlu1 %1146  ;;  %v1276_v46 = vadd.f32 %v3900_v37, %v1262_v55  ;;  %v1975_v37 = vmul.f32 %v1973_v41, %v3840_v30 }
 0x235   : > { %v1123_v20 = vadd.f32 %v1119_v56, %v1109_v31  ;;  %v1329_v15 = vpop.permute.xlu0 %1328 }
 0x236   : > { %1966 = vrot.lane.b32.xlu1 %v1961_v49, %s2630_s28  ;;  %v1284_v43 = vadd.f32 %v1282_v23, %v1276_v46  ;;  %v2101_v23 = vstv %s4353_s6  ;;  %v4384_v46 = vld [vmem:[#allocation2 + $0xe] sm:$0xff]  ;;  %s175_s6 = scalar_lea.vmem [#allocation7], %s2324_s5 }
 0x237   : > { %v1137_v53 = vadd.f32 %v3906_v54, %v1123_v20  ;;  %2064 = vrot.lane.b32.xlu0 %v2060_v59, %s4789_s7  ;;  %v2003_v20 = vmul.f32 %v2001_v7, %v3840_v30  ;;  %v2033_v7 = vmul.f32 %v2031_v16, %v4384_v46 }
 0x238   : > { %v1175_v42 = vpop.permute.xlu1 %1174  ;;  %v1292_v48 = vadd.f32 %v1290_v47, %v1284_v43  ;;  %v2115_v47 = vstv %s4365_s8  ;;  %v4399_v43 = vld [vmem:[#allocation3 + $0xe] sm:$0xff]  ;;  %s2226_s8 = sshll.u32 %s175_s6, 4  ;;  %s4572_s8 = int_to_ptr.vmem [resolvable:$true] %s2226_s8 }
 0x239   : > { %v1151_v56 = vadd.f32 %v1147_v50, %v1137_v53  ;;  %v1357_v54 = vpop.permute.xlu0 %1356 }
 0x23a   : > { %1980 = vrot.lane.b32.xlu1 %v1975_v37, %s2630_s28  ;;  %v1306_v40 = vadd.f32 %v1301_v60, %v1292_v48  ;;  %v2116_v37 = vmul.f32 %v2115_v47, %v4296_v44  ;;  %v2129_v48 = vstv %s4378_s15 }
 0x23b   : > { %v1165_v51 = vadd.f32 %v3917_v21, %v1151_v56  ;;  %2078 = vrot.lane.b32.xlu0 %v2074_v58, %s4789_s7  ;;  %v2088_v21 = vmul.f32 %v2087_v39, %v4296_v44 }
 0x23c   : > { %v1203_v41 = vpop.permute.xlu1 %1202  ;;  %v1320_v55 = vadd.f32 %v3911_v19, %v1306_v40  ;;  %v2130_v40 = vmul.f32 %v2129_v48, %v4316_v12 }
 0x23d   : > { %v1179_v31 = vadd.f32 %v1175_v42, %v1165_v51  ;;  %v1385_v50 = vpop.permute.xlu0 %1384 }
 0x23e   : > { %1994 = vrot.lane.b32.xlu1 %v1989_v25, %s4673_s29  ;;  %v1334_v49 = vadd.f32 %v1329_v15, %v1320_v55  ;;  %v2102_v15 = vmul.f32 %v2101_v23, %v4316_v12 }
 0x23f   : > { %v1193_v60 = vadd.f32 %v3928_v62, %v1179_v31  ;;  %2092 = vrot.lane.b32.xlu0 %v2088_v21, %s2628_s26  ;;  %v2143_v31 = vstv %s4393_s16 }
 0x240   : > { %v1231_v28 = vpop.permute.xlu1 %1230  ;;  %v1348_v59 = vadd.f32 %v3922_v9, %v1334_v49  ;;  %v2144_v49 = vmul.f32 %v2143_v31, %v4296_v44 }
 0x241   : > { %v1207_v19 = vadd.f32 %v1203_v41, %v1193_v60  ;;  %v1413_v62 = vpop.permute.xlu0 %1412  ;;  %v1283_v41 = vmul.f32 %v1281_v34, %v4002_v38  ;;  %v1465_v34 = vstv %s4403_s18 }
 0x242   : > { %2008 = vrot.lane.b32.xlu1 %v2003_v20, %s4673_s29  ;;  %v1362_v6 = vadd.f32 %v1357_v54, %v1348_v59  ;;  %s4415_s29 = sld [smem:[#allocation4 + $0x46]]  ;;  %v2157_v20 = vstv %s4410_s23  ;;  %s4575_s23 = scalar_lea.sflag [#allocation5], %s173_s4 }
 0x243   : > { %v1221_v53 = vadd.f32 %v3943_v3, %v1207_v19  ;;  %2106 = vrot.lane.b32.xlu0 %v2102_v15, %s2628_s26 }
 0x244   : > { %v1259_v30 = vpop.permute.xlu1 %1258  ;;  %v1376_v42 = vadd.f32 %v3935_v11, %v1362_v6  ;;  %v2047_v11 = vmul.f32 %v2045_v36, %v4399_v43  ;;  %v2158_v6 = vmul.f32 %v2157_v20, %v4316_v12 }
 0x245   : > { %v1235_v9 = vadd.f32 %v1231_v28, %v1221_v53  ;;  %v1441_v3 = vpop.permute.xlu0 %1440 }
 0x246   : > { %2038 = vrot.lane.b32.xlu1 %v2033_v7, %s2626_s20  ;;  %v1390_v16 = vadd.f32 %v1385_v50, %v1376_v42  ;;  %v2518_v50 = vld [vmem:[#allocation3 + $0xa] sm:$0xff]  ;;  %v2171_v42 = vstv %s4428_s25  ;;  %s2540_s25 = scalar_lea.vmem %s4572_s8, 256 }
 0x247   : > { %v1249_v56 = vadd.f32 %v3954_v57, %v1235_v9  ;;  %2120 = vrot.lane.b32.xlu0 %v2116_v37, %s2629_s27  ;;  %v1291_v21 = vmul.f32 %v2518_v50, %v1289_v32  ;;  %v2519_v7 = vld [vmem:[#allocation3 + $0x3] sm:$0xff]  ;;  %p2541_p10 = scmp.ne.s32.totalorder %s4572_s8, %s2540_s25 }
 0x248   : > { %v1303_v54 = vpop.permute.xlu1 %1302  ;;  %v1404_v51 = vadd.f32 %v3948_v61, %v1390_v16  ;;  %v2061_v61 = vmul.f32 %v2059_v35, %v4384_v46  ;;  %v1473_v19 = vstv %s4415_s29  ;;  %s4549_s29 = sld [smem:[#allocation4 + $0x2a]] }
 0x249   : > { %v1263_v58 = vadd.f32 %v1259_v30, %v1249_v56  ;;  %v1485_v57 = vpop.permute.xlu0 %1484  ;;  %p2542_p11 = pnand %p2541_p10, %p2690_p4 }
 0x24a   : > { %2052 = vrot.lane.b32.xlu1 %v2047_v11, %s2626_s20  ;;  %v1418_v25 = vadd.f32 %v1413_v62, %v1404_v51  ;;  %s4443_s20 = sld [smem:[#allocation4 + $0x61]]  ;;  %v1466_v62 = vmul.f32 %v1465_v34, %v4008_v22  ;;  %v2089_v22 = vmul.f32 %v2087_v39, %v4384_v46  ;;  %v2103_v51 = vmul.f32 %v2101_v23, %v4399_v43 }
 0x24b   : > { %v1277_v36 = vadd.f32 %v3965_v33, %v1263_v58  ;;  %2134 = vrot.lane.b32.xlu0 %v2130_v40, %s2629_s27  ;;  %p2543_p13 = pneg %p2542_p11 }
 0x24c   : > { %v1331_v55 = vpop.permute.xlu1 %1330  ;;  %v1432_v33 = vadd.f32 %v3959_v52, %v1418_v25  ;;  %v2075_v52 = vmul.f32 %v2073_v27, %v4399_v43  ;;  %v1474_v27 = vmul.f32 %v2519_v7, %v1473_v19 }
 0x24d   : > { %v1285_v38 = vadd.f32 %v1283_v41, %v1277_v36  ;;  %v1513_v60 = vpop.permute.xlu0 %1512 }
 0x24e   : > { %2066 = vrot.lane.b32.xlu1 %v2061_v61, %s4789_s7  ;;  %v1446_v35 = vadd.f32 %v1441_v3, %v1432_v33 }
 0x24f   : > { %v1293_v28 = vadd.f32 %v1291_v21, %v1285_v38  ;;  %2148 = vrot.lane.b32.xlu0 %v2144_v49, %s2630_s28 }
 0x250   : > { %v1359_v32 = vpop.permute.xlu1 %1358  ;;  %v1460_v15 = vadd.f32 %v3970_v5, %v1446_v35  ;;  %v2185_v11 = vstv %s4443_s20  ;;  %v2145_v35 = vmul.f32 %v2143_v31, %v4384_v46  ;;  %v2159_v31 = vmul.f32 %v2157_v20, %v4399_v43 }
 0x251   : > { %v1307_v59 = vadd.f32 %v1303_v54, %v1293_v28  ;;  %v1541_v53 = vpop.permute.xlu0 %1540  ;;  %v2186_v36 = vmul.f32 %v2185_v11, %v4316_v12 }
 0x252   : > { %2080 = vrot.lane.b32.xlu1 %v2075_v52, %s4789_s7  ;;  %v1468_v9 = vadd.f32 %v1466_v62, %v1460_v15  ;;  %v4793_v62 = vld [vmem:[#allocation11_spill] sm:$0xff]  ;;  %s2432_s7 = sshll.u32 %s2614_s12, 8  ;;  %s2632_s12 = smov [#allocation7]  }
 0x253   : > { %v1321_v30 = vadd.f32 %v3976_v63, %v1307_v59  ;;  %2162 = vrot.lane.b32.xlu0 %v2158_v6, %s2630_s28  ;;  %v2172_v63 = vmul.f32 %v2171_v42, %v4296_v44  ;;  %v1467_v59 = vmul.f32 %v1465_v34, %v4072_v14  ;;  %s4570_s18 = scalar_lea.hbm %s4623_s2, %s2432_s7  ;;  %s2544_s20 = sshll.u32 %s2632_s12, 4  ;;  %s2545_s20 = int_to_ptr.vmem [resolvable:$false] %s2544_s20 }
 0x254   : > { %v1387_v3 = vpop.permute.xlu1 %1386  ;;  %v1476_v37 = vadd.f32 %v1474_v27, %v1468_v9  ;;  %v4794_v9 = vld [vmem:[#allocation49_spill] sm:$0xff]  ;;  %p2547_p0 = scmp.lt.s32.totalorder %s4572_s8, %s2545_s20 }
 0x255   : > { %v1335_v5 = vadd.f32 %v1331_v55, %v1321_v30  ;;  %v1569_v56 = vpop.permute.xlu0 %1568  ;;  %v2117_v55 = vmul.f32 %v2115_v47, %v4384_v46  ;;  %v2520_v30 = vld [vmem:[#allocation3 + $0xb] sm:$0xff] }
 0x256   : > { %2094 = vrot.lane.b32.xlu1 %v2089_v22, %s2628_s26  ;;  %v1490_v54 = vadd.f32 %v1485_v57, %v1476_v37  ;;  %v1475_v7 = vmul.f32 %v2520_v30, %v1473_v19  ;;  %v4804_v30 = vld [vmem:[#allocation22_spill] sm:$0xff] }
 0x257   : > { %v1349_v16 = vadd.f32 %v3987_v18, %v1335_v5  ;;  %2176 = vrot.lane.b32.xlu0 %v2172_v63, %s4790_s24  ;;  %v1657_v63 = vstv %s4498_s30 }
 0x258   : > { %v1415_v58 = vpop.permute.xlu1 %1414  ;;  %v1504_v40 = vadd.f32 %v3981_v13, %v1490_v54  ;;  %v4795_v54 = vld [vmem:[#allocation12_spill] sm:$0xff] }
 0x259   : > { %v1363_v39 = vadd.f32 %v1359_v32, %v1349_v16  ;;  %v1597_v41 = vpop.permute.xlu0 %1596  ;;  %v4792_v32 = vld [vmem:[#allocation10_spill] sm:$0xff] }
 0x25a   : > { %2108 = vrot.lane.b32.xlu1 %v2103_v51, %s2628_s26  ;;  %v1518_v57 = vadd.f32 %v1513_v60, %v1504_v40  ;;  %s4492_s26 = sld [smem:[#allocation4 + $0x1c]]  ;;  %v4791_v60 = vld [vmem:[#allocation48_spill] sm:$0xff] }
 0x25b   : > { %v1377_v18 = vadd.f32 %v3998_v45, %v1363_v39  ;;  %2190 = vrot.lane.b32.xlu0 %v2186_v36, %s4790_s24  ;;  %v2131_v45 = vmul.f32 %v2129_v48, %v4399_v43  ;;  %v4797_v39 = vld [vmem:[#allocation13_spill] sm:$0xff]  ;;  %v2521_v36 = vld [vmem:[#allocation3 + $0x4] sm:$0xff] }
 0x25c   : > { %v1443_v25 = vpop.permute.xlu1 %1442  ;;  %v1532_v13 = vadd.f32 %v3992_v24, %v1518_v57 }
 0x25d   : > { %v1391_v23 = vadd.f32 %v1387_v3, %v1377_v18  ;;  %v1625_v61 = vpop.permute.xlu0 %1624  ;;  %v1658_v18 = vmul.f32 %v2521_v36, %v1657_v63 }
 0x25e   : > { %2122 = vrot.lane.b32.xlu1 %v2117_v55, %s2629_s27  ;;  %v1546_v21 = vadd.f32 %v1541_v53, %v1532_v13  ;;  %v4798_v13 = vld [vmem:[#allocation15_spill] sm:$0xff] }
 0x25f   : > { %v1405_v50 = vadd.f32 %v4013_v29, %v1391_v23 }
 0x260   : > { %v1487_v38 = vpop.permute.xlu1 %1486  ;;  %v1560_v47 = vadd.f32 %v4005_v2, %v1546_v21  ;;  %v1649_v22 = vstv %s4492_s26 }
 0x261   : > { %v1419_v33 = vadd.f32 %v1415_v58, %v1405_v50  ;;  %v1669_v24 = vpop.permute.xlu0 %1668  ;;  %v4796_v58 = vld [vmem:[#allocation19_spill] sm:$0xff] }
 0x262   : > { %2136 = vrot.lane.b32.xlu1 %v2131_v45, %s2629_s27  ;;  %v1574_v28 = vadd.f32 %v1569_v56, %v1560_v47  ;;  %v2173_v56 = vmul.f32 %v2171_v42, %v4384_v46  ;;  %v1650_v51 = vmul.f32 %v1649_v22, %v4796_v58  ;;  %v4799_v45 = vld [vmem:[#allocation14_spill] sm:$0xff]  ;;  %s4530_s27 = sld [smem:[#allocation4 + $0x23]] }
 0x263   : > { %v1433_v49 = vadd.f32 %v4791_v60, %v1419_v33  ;;  %v4800_v60 = vld [vmem:[#allocation17_spill] sm:$0xff] }
 0x264   : > { %v1515_v29 = vpop.permute.xlu1 %1514  ;;  %v1588_v2 = vadd.f32 %v4792_v32, %v1574_v28  ;;  %v4801_v32 = vld [vmem:[#allocation16_spill] sm:$0xff] }
 0x265   : > { %v1447_v48 = vadd.f32 %v1443_v25, %v1433_v49  ;;  %v1697_v52 = vpop.permute.xlu0 %1696  ;;  %v2187_v25 = vmul.f32 %v2185_v11, %v4399_v43 }
 0x266   : > { %2150 = vrot.lane.b32.xlu1 %v2145_v35, %s2630_s28  ;;  %v1602_v53 = vadd.f32 %v1597_v41, %v1588_v2  ;;  %v4802_v2 = vld [vmem:[#allocation20_spill] sm:$0xff] }
 0x267   : > { %v1461_v15 = vadd.f32 %v4793_v62, %v1447_v48 }
 0x268   : > { %v1543_v6 = vpop.permute.xlu1 %1542  ;;  %v1616_v3 = vadd.f32 %v4794_v9, %v1602_v53 }
 0x269   : > { %v1469_v27 = vadd.f32 %v1467_v59, %v1461_v15  ;;  %v1725_v5 = vpop.permute.xlu0 %1724 }
 0x26a   : > { %2164 = vrot.lane.b32.xlu1 %v2159_v31, %s2630_s28  ;;  %v1630_v34 = vadd.f32 %v1625_v61, %v1616_v3  ;;  %v4803_v31 = vld [vmem:[#allocation18_spill] sm:$0xff]  ;;  %s4533_s28 = sld [smem:[#allocation4 + $0x54]]  ;;  %v4805_v3 = vld [vmem:[#allocation21_spill] sm:$0xff] }
 0x26b   : > { %v1477_v14 = vadd.f32 %v1475_v7, %v1469_v27 }
 0x26c   : > { %v1571_v37 = vpop.permute.xlu1 %1570  ;;  %v1644_v20 = vadd.f32 %v4795_v54, %v1630_v34 }
 0x26d   : > { %v1491_v16 = vadd.f32 %v1487_v38, %v1477_v14  ;;  %v1753_v19 = vpop.permute.xlu0 %1752 }
 0x26e   : > { %2178 = vrot.lane.b32.xlu1 %v2173_v56, %s4790_s24  ;;  %v1652_v41 = vadd.f32 %v1650_v51, %v1644_v20  ;;  %v1651_v56 = vmul.f32 %v1649_v22, %v4144_v10  ;;  %v2522_v20 = vld [vmem:[#allocation3 + $0xc] sm:$0xff]  ;;  %v4809_v10 = vld [vmem:[#allocation26_spill] sm:$0xff] }
 0x26f   : > { %v1505_v40 = vadd.f32 %v4797_v39, %v1491_v16  ;;  %v1659_v58 = vmul.f32 %v2522_v20, %v1657_v63  ;;  %v4807_v39 = vld [vmem:[#allocation23_spill] sm:$0xff] }
 0x270   : > { %v1599_v57 = vpop.permute.xlu1 %1598  ;;  %v1660_v42 = vadd.f32 %v1658_v18, %v1652_v41 }
 0x271   : > { %v1519_v55 = vadd.f32 %v1515_v29, %v1505_v40  ;;  %v1781_v23 = vpop.permute.xlu0 %1780 }
 0x272   : > { %2192 = vrot.lane.b32.xlu1 %v2187_v25, %s4790_s24  ;;  %v1674_v50 = vadd.f32 %v1669_v24, %v1660_v42  ;;  %v1841_v25 = vstv %s4533_s28  ;;  %v4808_v42 = vld [vmem:[#allocation25_spill] sm:$0xff]  ;;  %s2546_s24 = scalar_lea.vmem %s2545_s20, 512 }
 0x273   : > { %v1533_v61 = vadd.f32 %v4798_v13, %v1519_v55  ;;  %p2548_p1 = scmp.lt.s32.totalorder %s2546_s24, %s2540_s25 }
 0x274   : > { %v1627_v21 = vpop.permute.xlu1 %1626  ;;  %v1688_v33 = vadd.f32 %v4799_v45, %v1674_v50 }
 0x275   : > { %v1547_v38 = vadd.f32 %v1543_v6, %v1533_v61  ;;  %v1809_v47 = vpop.permute.xlu0 %1808  ;;  %p2549_p2 = por %p2548_p1, %p2547_p0 }
 0x276   : > { %v1702_v28 = vadd.f32 %v1697_v52, %v1688_v33 }
 0x277   : > { %v1561_v49 = vadd.f32 %v4800_v60, %v1547_v38  ;;  %p2550_p3 = pnand %p2549_p2, %p2543_p13 }
 0x278   : > { %v1671_v35 = vpop.permute.xlu1 %1670  ;;  %v1716_v11 = vadd.f32 %v4801_v32, %v1702_v28 }
 0x279   : > { %v1575_v48 = vadd.f32 %v1571_v37, %v1561_v49  ;;  %v1853_v29 = vpop.permute.xlu0 %1852  ;;  %v4810_v49 = vld [vmem:[#allocation28_spill] sm:$0xff] }
 0x27a   : > { %v1730_v62 = vadd.f32 %v1725_v5, %v1716_v11  ;;  %v4806_v5 = vld [vmem:[#allocation24_spill] sm:$0xff] }
 0x27b   : > { %v1589_v59 = vadd.f32 %v4802_v2, %v1575_v48 }
 0x27c   : > { %v1699_v15 = vpop.permute.xlu1 %1698  ;;  %v1744_v24 = vadd.f32 %v4803_v31, %v1730_v62 }
 0x27d   : > { %v1603_v53 = vadd.f32 %v1599_v57, %v1589_v59  ;;  %v1881_v6 = vpop.permute.xlu0 %1880  ;;  %v4812_v59 = vld [vmem:[#allocation30_spill] sm:$0xff] }
 0x27e   : > { %v1758_v27 = vadd.f32 %v1753_v19, %v1744_v24  ;;  %v1833_v19 = vstv %s4530_s27  ;;  %v4813_v24 = vld [vmem:[#allocation29_spill] sm:$0xff] }
 0x27f   : > { %v1617_v7 = vadd.f32 %v4804_v30, %v1603_v53  ;;  %v1834_v61 = vmul.f32 %v1833_v19, %v4151_v4 }
 0x280   : > { %v1727_v52 = vpop.permute.xlu1 %1726  ;;  %v1772_v14 = vadd.f32 %v4805_v3, %v1758_v27  ;;  %v4814_v27 = vld [vmem:[#allocation31_spill] sm:$0xff] }
 0x281   : > { %v1631_v9 = vadd.f32 %v1627_v21, %v1617_v7  ;;  %v1909_v34 = vpop.permute.xlu0 %1908  ;;  %v2523_v21 = vld [vmem:[#allocation3 + $0x5] sm:$0xff] }
 0x282   : > { %v1786_v16 = vadd.f32 %v1781_v23, %v1772_v14  ;;  %v1842_v63 = vmul.f32 %v2523_v21, %v1841_v25 }
 0x283   : > { %v1645_v37 = vadd.f32 %v4806_v5, %v1631_v9 }
 0x284   : > { %v1755_v54 = vpop.permute.xlu1 %1754  ;;  %v1800_v40 = vadd.f32 %v4807_v39, %v1786_v16  ;;  %v2524_v39 = vld [vmem:[#allocation3 + $0xd] sm:$0xff] }
 0x285   : > { %v1653_v51 = vadd.f32 %v1651_v56, %v1645_v37  ;;  %v1923_v41 = vpop.permute.xlu0 %1922 }
 0x286   : > { %v1814_v18 = vadd.f32 %v1809_v47, %v1800_v40  ;;  %v1843_v40 = vmul.f32 %v2524_v39, %v1841_v25 }
 0x287   : > { %v1661_v36 = vadd.f32 %v1659_v58, %v1653_v51 }
 0x288   : > { %v1783_v57 = vpop.permute.xlu1 %1782  ;;  %v1828_v13 = vadd.f32 %v4808_v42, %v1814_v18  ;;  %v2017_v18 = vstv %s4549_s29 }
 0x289   : > { %v1675_v55 = vadd.f32 %v1671_v35, %v1661_v36  ;;  %v1937_v50 = vpop.permute.xlu0 %1936  ;;  %v4811_v35 = vld [vmem:[#allocation27_spill] sm:$0xff] }
 0x28a   : > { %v1836_v23 = vadd.f32 %v1834_v61, %v1828_v13  ;;  %v2025_v13 = vstv %s4552_s3 }
 0x28b   : > { %v1689_v22 = vadd.f32 %v4809_v10, %v1675_v55 }
 0x28c   : > { %v1811_v38 = vpop.permute.xlu1 %1810  ;;  %v1844_v33 = vadd.f32 %v1842_v63, %v1836_v23 }
 0x28d   : > { %v1703_v45 = vadd.f32 %v1699_v15, %v1689_v22  ;;  %v1951_v60 = vpop.permute.xlu0 %1950 }
 0x28e   : > { %v1858_v47 = vadd.f32 %v1853_v29, %v1844_v33 }
 0x28f   : > { %v1717_v28 = vadd.f32 %v4810_v49, %v1703_v45 }
 0x290   : > { %v1855_v48 = vpop.permute.xlu1 %1854  ;;  %v1872_v11 = vadd.f32 %v4811_v35, %v1858_v47 }
 0x291   : > { %v1731_v32 = vadd.f32 %v1727_v52, %v1717_v28  ;;  %v1965_v2 = vpop.permute.xlu0 %1964 }
 0x292   : > { %v1886_v62 = vadd.f32 %v1881_v6, %v1872_v11 }
 0x293   : > { %v1745_v4 = vadd.f32 %v4812_v59, %v1731_v32 }
 0x294   : > { %v1883_v53 = vpop.permute.xlu1 %1882  ;;  %v1900_v30 = vadd.f32 %v4813_v24, %v1886_v62 }
 0x295   : > { %v1759_v31 = vadd.f32 %v1755_v54, %v1745_v4  ;;  %v1979_v7 = vpop.permute.xlu0 %1978 }
 0x296   : > { %v1914_v9 = vadd.f32 %v1909_v34, %v1900_v30  ;;  %v1835_v34 = vmul.f32 %v1833_v19, %v4232_v26  ;;  %v2026_v19 = vmul.f32 %v2025_v13, %v4316_v12 }
 0x297   : > { %v1773_v15 = vadd.f32 %v4814_v27, %v1759_v31 }
 0x298   : > { %v1911_v3 = vpop.permute.xlu1 %1910  ;;  %v1928_v5 = vadd.f32 %v1923_v41, %v1914_v9 }
 0x299   : > { %v1787_v14 = vadd.f32 %v1783_v57, %v1773_v15  ;;  %v1993_v29 = vpop.permute.xlu0 %1992 }
 0x29a   : > { %v1942_v37 = vadd.f32 %v1937_v50, %v1928_v5  ;;  %v2018_v50 = vmul.f32 %v2017_v18, %v4296_v44 }
 0x29b   : > { %v1801_v52 = vadd.f32 %v4168_v1, %v1787_v14 }
 0x29c   : > { %v1925_v56 = vpop.permute.xlu1 %1924  ;;  %v1956_v16 = vadd.f32 %v1951_v60, %v1942_v37 }
 0x29d   : > { %v1815_v6 = vadd.f32 %v1811_v38, %v1801_v52  ;;  %v2007_v54 = vpop.permute.xlu0 %2006 }
 0x29e   : > { %v1970_v58 = vadd.f32 %v1965_v2, %v1956_v16 }
 0x29f   : > { %v1829_v20 = vadd.f32 %v4180_v17, %v1815_v6 }
 0x2a0   : > { %v1939_v51 = vpop.permute.xlu1 %1938  ;;  %v1984_v36 = vadd.f32 %v1979_v7, %v1970_v58  ;;  %v2027_v7 = vmul.f32 %v2025_v13, %v4399_v43 }
 0x2a1   : > { %v1837_v41 = vadd.f32 %v1835_v34, %v1829_v20  ;;  %v2037_v1 = vpop.permute.xlu0 %2036 }
 0x2a2   : > { %v1998_v55 = vadd.f32 %v1993_v29, %v1984_v36 }
 0x2a3   : > { %v1845_v57 = vadd.f32 %v1843_v40, %v1837_v41 }
 0x2a4   : > { %v1953_v42 = vpop.permute.xlu1 %1952  ;;  %v2012_v10 = vadd.f32 %v2007_v54, %v1998_v55 }
 0x2a5   : > { %v1859_v61 = vadd.f32 %v1855_v48, %v1845_v57  ;;  %v2051_v22 = vpop.permute.xlu0 %2050 }
 0x2a6   : > { %v2020_v26 = vadd.f32 %v2018_v50, %v2012_v10 }
 0x2a7   : > { %v1873_v17 = vadd.f32 %v4196_v8, %v1859_v61 }
 0x2a8   : > { %v1967_v23 = vpop.permute.xlu1 %1966  ;;  %v2028_v21 = vadd.f32 %v2026_v19, %v2020_v26 }
 0x2a9   : > { %v1887_v25 = vadd.f32 %v1883_v53, %v1873_v17  ;;  %v2065_v63 = vpop.permute.xlu0 %2064 }
 0x2aa   : > { %v2042_v44 = vadd.f32 %v2037_v1, %v2028_v21 }
 0x2ab   : > { %v1901_v38 = vadd.f32 %v4208_v0, %v1887_v25  ;;  %v2019_v0 = vmul.f32 %v2017_v18, %v4384_v46 }
 0x2ac   : > { %v1981_v45 = vpop.permute.xlu1 %1980  ;;  %v2056_v11 = vadd.f32 %v2051_v22, %v2042_v44 }
 0x2ad   : > { %v1915_v33 = vadd.f32 %v1911_v3, %v1901_v38  ;;  %v2079_v60 = vpop.permute.xlu0 %2078 }
 0x2ae   : > { %v2070_v62 = vadd.f32 %v2065_v63, %v2056_v11 }
 0x2af   : > { %v1929_v49 = vadd.f32 %v1925_v56, %v1915_v33 }
 0x2b0   : > { %v1995_v28 = vpop.permute.xlu1 %1994  ;;  %v2084_v27 = vadd.f32 %v2079_v60, %v2070_v62 }
 0x2b1   : > { %v1943_v47 = vadd.f32 %v1939_v51, %v1929_v49  ;;  %v2093_v48 = vpop.permute.xlu0 %2092 }
 0x2b2   : > { %v2098_v14 = vadd.f32 %v2093_v48, %v2084_v27 }
 0x2b3   : > { %v1957_v32 = vadd.f32 %v1953_v42, %v1943_v47 }
 0x2b4   : > { %v2009_v35 = vpop.permute.xlu1 %2008 }
 0x2b5   : > { %v1971_v8 = vadd.f32 %v1967_v23, %v1957_v32  ;;  %v2107_v2 = vpop.permute.xlu0 %2106 }
 0x2b6   : > { %v2112_v29 = vadd.f32 %v2107_v2, %v2098_v14 }
 0x2b7   : > { %v1985_v12 = vadd.f32 %v1981_v45, %v1971_v8 }
 0x2b8   : > { %v2039_v59 = vpop.permute.xlu1 %2038 }
 0x2b9   : > { %v1999_v4 = vadd.f32 %v1995_v28, %v1985_v12  ;;  %v2121_v53 = vpop.permute.xlu0 %2120 }
 0x2ba   : > { %v2126_v37 = vadd.f32 %v2121_v53, %v2112_v29 }
 0x2bb   : > { %v2013_v31 = vadd.f32 %v2009_v35, %v1999_v4 }
 0x2bc   : > { %v2053_v24 = vpop.permute.xlu1 %2052 }
 0x2bd   : > { %v2021_v30 = vadd.f32 %v2019_v0, %v2013_v31  ;;  %v2135_v15 = vpop.permute.xlu0 %2134 }
 0x2be   : > { %v2140_v16 = vadd.f32 %v2135_v15, %v2126_v37 }
 0x2bf   : > { %v2029_v9 = vadd.f32 %v2027_v7, %v2021_v30 }
 0x2c0   : > { %v2067_v3 = vpop.permute.xlu1 %2066 }
 0x2c1   : > { %v2149_v5 = vpop.permute.xlu0 %2148  ;;  %v2043_v6 = vadd.f32 %v2039_v59, %v2029_v9 }
 0x2c2   : > { %v2154_v20 = vadd.f32 %v2149_v5, %v2140_v16 }
 0x2c3   : > { %v2057_v34 = vadd.f32 %v2053_v24, %v2043_v6 }
 0x2c4   : > { %v2081_v52 = vpop.permute.xlu1 %2080 }
 0x2c5   : > { %v2163_v56 = vpop.permute.xlu0 %2162  ;;  %v2071_v40 = vadd.f32 %v2067_v3, %v2057_v34 }
 0x2c6   : > { %v2168_v58 = vadd.f32 %v2163_v56, %v2154_v20 }
 0x2c7   : > { %v2085_v1 = vadd.f32 %v2081_v52, %v2071_v40 }
 0x2c8   : > { %v2095_v54 = vpop.permute.xlu1 %2094 }
 0x2c9   : > { %v2177_v46 = vpop.permute.xlu0 %2176  ;;  %v2099_v55 = vadd.f32 %v2095_v54, %v2085_v1 }
 0x2ca   : > { %v2182_v39 = vadd.f32 %v2177_v46, %v2168_v58 }
 0x2cc   : > { %v2109_v51 = vpop.permute.xlu1 %2108 }
 0x2cd   : > { %v2191_v43 = vpop.permute.xlu0 %2190  ;;  %v2113_v13 = vadd.f32 %v2109_v51, %v2099_v55 }
 0x2ce   : > { %v2196_v41 = vadd.f32 %v2191_v43, %v2182_v39 }
 0x2d0   : > { %v2123_v36 = vpop.permute.xlu1 %2122  ;;  %v2424_v18 = vmul.f32 -1.442695, %v2196_v41 }
 0x2d1   : > { %v2127_v61 = vadd.f32 %v2123_v36, %v2113_v13 }
 0x2d2   : > { %2508 = vpow2.f32 %v2424_v18 }
 0x2d4   : > { %v2137_v57 = vpop.permute.xlu1 %2136 }
 0x2d5   : > { %v2141_v22 = vadd.f32 %v2137_v57, %v2127_v61 }
 0x2d8   : > { %v2151_v42 = vpop.permute.xlu1 %2150 }
 0x2d9   : > { %v2155_v26 = vadd.f32 %v2151_v42, %v2141_v22 }
 0x2dc   : > { %v2165_v50 = vpop.permute.xlu1 %2164  ;;  %v2509_v10 = vpop.eup %2508 }
 0x2dd   : > { %v2204_v17 = vadd.f32 1.0, %v2509_v10  ;;  %v2169_v23 = vadd.f32 %v2165_v50, %v2155_v26 }
 0x2df   : > { %2510 = vrcp.f32 %v2204_v17 }
 0x2e0   : > { %v2179_v19 = vpop.permute.xlu1 %2178 }
 0x2e1   : > { %v2183_v25 = vadd.f32 %v2179_v19, %v2169_v23 }
 0x2e4   : > { %v2193_v21 = vpop.permute.xlu1 %2192 }
 0x2e5   : > { %v2197_v63 = vadd.f32 %v2193_v21, %v2183_v25 }
 0x2e7   : > { %v2425_v38 = vmul.f32 -1.442695, %v2197_v63 }
 0x2e9   : > { %2512 = vpow2.f32 %v2425_v38  ;;  %v2511_v45 = vpop.eup %2510 }
 0x2ea   : > { %2210 = vst.msk [vmem:[%s175_s6] sm:$0xff] %vm315_vm0, %v2511_v45 }
 0x2f3   : > { %v2513_v33 = vpop.eup %2512 }
 0x2f4   : > { %v2205_v60 = vadd.f32 1.0, %v2513_v33 }
 0x2f6   : > { %2514 = vrcp.f32 %v2205_v60 }
 0x300   : > { %v2515_v49 = vpop.eup %2514 }
 0x301   : > { %2211 = vst.msk [vmem:[%s175_s6 + $0x8] sm:$0xff] %vm315_vm0, %v2515_v49 }
 0x302   : > { %2553 = shalt.err (!%p2550_p3)
}
 0x303   : > { %s2554_s26 = scalar_lea.hbm %s4570_s18, 256  ;;  %s2558_s28 = scalar_lea.hbm %s4623_s2, 512 }
 0x304   : > { %p2555_p5 = scmp.ne.s32.totalorder %s4570_s18, %s2554_s26  ;;  %p2559_p9 = scmp.lt.u32.totalorder %s4570_s18, %s4623_s2 }
 0x305   : > { %p2560_p12 = scmp.lt.u32.totalorder %s2558_s28, %s2554_s26  ;;  %p2562_p11 = scmp.lt.u32.totalorder %s2554_s26, %s4570_s18 }
 0x306   : > { %p2556_p6 = pnand %p2555_p5, %p2690_p4 }
 0x307   : > { %p2561_p10 = por %p2560_p12, %p2559_p9 }
 0x308   : > { %p2557_p7 = pneg %p2556_p6 }
 0x309   : > { %p2563_p13 = por %p2562_p11, %p2561_p10 }
 0x30b   : > { %p2564_p0 = pnand %p2563_p13, %p2557_p7 }
 0x30d   : > { %2567 = shalt.err (!%p2564_p0)
}
 0x30e   : > { %s2633_s4 = smov 128   ;;  %s2634_s5 = smov 8  }
 0x30f   : > { %2437 = dma.vmem_to_hbm [thread:$0]  (%p2690_p4), %s4572_s8, 256, %s4570_s18, %s4575_s23, %s2633_s4, %s2633_s4, %s2634_s5  }
 0x310 PF: > { %p2449_p1 = scmp.ge.s32.totalorder %s2622_s14, 2  ;;  %s2241_s6 = sand.u32 1, %s2602_s9  }
 0x311   : > { %s2242_s7 = scalar_lea.sflag [#allocation5], %s2241_s6 }
 0x312   : > { %p2444_p2 = pnand %p2449_p1, %p2697_p8 }
 0x314   : > { %2597 = dma.done.wait (!%p2444_p2), %s2242_s7, 256  }
 0x315   : > { %2599 = vsyncadd (!%p2444_p2), %s2242_s7, 4294967040  ;;  %s16_s14 = sadd.s32 1, %s2622_s14   ;;  %s4815_s9 = smov %s2606_s10 }
 0x316   : > { %p13_p3 = scmp.ge.s32.totalorder %s16_s14, 4   ;;  %s4816_s10 = smov %s2610_s11 }
 0x317   : > { %s4817_s11 = smov %s2703_s22  ;;  %s4818_s12 = smov %s2618_s13 }
 0x318   : > { %s4819_s13 = smov %s4821_s17  ;;  %15 = sbr.rel (!%p13_p3) target bundleno = 5 (0x5), region = 80 }
 0x31f   :  { %2247 = vsyncpa [#allocation5], 1 }
 0x320   :  { %2249 = vsyncpa [#allocation5 + $0x1], 1 }
 0x321   :  { %2250 = vsyncpa [#allocation6], 1 }
 0x322   :  { %2252 = vsyncpa [#allocation6 + $0x1], 1 }

</bundles_post_ra>
